<compile_context>
chip_gen: v6e
topology: v6e:2x2x1
jax: 0.10.0
libtpu: 0.0.40
codegen_flags: <defaults>
</compile_context>

<pallas_src>
import functools

import jax
import jax.numpy as jnp
from jax import lax
from jax.experimental import pallas as pl
from jax.experimental.pallas import tpu as pltpu


def _sam_kernel(x_ref, w_ref, b_ref, o_ref,
                sum_ref, max_ref, pad_ref, col_ref,
                *, ksize, n_channels):
    # x_ref  : (Cc, H, W)   VMEM, one channel chunk of one batch element (NCHW, batch squeezed)
    # w_ref  : (2*K*K,)     SMEM, flattened conv weight (cin-major, kh, kw)
    # b_ref  : (1,)         SMEM, conv bias
    # o_ref  : (H, W)       VMEM output block (full spatial extent)
    # sum_ref: (H, W)       f32 running channel sum (persists across the chunk axis)
    # max_ref: (H, W)       f32 running channel max
    # pad_ref: (2, H+K-1, W+K-1) f32 zero-padded avg/max planes
    # col_ref: (H+K-1, W)   f32 kw-realigned slab (lane shift hoisted out of tap loop)
    Cc, H, W = x_ref.shape
    K = ksize
    p = (K - 1) // 2
    Wp = W + K - 1
    k = pl.program_id(1)

    # ---- streamed per-plane reduction over this channel chunk (bounded live set) ----
    v0 = x_ref[0].astype(jnp.float32)
    s = v0
    m = v0
    for c in range(1, Cc):
        v = x_ref[c].astype(jnp.float32)
        s = s + v
        m = jnp.maximum(m, v)

    @pl.when(k == 0)
    def _init():
        sum_ref[...] = s
        max_ref[...] = m

    @pl.when(k > 0)
    def _accumulate():
        sum_ref[...] = sum_ref[...] + s
        max_ref[...] = jnp.maximum(max_ref[...], m)

    # ---- finalize (last channel chunk): pad -> 7x7 conv -> sigmoid -----------------
    @pl.when(k == pl.num_programs(1) - 1)
    def _finalize():
        avg = sum_ref[...] * (1.0 / n_channels)
        mx = max_ref[...]

        # Zero only the halo strips; the interior is fully overwritten just below.
        pad_ref[:, :p, :] = jnp.zeros((2, p, Wp), jnp.float32)
        pad_ref[:, p + H:, :] = jnp.zeros((2, p, Wp), jnp.float32)
        pad_ref[:, p:p + H, :p] = jnp.zeros((2, H, p), jnp.float32)
        pad_ref[:, p:p + H, p + W:] = jnp.zeros((2, H, p), jnp.float32)
        pad_ref[0, p:p + H, p:p + W] = avg
        pad_ref[1, p:p + H, p:p + W] = mx

        # 7x7 conv (2 -> 1 channel) on the VPU: hoist the lane-misaligned kw shift out
        # of the tap loop (14 slab copies), inner kh taps are address-offset loads.
        # 4 independent partial accumulators restore VALU ILP.
        parts = [jnp.zeros((H, W), jnp.float32) for _ in range(4)]
        parts[0] = parts[0] + b_ref[0]
        for c in range(2):
            for kw in range(K):
                col_ref[...] = pad_ref[c, :, kw:kw + W]          # one lane realign
                for kh in range(K):
                    wv = w_ref[c * K * K + kh * K + kw]          # SMEM scalar
                    pi = (kh + kw) % 4
                    parts[pi] = parts[pi] + col_ref[kh:kh + H, :] * wv
        acc = (parts[0] + parts[1]) + (parts[2] + parts[3])

        # sigmoid: EUP exp + EUP approx reciprocal, 2 Newton refinements (f32-exact).
        den = 1.0 + jnp.exp(-acc)
        r = pl.reciprocal(den, approx=True)
        r = r * (2.0 - den * r)
        r = r * (2.0 - den * r)
        o_ref[...] = r.astype(o_ref.dtype)


def _pick_channel_chunk(C, H, W, itemsize, max_bytes=512 * 1024, max_cc=64):
    """Largest divisor of C whose (Cc, H, W) block stays small (VMEM/vreg friendly)."""
    cap = max(1, min(max_cc, max_bytes // max(1, H * W * itemsize)))
    best = 1
    for d in range(1, C + 1):
        if C % d == 0 and d <= cap:
            best = d
    return best


def spatial_attention(x, conv_w, conv_b):
    """SpatialAttentionModule.forward. x: (B, C, H, W); conv_w: (1, 2, K, K); conv_b: (1,)."""
    B, C, H, W = x.shape
    K = conv_w.shape[-1]

    w_flat = conv_w.reshape(-1).astype(jnp.float32)    # (2*K*K,)
    b = conv_b.astype(jnp.float32)                     # (1,)

    cc = _pick_channel_chunk(C, H, W, x.dtype.itemsize)
    n_chunks = C // cc

    itemsize = x.dtype.itemsize
    cost = pl.CostEstimate(
        flops=int(B * H * W * (2 * 2 * K * K + 2 * C + 6)),
        transcendentals=int(2 * B * H * W),
        bytes_accessed=int(x.size * itemsize + B * H * W * itemsize
                           + (w_flat.size + b.size) * 4),
    )

    return pl.pallas_call(
        functools.partial(_sam_kernel, ksize=K, n_channels=C),
        out_shape=jax.ShapeDtypeStruct((B, 1, H, W), x.dtype),
        grid_spec=pltpu.PrefetchScalarGridSpec(
            num_scalar_prefetch=0,
            grid=(B, n_chunks),
            in_specs=[
                pl.BlockSpec((None, cc, H, W), lambda bb, kk: (bb, kk, 0, 0)),
                pl.BlockSpec(memory_space=pltpu.MemorySpace.SMEM),   # conv weights
                pl.BlockSpec(memory_space=pltpu.MemorySpace.SMEM),   # conv bias
            ],
            out_specs=pl.BlockSpec((None, None, H, W), lambda bb, kk: (bb, 0, 0, 0)),
            scratch_shapes=[
                pltpu.VMEM((H, W), jnp.float32),                      # running channel sum
                pltpu.VMEM((H, W), jnp.float32),                      # running channel max
                pltpu.VMEM((2, H + K - 1, W + K - 1), jnp.float32),   # zero-padded planes
                pltpu.VMEM((H + K - 1, W), jnp.float32),              # kw-realigned slab
            ],
        ),
        compiler_params=pltpu.CompilerParams(
            dimension_semantics=("parallel", "arbitrary"),
            vmem_limit_bytes=32 * 1024 * 1024),
        cost_estimate=cost,
    )(x, w_flat, b)


def _reference(x, conv_w, conv_b):
    avg = jnp.mean(x, axis=1, keepdims=True)
    mx = jnp.max(x, axis=1, keepdims=True)
    s = jnp.concatenate([avg, mx], axis=1)                        # (B, 2, H, W)
    pad = (conv_w.shape[-1] - 1) // 2
    y = lax.conv_general_dilated(
        s, conv_w, window_strides=(1, 1), padding=((pad, pad), (pad, pad)),
        dimension_numbers=("NCHW", "OIHW", "NCHW"),
        precision=lax.Precision.HIGHEST)
    y = y + conv_b.reshape(1, -1, 1, 1)
    return jax.nn.sigmoid(y)


if __name__ == "__main__":
    key = jax.random.PRNGKey(0)
    k_x, k_w, k_b = jax.random.split(key, 3)

    B, C, H, W = 2, 4, 16, 16
    x = jax.random.normal(k_x, (B, C, H, W), dtype=jnp.float32)
    # PyTorch parameter shapes: Conv2d(2, 1, kernel_size=7) -> weight (1,2,7,7), bias (1,)
    conv_w = jax.random.normal(k_w, (1, 2, 7, 7), dtype=jnp.float32) * 0.1
    conv_b = jax.random.normal(k_b, (1,), dtype=jnp.float32) * 0.1

    out = jax.block_until_ready(spatial_attention(x, conv_w, conv_b))
    ref = jax.block_until_ready(_reference(x, conv_w, conv_b))

    assert out.shape == (B, 1, H, W), out.shape
    max_err = float(jnp.max(jnp.abs(out - ref)))
    assert jnp.allclose(out, ref, rtol=1e-5, atol=1e-5), max_err

    print("KERNEL_OK")
</pallas_src>

<mosaic_0001>
module attributes {stable_mosaic.version = 11 : i64} {
  func.func @_sam_kernel(%arg0: i32, %arg1: i32, %arg2: memref<1x4x16x16xf32, #tpu.memory_space<vmem>>, %arg3: memref<98xf32, #tpu.memory_space<smem>>, %arg4: memref<1xf32, #tpu.memory_space<smem>>, %arg5: memref<1x1x16x16xf32, #tpu.memory_space<vmem>>, %arg6: memref<16x16xf32, #tpu.memory_space<vmem>>, %arg7: memref<16x16xf32, #tpu.memory_space<vmem>>, %arg8: memref<2x22x22xf32, #tpu.memory_space<vmem>>, %arg9: memref<22x16xf32, #tpu.memory_space<vmem>>) attributes {dimension_semantics = [#tpu.dimension_semantics<parallel>, #tpu.dimension_semantics<arbitrary>], iteration_bounds = array<i64: 2, 1>, scalar_prefetch = 0 : i64, scratch_operands = 4 : i64, tpu.core_type = #tpu.core_type<tc>, window_params = [{transform_indices = @transform_0, window_bounds = array<i64: 1, 4, 16, 16>}, {transform_indices = @transform_1, window_bounds = array<i64: 98>}, {transform_indices = @transform_2, window_bounds = array<i64: 1>}, {transform_indices = @transform_3, window_bounds = array<i64: 1, 1, 16, 16>}]} {
    %c0 = arith.constant 0 : index
    %c0_0 = arith.constant 0 : index
    %c0_1 = arith.constant 0 : index
    %c0_2 = arith.constant 0 : index
    %0 = vector.load %arg2[%c0, %c0_0, %c0_1, %c0_2] : memref<1x4x16x16xf32, #tpu.memory_space<vmem>>, vector<1x1x16x16xf32>
    %1 = vector.shape_cast %0 : vector<1x1x16x16xf32> to vector<16x16xf32>
    %c0_3 = arith.constant 0 : index
    %c1 = arith.constant 1 : index
    %c0_4 = arith.constant 0 : index
    %c0_5 = arith.constant 0 : index
    %2 = vector.load %arg2[%c0_3, %c1, %c0_4, %c0_5] : memref<1x4x16x16xf32, #tpu.memory_space<vmem>>, vector<1x1x16x16xf32>
    %3 = vector.shape_cast %2 : vector<1x1x16x16xf32> to vector<16x16xf32>
    %4 = arith.addf %1, %3 : vector<16x16xf32>
    %5 = arith.maximumf %1, %3 : vector<16x16xf32>
    %c0_6 = arith.constant 0 : index
    %c2 = arith.constant 2 : index
    %c0_7 = arith.constant 0 : index
    %c0_8 = arith.constant 0 : index
    %6 = vector.load %arg2[%c0_6, %c2, %c0_7, %c0_8] : memref<1x4x16x16xf32, #tpu.memory_space<vmem>>, vector<1x1x16x16xf32>
    %7 = vector.shape_cast %6 : vector<1x1x16x16xf32> to vector<16x16xf32>
    %8 = arith.addf %4, %7 : vector<16x16xf32>
    %9 = arith.maximumf %5, %7 : vector<16x16xf32>
    %c0_9 = arith.constant 0 : index
    %c3 = arith.constant 3 : index
    %c0_10 = arith.constant 0 : index
    %c0_11 = arith.constant 0 : index
    %10 = vector.load %arg2[%c0_9, %c3, %c0_10, %c0_11] : memref<1x4x16x16xf32, #tpu.memory_space<vmem>>, vector<1x1x16x16xf32>
    %11 = vector.shape_cast %10 : vector<1x1x16x16xf32> to vector<16x16xf32>
    %12 = arith.addf %8, %11 : vector<16x16xf32>
    %13 = arith.maximumf %9, %11 : vector<16x16xf32>
    %c0_i32 = arith.constant 0 : i32
    %14 = arith.cmpi eq, %arg1, %c0_i32 : i32
    %15 = arith.extui %14 : i1 to i32
    %c0_i32_12 = arith.constant 0 : i32
    %16 = arith.cmpi ne, %15, %c0_i32_12 : i32
    scf.if %16 {
      %c0_17 = arith.constant 0 : index
      %c0_18 = arith.constant 0 : index
      %23 = vector.load %arg6[%c0_17, %c0_18] : memref<16x16xf32, #tpu.memory_space<vmem>>, vector<16x16xf32>
      tpu.vector_store %arg6[%c0_17, %c0_18], %12 {strides = array<i32>} : memref<16x16xf32, #tpu.memory_space<vmem>>, vector<16x16xf32>,
      %c0_19 = arith.constant 0 : index
      %c0_20 = arith.constant 0 : index
      %24 = vector.load %arg7[%c0_19, %c0_20] : memref<16x16xf32, #tpu.memory_space<vmem>>, vector<16x16xf32>
      tpu.vector_store %arg7[%c0_19, %c0_20], %13 {strides = array<i32>} : memref<16x16xf32, #tpu.memory_space<vmem>>, vector<16x16xf32>,
    } else {
    }
    %c0_i32_13 = arith.constant 0 : i32
    %17 = arith.cmpi sgt, %arg1, %c0_i32_13 : i32
    %18 = arith.extui %17 : i1 to i32
    %c0_i32_14 = arith.constant 0 : i32
    %19 = arith.cmpi ne, %18, %c0_i32_14 : i32
    scf.if %19 {
      %c0_17 = arith.constant 0 : index
      %c0_18 = arith.constant 0 : index
      %23 = vector.load %arg6[%c0_17, %c0_18] : memref<16x16xf32, #tpu.memory_space<vmem>>, vector<16x16xf32>
      %24 = arith.addf %23, %12 : vector<16x16xf32>
      %c0_19 = arith.constant 0 : index
      %c0_20 = arith.constant 0 : index
      %25 = vector.load %arg6[%c0_19, %c0_20] : memref<16x16xf32, #tpu.memory_space<vmem>>, vector<16x16xf32>
      tpu.vector_store %arg6[%c0_19, %c0_20], %24 {strides = array<i32>} : memref<16x16xf32, #tpu.memory_space<vmem>>, vector<16x16xf32>,
      %c0_21 = arith.constant 0 : index
      %c0_22 = arith.constant 0 : index
      %26 = vector.load %arg7[%c0_21, %c0_22] : memref<16x16xf32, #tpu.memory_space<vmem>>, vector<16x16xf32>
      %27 = arith.maximumf %26, %13 : vector<16x16xf32>
      %c0_23 = arith.constant 0 : index
      %c0_24 = arith.constant 0 : index
      %28 = vector.load %arg7[%c0_23, %c0_24] : memref<16x16xf32, #tpu.memory_space<vmem>>, vector<16x16xf32>
      tpu.vector_store %arg7[%c0_23, %c0_24], %27 {strides = array<i32>} : memref<16x16xf32, #tpu.memory_space<vmem>>, vector<16x16xf32>,
    } else {
    }
    %c0_i32_15 = arith.constant 0 : i32
    %20 = arith.cmpi eq, %arg1, %c0_i32_15 : i32
    %21 = arith.extui %20 : i1 to i32
    %c0_i32_16 = arith.constant 0 : i32
    %22 = arith.cmpi ne, %21, %c0_i32_16 : i32
    scf.if %22 {
      %c0_17 = arith.constant 0 : index
      %c0_18 = arith.constant 0 : index
      %23 = vector.load %arg6[%c0_17, %c0_18] : memref<16x16xf32, #tpu.memory_space<vmem>>, vector<16x16xf32>
      %cst = arith.constant 2.500000e-01 : f32
      %24 = vector.broadcast %cst : f32 to vector<16x16xf32>
      %25 = arith.mulf %23, %24 : vector<16x16xf32>
      %c0_19 = arith.constant 0 : index
      %c0_20 = arith.constant 0 : index
      %26 = vector.load %arg7[%c0_19, %c0_20] : memref<16x16xf32, #tpu.memory_space<vmem>>, vector<16x16xf32>
      %cst_21 = arith.constant 0.000000e+00 : f32
      %27 = vector.broadcast %cst_21 : f32 to vector<2x3x22xf32>
      %c0_22 = arith.constant 0 : index
      %c0_23 = arith.constant 0 : index
      %c0_24 = arith.constant 0 : index
      %28 = vector.load %arg8[%c0_22, %c0_23, %c0_24] : memref<2x22x22xf32, #tpu.memory_space<vmem>>, vector<2x3x22xf32>
      tpu.vector_store %arg8[%c0_22, %c0_23, %c0_24], %27 {strides = array<i32>} : memref<2x22x22xf32, #tpu.memory_space<vmem>>, vector<2x3x22xf32>,
      %cst_25 = arith.constant 0.000000e+00 : f32
      %29 = vector.broadcast %cst_25 : f32 to vector<2x3x22xf32>
      %c0_26 = arith.constant 0 : index
      %c19 = arith.constant 19 : index
      %c0_27 = arith.constant 0 : index
      %30 = vector.load %arg8[%c0_26, %c19, %c0_27] : memref<2x22x22xf32, #tpu.memory_space<vmem>>, vector<2x3x22xf32>
      tpu.vector_store %arg8[%c0_26, %c19, %c0_27], %29 {strides = array<i32>} : memref<2x22x22xf32, #tpu.memory_space<vmem>>, vector<2x3x22xf32>,
      %cst_28 = arith.constant 0.000000e+00 : f32
      %31 = vector.broadcast %cst_28 : f32 to vector<2x16x3xf32>
      %c0_29 = arith.constant 0 : index
      %c3_30 = arith.constant 3 : index
      %c0_31 = arith.constant 0 : index
      %32 = vector.load %arg8[%c0_29, %c3_30, %c0_31] : memref<2x22x22xf32, #tpu.memory_space<vmem>>, vector<2x16x3xf32>
      tpu.vector_store %arg8[%c0_29, %c3_30, %c0_31], %31 {strides = array<i32>} : memref<2x22x22xf32, #tpu.memory_space<vmem>>, vector<2x16x3xf32>,
      %cst_32 = arith.constant 0.000000e+00 : f32
      %33 = vector.broadcast %cst_32 : f32 to vector<2x16x3xf32>
      %c0_33 = arith.constant 0 : index
      %c3_34 = arith.constant 3 : index
      %c19_35 = arith.constant 19 : index
      %34 = vector.load %arg8[%c0_33, %c3_34, %c19_35] : memref<2x22x22xf32, #tpu.memory_space<vmem>>, vector<2x16x3xf32>
      tpu.vector_store %arg8[%c0_33, %c3_34, %c19_35], %33 {strides = array<i32>} : memref<2x22x22xf32, #tpu.memory_space<vmem>>, vector<2x16x3xf32>,
      %c0_36 = arith.constant 0 : index
      %c3_37 = arith.constant 3 : index
      %c3_38 = arith.constant 3 : index
      %35 = vector.load %arg8[%c0_36, %c3_37, %c3_38] : memref<2x22x22xf32, #tpu.memory_space<vmem>>, vector<1x16x16xf32>
      %36 = vector.shape_cast %35 : vector<1x16x16xf32> to vector<16x16xf32>
      %37 = vector.shape_cast %25 : vector<16x16xf32> to vector<1x16x16xf32>
      tpu.vector_store %arg8[%c0_36, %c3_37, %c3_38], %37 {strides = array<i32>} : memref<2x22x22xf32, #tpu.memory_space<vmem>>, vector<1x16x16xf32>,
      %c1_39 = arith.constant 1 : index
      %c3_40 = arith.constant 3 : index
      %c3_41 = arith.constant 3 : index
      %38 = vector.load %arg8[%c1_39, %c3_40, %c3_41] : memref<2x22x22xf32, #tpu.memory_space<vmem>>, vector<1x16x16xf32>
      %39 = vector.shape_cast %38 : vector<1x16x16xf32> to vector<16x16xf32>
      %40 = vector.shape_cast %26 : vector<16x16xf32> to vector<1x16x16xf32>
      tpu.vector_store %arg8[%c1_39, %c3_40, %c3_41], %40 {strides = array<i32>} : memref<2x22x22xf32, #tpu.memory_space<vmem>>, vector<1x16x16xf32>,
      %cst_42 = arith.constant 0.000000e+00 : f32
      %41 = vector.broadcast %cst_42 : f32 to vector<16x16xf32>
      %cst_43 = arith.constant 0.000000e+00 : f32
      %42 = vector.broadcast %cst_43 : f32 to vector<16x16xf32>
      %cst_44 = arith.constant 0.000000e+00 : f32
      %43 = vector.broadcast %cst_44 : f32 to vector<16x16xf32>
      %cst_45 = arith.constant 0.000000e+00 : f32
      %44 = vector.broadcast %cst_45 : f32 to vector<16x16xf32>
      %c0_46 = arith.constant 0 : index
      %45 = memref.load %arg4[%c0_46] : memref<1xf32, #tpu.memory_space<smem>>
      %46 = vector.broadcast %45 : f32 to vector<16x16xf32>
      %47 = arith.addf %41, %46 : vector<16x16xf32>
      %c0_47 = arith.constant 0 : index
      %c0_48 = arith.constant 0 : index
      %c0_49 = arith.constant 0 : index
      %48 = vector.load %arg8[%c0_47, %c0_48, %c0_49] : memref<2x22x22xf32, #tpu.memory_space<vmem>>, vector<1x22x16xf32>
      %49 = vector.shape_cast %48 : vector<1x22x16xf32> to vector<22x16xf32>
      %c0_50 = arith.constant 0 : index
      %c0_51 = arith.constant 0 : index
      %50 = vector.load %arg9[%c0_50, %c0_51] : memref<22x16xf32, #tpu.memory_space<vmem>>, vector<22x16xf32>
      tpu.vector_store %arg9[%c0_50, %c0_51], %49 {strides = array<i32>} : memref<22x16xf32, #tpu.memory_space<vmem>>, vector<22x16xf32>,
      %c0_52 = arith.constant 0 : index
      %51 = memref.load %arg3[%c0_52] : memref<98xf32, #tpu.memory_space<smem>>
      %c0_53 = arith.constant 0 : index
      %c0_54 = arith.constant 0 : index
      %52 = vector.load %arg9[%c0_53, %c0_54] : memref<22x16xf32, #tpu.memory_space<vmem>>, vector<16x16xf32>
      %53 = vector.broadcast %51 : f32 to vector<16x16xf32>
      %54 = arith.mulf %52, %53 : vector<16x16xf32>
      %55 = arith.addf %47, %54 : vector<16x16xf32>
      %c7 = arith.constant 7 : index
      %56 = memref.load %arg3[%c7] : memref<98xf32, #tpu.memory_space<smem>>
      %c1_55 = arith.constant 1 : index
      %c0_56 = arith.constant 0 : index
      %57 = vector.load %arg9[%c1_55, %c0_56] : memref<22x16xf32, #tpu.memory_space<vmem>>, vector<16x16xf32>
      %58 = vector.broadcast %56 : f32 to vector<16x16xf32>
      %59 = arith.mulf %57, %58 : vector<16x16xf32>
      %60 = arith.addf %42, %59 : vector<16x16xf32>
      %c14 = arith.constant 14 : index
      %61 = memref.load %arg3[%c14] : memref<98xf32, #tpu.memory_space<smem>>
      %c2_57 = arith.constant 2 : index
      %c0_58 = arith.constant 0 : index
      %62 = vector.load %arg9[%c2_57, %c0_58] : memref<22x16xf32, #tpu.memory_space<vmem>>, vector<16x16xf32>
      %63 = vector.broadcast %61 : f32 to vector<16x16xf32>
      %64 = arith.mulf %62, %63 : vector<16x16xf32>
      %65 = arith.addf %43, %64 : vector<16x16xf32>
      %c21 = arith.constant 21 : index
      %66 = memref.load %arg3[%c21] : memref<98xf32, #tpu.memory_space<smem>>
      %c3_59 = arith.constant 3 : index
      %c0_60 = arith.constant 0 : index
      %67 = vector.load %arg9[%c3_59, %c0_60] : memref<22x16xf32, #tpu.memory_space<vmem>>, vector<16x16xf32>
      %68 = vector.broadcast %66 : f32 to vector<16x16xf32>
      %69 = arith.mulf %67, %68 : vector<16x16xf32>
      %70 = arith.addf %44, %69 : vector<16x16xf32>
      %c28 = arith.constant 28 : index
      %71 = memref.load %arg3[%c28] : memref<98xf32, #tpu.memory_space<smem>>
      %c4 = arith.constant 4 : index
      %c0_61 = arith.constant 0 : index
      %72 = vector.load %arg9[%c4, %c0_61] : memref<22x16xf32, #tpu.memory_space<vmem>>, vector<16x16xf32>
      %73 = vector.broadcast %71 : f32 to vector<16x16xf32>
      %74 = arith.mulf %72, %73 : vector<16x16xf32>
      %75 = arith.addf %55, %74 : vector<16x16xf32>
      %c35 = arith.constant 35 : index
      %76 = memref.load %arg3[%c35] : memref<98xf32, #tpu.memory_space<smem>>
      %c5 = arith.constant 5 : index
      %c0_62 = arith.constant 0 : index
      %77 = vector.load %arg9[%c5, %c0_62] : memref<22x16xf32, #tpu.memory_space<vmem>>, vector<16x16xf32>
      %78 = vector.broadcast %76 : f32 to vector<16x16xf32>
      %79 = arith.mulf %77, %78 : vector<16x16xf32>
      %80 = arith.addf %60, %79 : vector<16x16xf32>
      %c42 = arith.constant 42 : index
      %81 = memref.load %arg3[%c42] : memref<98xf32, #tpu.memory_space<smem>>
      %c6 = arith.constant 6 : index
      %c0_63 = arith.constant 0 : index
      %82 = vector.load %arg9[%c6, %c0_63] : memref<22x16xf32, #tpu.memory_space<vmem>>, vector<16x16xf32>
      %83 = vector.broadcast %81 : f32 to vector<16x16xf32>
      %84 = arith.mulf %82, %83 : vector<16x16xf32>
      %85 = arith.addf %65, %84 : vector<16x16xf32>
      %c0_64 = arith.constant 0 : index
      %c0_65 = arith.constant 0 : index
      %c1_66 = arith.constant 1 : index
      %86 = vector.load %arg8[%c0_64, %c0_65, %c1_66] : memref<2x22x22xf32, #tpu.memory_space<vmem>>, vector<1x22x16xf32>
      %87 = vector.shape_cast %86 : vector<1x22x16xf32> to vector<22x16xf32>
      %c0_67 = arith.constant 0 : index
      %c0_68 = arith.constant 0 : index
      %88 = vector.load %arg9[%c0_67, %c0_68] : memref<22x16xf32, #tpu.memory_space<vmem>>, vector<22x16xf32>
      tpu.vector_store %arg9[%c0_67, %c0_68], %87 {strides = array<i32>} : memref<22x16xf32, #tpu.memory_space<vmem>>, vector<22x16xf32>,
      %c1_69 = arith.constant 1 : index
      %89 = memref.load %arg3[%c1_69] : memref<98xf32, #tpu.memory_space<smem>>
      %c0_70 = arith.constant 0 : index
      %c0_71 = arith.constant 0 : index
      %90 = vector.load %arg9[%c0_70, %c0_71] : memref<22x16xf32, #tpu.memory_space<vmem>>, vector<16x16xf32>
      %91 = vector.broadcast %89 : f32 to vector<16x16xf32>
      %92 = arith.mulf %90, %91 : vector<16x16xf32>
      %93 = arith.addf %80, %92 : vector<16x16xf32>
      %c8 = arith.constant 8 : index
      %94 = memref.load %arg3[%c8] : memref<98xf32, #tpu.memory_space<smem>>
      %c1_72 = arith.constant 1 : index
      %c0_73 = arith.constant 0 : index
      %95 = vector.load %arg9[%c1_72, %c0_73] : memref<22x16xf32, #tpu.memory_space<vmem>>, vector<16x16xf32>
      %96 = vector.broadcast %94 : f32 to vector<16x16xf32>
      %97 = arith.mulf %95, %96 : vector<16x16xf32>
      %98 = arith.addf %85, %97 : vector<16x16xf32>
      %c15 = arith.constant 15 : index
      %99 = memref.load %arg3[%c15] : memref<98xf32, #tpu.memory_space<smem>>
      %c2_74 = arith.constant 2 : index
      %c0_75 = arith.constant 0 : index
      %100 = vector.load %arg9[%c2_74, %c0_75] : memref<22x16xf32, #tpu.memory_space<vmem>>, vector<16x16xf32>
      %101 = vector.broadcast %99 : f32 to vector<16x16xf32>
      %102 = arith.mulf %100, %101 : vector<16x16xf32>
      %103 = arith.addf %70, %102 : vector<16x16xf32>
      %c22 = arith.constant 22 : index
      %104 = memref.load %arg3[%c22] : memref<98xf32, #tpu.memory_space<smem>>
      %c3_76 = arith.constant 3 : index
      %c0_77 = arith.constant 0 : index
      %105 = vector.load %arg9[%c3_76, %c0_77] : memref<22x16xf32, #tpu.memory_space<vmem>>, vector<16x16xf32>
      %106 = vector.broadcast %104 : f32 to vector<16x16xf32>
      %107 = arith.mulf %105, %106 : vector<16x16xf32>
      %108 = arith.addf %75, %107 : vector<16x16xf32>
      %c29 = arith.constant 29 : index
      %109 = memref.load %arg3[%c29] : memref<98xf32, #tpu.memory_space<smem>>
      %c4_78 = arith.constant 4 : index
      %c0_79 = arith.constant 0 : index
      %110 = vector.load %arg9[%c4_78, %c0_79] : memref<22x16xf32, #tpu.memory_space<vmem>>, vector<16x16xf32>
      %111 = vector.broadcast %109 : f32 to vector<16x16xf32>
      %112 = arith.mulf %110, %111 : vector<16x16xf32>
      %113 = arith.addf %93, %112 : vector<16x16xf32>
      %c36 = arith.constant 36 : index
      %114 = memref.load %arg3[%c36] : memref<98xf32, #tpu.memory_space<smem>>
      %c5_80 = arith.constant 5 : index
      %c0_81 = arith.constant 0 : index
      %115 = vector.load %arg9[%c5_80, %c0_81] : memref<22x16xf32, #tpu.memory_space<vmem>>, vector<16x16xf32>
      %116 = vector.broadcast %114 : f32 to vector<16x16xf32>
      %117 = arith.mulf %115, %116 : vector<16x16xf32>
      %118 = arith.addf %98, %117 : vector<16x16xf32>
      %c43 = arith.constant 43 : index
      %119 = memref.load %arg3[%c43] : memref<98xf32, #tpu.memory_space<smem>>
      %c6_82 = arith.constant 6 : index
      %c0_83 = arith.constant 0 : index
      %120 = vector.load %arg9[%c6_82, %c0_83] : memref<22x16xf32, #tpu.memory_space<vmem>>, vector<16x16xf32>
      %121 = vector.broadcast %119 : f32 to vector<16x16xf32>
      %122 = arith.mulf %120, %121 : vector<16x16xf32>
      %123 = arith.addf %103, %122 : vector<16x16xf32>
      %c0_84 = arith.constant 0 : index
      %c0_85 = arith.constant 0 : index
      %c2_86 = arith.constant 2 : index
      %124 = vector.load %arg8[%c0_84, %c0_85, %c2_86] : memref<2x22x22xf32, #tpu.memory_space<vmem>>, vector<1x22x16xf32>
      %125 = vector.shape_cast %124 : vector<1x22x16xf32> to vector<22x16xf32>
      %c0_87 = arith.constant 0 : index
      %c0_88 = arith.constant 0 : index
      %126 = vector.load %arg9[%c0_87, %c0_88] : memref<22x16xf32, #tpu.memory_space<vmem>>, vector<22x16xf32>
      tpu.vector_store %arg9[%c0_87, %c0_88], %125 {strides = array<i32>} : memref<22x16xf32, #tpu.memory_space<vmem>>, vector<22x16xf32>,
      %c2_89 = arith.constant 2 : index
      %127 = memref.load %arg3[%c2_89] : memref<98xf32, #tpu.memory_space<smem>>
      %c0_90 = arith.constant 0 : index
      %c0_91 = arith.constant 0 : index
      %128 = vector.load %arg9[%c0_90, %c0_91] : memref<22x16xf32, #tpu.memory_space<vmem>>, vector<16x16xf32>
      %129 = vector.broadcast %127 : f32 to vector<16x16xf32>
      %130 = arith.mulf %128, %129 : vector<16x16xf32>
      %131 = arith.addf %118, %130 : vector<16x16xf32>
      %c9 = arith.constant 9 : index
      %132 = memref.load %arg3[%c9] : memref<98xf32, #tpu.memory_space<smem>>
      %c1_92 = arith.constant 1 : index
      %c0_93 = arith.constant 0 : index
      %133 = vector.load %arg9[%c1_92, %c0_93] : memref<22x16xf32, #tpu.memory_space<vmem>>, vector<16x16xf32>
      %134 = vector.broadcast %132 : f32 to vector<16x16xf32>
      %135 = arith.mulf %133, %134 : vector<16x16xf32>
      %136 = arith.addf %123, %135 : vector<16x16xf32>
      %c16 = arith.constant 16 : index
      %137 = memref.load %arg3[%c16] : memref<98xf32, #tpu.memory_space<smem>>
      %c2_94 = arith.constant 2 : index
      %c0_95 = arith.constant 0 : index
      %138 = vector.load %arg9[%c2_94, %c0_95] : memref<22x16xf32, #tpu.memory_space<vmem>>, vector<16x16xf32>
      %139 = vector.broadcast %137 : f32 to vector<16x16xf32>
      %140 = arith.mulf %138, %139 : vector<16x16xf32>
      %141 = arith.addf %108, %140 : vector<16x16xf32>
      %c23 = arith.constant 23 : index
      %142 = memref.load %arg3[%c23] : memref<98xf32, #tpu.memory_space<smem>>
      %c3_96 = arith.constant 3 : index
      %c0_97 = arith.constant 0 : index
      %143 = vector.load %arg9[%c3_96, %c0_97] : memref<22x16xf32, #tpu.memory_space<vmem>>, vector<16x16xf32>
      %144 = vector.broadcast %142 : f32 to vector<16x16xf32>
      %145 = arith.mulf %143, %144 : vector<16x16xf32>
      %146 = arith.addf %113, %145 : vector<16x16xf32>
      %c30 = arith.constant 30 : index
      %147 = memref.load %arg3[%c30] : memref<98xf32, #tpu.memory_space<smem>>
      %c4_98 = arith.constant 4 : index
      %c0_99 = arith.constant 0 : index
      %148 = vector.load %arg9[%c4_98, %c0_99] : memref<22x16xf32, #tpu.memory_space<vmem>>, vector<16x16xf32>
      %149 = vector.broadcast %147 : f32 to vector<16x16xf32>
      %150 = arith.mulf %148, %149 : vector<16x16xf32>
      %151 = arith.addf %131, %150 : vector<16x16xf32>
      %c37 = arith.constant 37 : index
      %152 = memref.load %arg3[%c37] : memref<98xf32, #tpu.memory_space<smem>>
      %c5_100 = arith.constant 5 : index
      %c0_101 = arith.constant 0 : index
      %153 = vector.load %arg9[%c5_100, %c0_101] : memref<22x16xf32, #tpu.memory_space<vmem>>, vector<16x16xf32>
      %154 = vector.broadcast %152 : f32 to vector<16x16xf32>
      %155 = arith.mulf %153, %154 : vector<16x16xf32>
      %156 = arith.addf %136, %155 : vector<16x16xf32>
      %c44 = arith.constant 44 : index
      %157 = memref.load %arg3[%c44] : memref<98xf32, #tpu.memory_space<smem>>
      %c6_102 = arith.constant 6 : index
      %c0_103 = arith.constant 0 : index
      %158 = vector.load %arg9[%c6_102, %c0_103] : memref<22x16xf32, #tpu.memory_space<vmem>>, vector<16x16xf32>
      %159 = vector.broadcast %157 : f32 to vector<16x16xf32>
      %160 = arith.mulf %158, %159 : vector<16x16xf32>
      %161 = arith.addf %141, %160 : vector<16x16xf32>
      %c0_104 = arith.constant 0 : index
      %c0_105 = arith.constant 0 : index
      %c3_106 = arith.constant 3 : index
      %162 = vector.load %arg8[%c0_104, %c0_105, %c3_106] : memref<2x22x22xf32, #tpu.memory_space<vmem>>, vector<1x22x16xf32>
      %163 = vector.shape_cast %162 : vector<1x22x16xf32> to vector<22x16xf32>
      %c0_107 = arith.constant 0 : index
      %c0_108 = arith.constant 0 : index
      %164 = vector.load %arg9[%c0_107, %c0_108] : memref<22x16xf32, #tpu.memory_space<vmem>>, vector<22x16xf32>
      tpu.vector_store %arg9[%c0_107, %c0_108], %163 {strides = array<i32>} : memref<22x16xf32, #tpu.memory_space<vmem>>, vector<22x16xf32>,
      %c3_109 = arith.constant 3 : index
      %165 = memref.load %arg3[%c3_109] : memref<98xf32, #tpu.memory_space<smem>>
      %c0_110 = arith.constant 0 : index
      %c0_111 = arith.constant 0 : index
      %166 = vector.load %arg9[%c0_110, %c0_111] : memref<22x16xf32, #tpu.memory_space<vmem>>, vector<16x16xf32>
      %167 = vector.broadcast %165 : f32 to vector<16x16xf32>
      %168 = arith.mulf %166, %167 : vector<16x16xf32>
      %169 = arith.addf %156, %168 : vector<16x16xf32>
      %c10 = arith.constant 10 : index
      %170 = memref.load %arg3[%c10] : memref<98xf32, #tpu.memory_space<smem>>
      %c1_112 = arith.constant 1 : index
      %c0_113 = arith.constant 0 : index
      %171 = vector.load %arg9[%c1_112, %c0_113] : memref<22x16xf32, #tpu.memory_space<vmem>>, vector<16x16xf32>
      %172 = vector.broadcast %170 : f32 to vector<16x16xf32>
      %173 = arith.mulf %171, %172 : vector<16x16xf32>
      %174 = arith.addf %161, %173 : vector<16x16xf32>
      %c17 = arith.constant 17 : index
      %175 = memref.load %arg3[%c17] : memref<98xf32, #tpu.memory_space<smem>>
      %c2_114 = arith.constant 2 : index
      %c0_115 = arith.constant 0 : index
      %176 = vector.load %arg9[%c2_114, %c0_115] : memref<22x16xf32, #tpu.memory_space<vmem>>, vector<16x16xf32>
      %177 = vector.broadcast %175 : f32 to vector<16x16xf32>
      %178 = arith.mulf %176, %177 : vector<16x16xf32>
      %179 = arith.addf %146, %178 : vector<16x16xf32>
      %c24 = arith.constant 24 : index
      %180 = memref.load %arg3[%c24] : memref<98xf32, #tpu.memory_space<smem>>
      %c3_116 = arith.constant 3 : index
      %c0_117 = arith.constant 0 : index
      %181 = vector.load %arg9[%c3_116, %c0_117] : memref<22x16xf32, #tpu.memory_space<vmem>>, vector<16x16xf32>
      %182 = vector.broadcast %180 : f32 to vector<16x16xf32>
      %183 = arith.mulf %181, %182 : vector<16x16xf32>
      %184 = arith.addf %151, %183 : vector<16x16xf32>
      %c31 = arith.constant 31 : index
      %185 = memref.load %arg3[%c31] : memref<98xf32, #tpu.memory_space<smem>>
      %c4_118 = arith.constant 4 : index
      %c0_119 = arith.constant 0 : index
      %186 = vector.load %arg9[%c4_118, %c0_119] : memref<22x16xf32, #tpu.memory_space<vmem>>, vector<16x16xf32>
      %187 = vector.broadcast %185 : f32 to vector<16x16xf32>
      %188 = arith.mulf %186, %187 : vector<16x16xf32>
      %189 = arith.addf %169, %188 : vector<16x16xf32>
      %c38 = arith.constant 38 : index
      %190 = memref.load %arg3[%c38] : memref<98xf32, #tpu.memory_space<smem>>
      %c5_120 = arith.constant 5 : index
      %c0_121 = arith.constant 0 : index
      %191 = vector.load %arg9[%c5_120, %c0_121] : memref<22x16xf32, #tpu.memory_space<vmem>>, vector<16x16xf32>
      %192 = vector.broadcast %190 : f32 to vector<16x16xf32>
      %193 = arith.mulf %191, %192 : vector<16x16xf32>
      %194 = arith.addf %174, %193 : vector<16x16xf32>
      %c45 = arith.constant 45 : index
      %195 = memref.load %arg3[%c45] : memref<98xf32, #tpu.memory_space<smem>>
      %c6_122 = arith.constant 6 : index
      %c0_123 = arith.constant 0 : index
      %196 = vector.load %arg9[%c6_122, %c0_123] : memref<22x16xf32, #tpu.memory_space<vmem>>, vector<16x16xf32>
      %197 = vector.broadcast %195 : f32 to vector<16x16xf32>
      %198 = arith.mulf %196, %197 : vector<16x16xf32>
      %199 = arith.addf %179, %198 : vector<16x16xf32>
      %c0_124 = arith.constant 0 : index
      %c0_125 = arith.constant 0 : index
      %c4_126 = arith.constant 4 : index
      %200 = vector.load %arg8[%c0_124, %c0_125, %c4_126] : memref<2x22x22xf32, #tpu.memory_space<vmem>>, vector<1x22x16xf32>
      %201 = vector.shape_cast %200 : vector<1x22x16xf32> to vector<22x16xf32>
      %c0_127 = arith.constant 0 : index
      %c0_128 = arith.constant 0 : index
      %202 = vector.load %arg9[%c0_127, %c0_128] : memref<22x16xf32, #tpu.memory_space<vmem>>, vector<22x16xf32>
      tpu.vector_store %arg9[%c0_127, %c0_128], %201 {strides = array<i32>} : memref<22x16xf32, #tpu.memory_space<vmem>>, vector<22x16xf32>,
      %c4_129 = arith.constant 4 : index
      %203 = memref.load %arg3[%c4_129] : memref<98xf32, #tpu.memory_space<smem>>
      %c0_130 = arith.constant 0 : index
      %c0_131 = arith.constant 0 : index
      %204 = vector.load %arg9[%c0_130, %c0_131] : memref<22x16xf32, #tpu.memory_space<vmem>>, vector<16x16xf32>
      %205 = vector.broadcast %203 : f32 to vector<16x16xf32>
      %206 = arith.mulf %204, %205 : vector<16x16xf32>
      %207 = arith.addf %194, %206 : vector<16x16xf32>
      %c11 = arith.constant 11 : index
      %208 = memref.load %arg3[%c11] : memref<98xf32, #tpu.memory_space<smem>>
      %c1_132 = arith.constant 1 : index
      %c0_133 = arith.constant 0 : index
      %209 = vector.load %arg9[%c1_132, %c0_133] : memref<22x16xf32, #tpu.memory_space<vmem>>, vector<16x16xf32>
      %210 = vector.broadcast %208 : f32 to vector<16x16xf32>
      %211 = arith.mulf %209, %210 : vector<16x16xf32>
      %212 = arith.addf %199, %211 : vector<16x16xf32>
      %c18 = arith.constant 18 : index
      %213 = memref.load %arg3[%c18] : memref<98xf32, #tpu.memory_space<smem>>
      %c2_134 = arith.constant 2 : index
      %c0_135 = arith.constant 0 : index
      %214 = vector.load %arg9[%c2_134, %c0_135] : memref<22x16xf32, #tpu.memory_space<vmem>>, vector<16x16xf32>
      %215 = vector.broadcast %213 : f32 to vector<16x16xf32>
      %216 = arith.mulf %214, %215 : vector<16x16xf32>
      %217 = arith.addf %184, %216 : vector<16x16xf32>
      %c25 = arith.constant 25 : index
      %218 = memref.load %arg3[%c25] : memref<98xf32, #tpu.memory_space<smem>>
      %c3_136 = arith.constant 3 : index
      %c0_137 = arith.constant 0 : index
      %219 = vector.load %arg9[%c3_136, %c0_137] : memref<22x16xf32, #tpu.memory_space<vmem>>, vector<16x16xf32>
      %220 = vector.broadcast %218 : f32 to vector<16x16xf32>
      %221 = arith.mulf %219, %220 : vector<16x16xf32>
      %222 = arith.addf %189, %221 : vector<16x16xf32>
      %c32 = arith.constant 32 : index
      %223 = memref.load %arg3[%c32] : memref<98xf32, #tpu.memory_space<smem>>
      %c4_138 = arith.constant 4 : index
      %c0_139 = arith.constant 0 : index
      %224 = vector.load %arg9[%c4_138, %c0_139] : memref<22x16xf32, #tpu.memory_space<vmem>>, vector<16x16xf32>
      %225 = vector.broadcast %223 : f32 to vector<16x16xf32>
      %226 = arith.mulf %224, %225 : vector<16x16xf32>
      %227 = arith.addf %207, %226 : vector<16x16xf32>
      %c39 = arith.constant 39 : index
      %228 = memref.load %arg3[%c39] : memref<98xf32, #tpu.memory_space<smem>>
      %c5_140 = arith.constant 5 : index
      %c0_141 = arith.constant 0 : index
      %229 = vector.load %arg9[%c5_140, %c0_141] : memref<22x16xf32, #tpu.memory_space<vmem>>, vector<16x16xf32>
      %230 = vector.broadcast %228 : f32 to vector<16x16xf32>
      %231 = arith.mulf %229, %230 : vector<16x16xf32>
      %232 = arith.addf %212, %231 : vector<16x16xf32>
      %c46 = arith.constant 46 : index
      %233 = memref.load %arg3[%c46] : memref<98xf32, #tpu.memory_space<smem>>
      %c6_142 = arith.constant 6 : index
      %c0_143 = arith.constant 0 : index
      %234 = vector.load %arg9[%c6_142, %c0_143] : memref<22x16xf32, #tpu.memory_space<vmem>>, vector<16x16xf32>
      %235 = vector.broadcast %233 : f32 to vector<16x16xf32>
      %236 = arith.mulf %234, %235 : vector<16x16xf32>
      %237 = arith.addf %217, %236 : vector<16x16xf32>
      %c0_144 = arith.constant 0 : index
      %c0_145 = arith.constant 0 : index
      %c5_146 = arith.constant 5 : index
      %238 = vector.load %arg8[%c0_144, %c0_145, %c5_146] : memref<2x22x22xf32, #tpu.memory_space<vmem>>, vector<1x22x16xf32>
      %239 = vector.shape_cast %238 : vector<1x22x16xf32> to vector<22x16xf32>
      %c0_147 = arith.constant 0 : index
      %c0_148 = arith.constant 0 : index
      %240 = vector.load %arg9[%c0_147, %c0_148] : memref<22x16xf32, #tpu.memory_space<vmem>>, vector<22x16xf32>
      tpu.vector_store %arg9[%c0_147, %c0_148], %239 {strides = array<i32>} : memref<22x16xf32, #tpu.memory_space<vmem>>, vector<22x16xf32>,
      %c5_149 = arith.constant 5 : index
      %241 = memref.load %arg3[%c5_149] : memref<98xf32, #tpu.memory_space<smem>>
      %c0_150 = arith.constant 0 : index
      %c0_151 = arith.constant 0 : index
      %242 = vector.load %arg9[%c0_150, %c0_151] : memref<22x16xf32, #tpu.memory_space<vmem>>, vector<16x16xf32>
      %243 = vector.broadcast %241 : f32 to vector<16x16xf32>
      %244 = arith.mulf %242, %243 : vector<16x16xf32>
      %245 = arith.addf %232, %244 : vector<16x16xf32>
      %c12 = arith.constant 12 : index
      %246 = memref.load %arg3[%c12] : memref<98xf32, #tpu.memory_space<smem>>
      %c1_152 = arith.constant 1 : index
      %c0_153 = arith.constant 0 : index
      %247 = vector.load %arg9[%c1_152, %c0_153] : memref<22x16xf32, #tpu.memory_space<vmem>>, vector<16x16xf32>
      %248 = vector.broadcast %246 : f32 to vector<16x16xf32>
      %249 = arith.mulf %247, %248 : vector<16x16xf32>
      %250 = arith.addf %237, %249 : vector<16x16xf32>
      %c19_154 = arith.constant 19 : index
      %251 = memref.load %arg3[%c19_154] : memref<98xf32, #tpu.memory_space<smem>>
      %c2_155 = arith.constant 2 : index
      %c0_156 = arith.constant 0 : index
      %252 = vector.load %arg9[%c2_155, %c0_156] : memref<22x16xf32, #tpu.memory_space<vmem>>, vector<16x16xf32>
      %253 = vector.broadcast %251 : f32 to vector<16x16xf32>
      %254 = arith.mulf %252, %253 : vector<16x16xf32>
      %255 = arith.addf %222, %254 : vector<16x16xf32>
      %c26 = arith.constant 26 : index
      %256 = memref.load %arg3[%c26] : memref<98xf32, #tpu.memory_space<smem>>
      %c3_157 = arith.constant 3 : index
      %c0_158 = arith.constant 0 : index
      %257 = vector.load %arg9[%c3_157, %c0_158] : memref<22x16xf32, #tpu.memory_space<vmem>>, vector<16x16xf32>
      %258 = vector.broadcast %256 : f32 to vector<16x16xf32>
      %259 = arith.mulf %257, %258 : vector<16x16xf32>
      %260 = arith.addf %227, %259 : vector<16x16xf32>
      %c33 = arith.constant 33 : index
      %261 = memref.load %arg3[%c33] : memref<98xf32, #tpu.memory_space<smem>>
      %c4_159 = arith.constant 4 : index
      %c0_160 = arith.constant 0 : index
      %262 = vector.load %arg9[%c4_159, %c0_160] : memref<22x16xf32, #tpu.memory_space<vmem>>, vector<16x16xf32>
      %263 = vector.broadcast %261 : f32 to vector<16x16xf32>
      %264 = arith.mulf %262, %263 : vector<16x16xf32>
      %265 = arith.addf %245, %264 : vector<16x16xf32>
      %c40 = arith.constant 40 : index
      %266 = memref.load %arg3[%c40] : memref<98xf32, #tpu.memory_space<smem>>
      %c5_161 = arith.constant 5 : index
      %c0_162 = arith.constant 0 : index
      %267 = vector.load %arg9[%c5_161, %c0_162] : memref<22x16xf32, #tpu.memory_space<vmem>>, vector<16x16xf32>
      %268 = vector.broadcast %266 : f32 to vector<16x16xf32>
      %269 = arith.mulf %267, %268 : vector<16x16xf32>
      %270 = arith.addf %250, %269 : vector<16x16xf32>
      %c47 = arith.constant 47 : index
      %271 = memref.load %arg3[%c47] : memref<98xf32, #tpu.memory_space<smem>>
      %c6_163 = arith.constant 6 : index
      %c0_164 = arith.constant 0 : index
      %272 = vector.load %arg9[%c6_163, %c0_164] : memref<22x16xf32, #tpu.memory_space<vmem>>, vector<16x16xf32>
      %273 = vector.broadcast %271 : f32 to vector<16x16xf32>
      %274 = arith.mulf %272, %273 : vector<16x16xf32>
      %275 = arith.addf %255, %274 : vector<16x16xf32>
      %c0_165 = arith.constant 0 : index
      %c0_166 = arith.constant 0 : index
      %c6_167 = arith.constant 6 : index
      %276 = vector.load %arg8[%c0_165, %c0_166, %c6_167] : memref<2x22x22xf32, #tpu.memory_space<vmem>>, vector<1x22x16xf32>
      %277 = vector.shape_cast %276 : vector<1x22x16xf32> to vector<22x16xf32>
      %c0_168 = arith.constant 0 : index
      %c0_169 = arith.constant 0 : index
      %278 = vector.load %arg9[%c0_168, %c0_169] : memref<22x16xf32, #tpu.memory_space<vmem>>, vector<22x16xf32>
      tpu.vector_store %arg9[%c0_168, %c0_169], %277 {strides = array<i32>} : memref<22x16xf32, #tpu.memory_space<vmem>>, vector<22x16xf32>,
      %c6_170 = arith.constant 6 : index
      %279 = memref.load %arg3[%c6_170] : memref<98xf32, #tpu.memory_space<smem>>
      %c0_171 = arith.constant 0 : index
      %c0_172 = arith.constant 0 : index
      %280 = vector.load %arg9[%c0_171, %c0_172] : memref<22x16xf32, #tpu.memory_space<vmem>>, vector<16x16xf32>
      %281 = vector.broadcast %279 : f32 to vector<16x16xf32>
      %282 = arith.mulf %280, %281 : vector<16x16xf32>
      %283 = arith.addf %270, %282 : vector<16x16xf32>
      %c13 = arith.constant 13 : index
      %284 = memref.load %arg3[%c13] : memref<98xf32, #tpu.memory_space<smem>>
      %c1_173 = arith.constant 1 : index
      %c0_174 = arith.constant 0 : index
      %285 = vector.load %arg9[%c1_173, %c0_174] : memref<22x16xf32, #tpu.memory_space<vmem>>, vector<16x16xf32>
      %286 = vector.broadcast %284 : f32 to vector<16x16xf32>
      %287 = arith.mulf %285, %286 : vector<16x16xf32>
      %288 = arith.addf %275, %287 : vector<16x16xf32>
      %c20 = arith.constant 20 : index
      %289 = memref.load %arg3[%c20] : memref<98xf32, #tpu.memory_space<smem>>
      %c2_175 = arith.constant 2 : index
      %c0_176 = arith.constant 0 : index
      %290 = vector.load %arg9[%c2_175, %c0_176] : memref<22x16xf32, #tpu.memory_space<vmem>>, vector<16x16xf32>
      %291 = vector.broadcast %289 : f32 to vector<16x16xf32>
      %292 = arith.mulf %290, %291 : vector<16x16xf32>
      %293 = arith.addf %260, %292 : vector<16x16xf32>
      %c27 = arith.constant 27 : index
      %294 = memref.load %arg3[%c27] : memref<98xf32, #tpu.memory_space<smem>>
      %c3_177 = arith.constant 3 : index
      %c0_178 = arith.constant 0 : index
      %295 = vector.load %arg9[%c3_177, %c0_178] : memref<22x16xf32, #tpu.memory_space<vmem>>, vector<16x16xf32>
      %296 = vector.broadcast %294 : f32 to vector<16x16xf32>
      %297 = arith.mulf %295, %296 : vector<16x16xf32>
      %298 = arith.addf %265, %297 : vector<16x16xf32>
      %c34 = arith.constant 34 : index
      %299 = memref.load %arg3[%c34] : memref<98xf32, #tpu.memory_space<smem>>
      %c4_179 = arith.constant 4 : index
      %c0_180 = arith.constant 0 : index
      %300 = vector.load %arg9[%c4_179, %c0_180] : memref<22x16xf32, #tpu.memory_space<vmem>>, vector<16x16xf32>
      %301 = vector.broadcast %299 : f32 to vector<16x16xf32>
      %302 = arith.mulf %300, %301 : vector<16x16xf32>
      %303 = arith.addf %283, %302 : vector<16x16xf32>
      %c41 = arith.constant 41 : index
      %304 = memref.load %arg3[%c41] : memref<98xf32, #tpu.memory_space<smem>>
      %c5_181 = arith.constant 5 : index
      %c0_182 = arith.constant 0 : index
      %305 = vector.load %arg9[%c5_181, %c0_182] : memref<22x16xf32, #tpu.memory_space<vmem>>, vector<16x16xf32>
      %306 = vector.broadcast %304 : f32 to vector<16x16xf32>
      %307 = arith.mulf %305, %306 : vector<16x16xf32>
      %308 = arith.addf %288, %307 : vector<16x16xf32>
      %c48 = arith.constant 48 : index
      %309 = memref.load %arg3[%c48] : memref<98xf32, #tpu.memory_space<smem>>
      %c6_183 = arith.constant 6 : index
      %c0_184 = arith.constant 0 : index
      %310 = vector.load %arg9[%c6_183, %c0_184] : memref<22x16xf32, #tpu.memory_space<vmem>>, vector<16x16xf32>
      %311 = vector.broadcast %309 : f32 to vector<16x16xf32>
      %312 = arith.mulf %310, %311 : vector<16x16xf32>
      %313 = arith.addf %293, %312 : vector<16x16xf32>
      %c1_185 = arith.constant 1 : index
      %c0_186 = arith.constant 0 : index
      %c0_187 = arith.constant 0 : index
      %314 = vector.load %arg8[%c1_185, %c0_186, %c0_187] : memref<2x22x22xf32, #tpu.memory_space<vmem>>, vector<1x22x16xf32>
      %315 = vector.shape_cast %314 : vector<1x22x16xf32> to vector<22x16xf32>
      %c0_188 = arith.constant 0 : index
      %c0_189 = arith.constant 0 : index
      %316 = vector.load %arg9[%c0_188, %c0_189] : memref<22x16xf32, #tpu.memory_space<vmem>>, vector<22x16xf32>
      tpu.vector_store %arg9[%c0_188, %c0_189], %315 {strides = array<i32>} : memref<22x16xf32, #tpu.memory_space<vmem>>, vector<22x16xf32>,
      %c49 = arith.constant 49 : index
      %317 = memref.load %arg3[%c49] : memref<98xf32, #tpu.memory_space<smem>>
      %c0_190 = arith.constant 0 : index
      %c0_191 = arith.constant 0 : index
      %318 = vector.load %arg9[%c0_190, %c0_191] : memref<22x16xf32, #tpu.memory_space<vmem>>, vector<16x16xf32>
      %319 = vector.broadcast %317 : f32 to vector<16x16xf32>
      %320 = arith.mulf %318, %319 : vector<16x16xf32>
      %321 = arith.addf %313, %320 : vector<16x16xf32>
      %c56 = arith.constant 56 : index
      %322 = memref.load %arg3[%c56] : memref<98xf32, #tpu.memory_space<smem>>
      %c1_192 = arith.constant 1 : index
      %c0_193 = arith.constant 0 : index
      %323 = vector.load %arg9[%c1_192, %c0_193] : memref<22x16xf32, #tpu.memory_space<vmem>>, vector<16x16xf32>
      %324 = vector.broadcast %322 : f32 to vector<16x16xf32>
      %325 = arith.mulf %323, %324 : vector<16x16xf32>
      %326 = arith.addf %298, %325 : vector<16x16xf32>
      %c63 = arith.constant 63 : index
      %327 = memref.load %arg3[%c63] : memref<98xf32, #tpu.memory_space<smem>>
      %c2_194 = arith.constant 2 : index
      %c0_195 = arith.constant 0 : index
      %328 = vector.load %arg9[%c2_194, %c0_195] : memref<22x16xf32, #tpu.memory_space<vmem>>, vector<16x16xf32>
      %329 = vector.broadcast %327 : f32 to vector<16x16xf32>
      %330 = arith.mulf %328, %329 : vector<16x16xf32>
      %331 = arith.addf %303, %330 : vector<16x16xf32>
      %c70 = arith.constant 70 : index
      %332 = memref.load %arg3[%c70] : memref<98xf32, #tpu.memory_space<smem>>
      %c3_196 = arith.constant 3 : index
      %c0_197 = arith.constant 0 : index
      %333 = vector.load %arg9[%c3_196, %c0_197] : memref<22x16xf32, #tpu.memory_space<vmem>>, vector<16x16xf32>
      %334 = vector.broadcast %332 : f32 to vector<16x16xf32>
      %335 = arith.mulf %333, %334 : vector<16x16xf32>
      %336 = arith.addf %308, %335 : vector<16x16xf32>
      %c77 = arith.constant 77 : index
      %337 = memref.load %arg3[%c77] : memref<98xf32, #tpu.memory_space<smem>>
      %c4_198 = arith.constant 4 : index
      %c0_199 = arith.constant 0 : index
      %338 = vector.load %arg9[%c4_198, %c0_199] : memref<22x16xf32, #tpu.memory_space<vmem>>, vector<16x16xf32>
      %339 = vector.broadcast %337 : f32 to vector<16x16xf32>
      %340 = arith.mulf %338, %339 : vector<16x16xf32>
      %341 = arith.addf %321, %340 : vector<16x16xf32>
      %c84 = arith.constant 84 : index
      %342 = memref.load %arg3[%c84] : memref<98xf32, #tpu.memory_space<smem>>
      %c5_200 = arith.constant 5 : index
      %c0_201 = arith.constant 0 : index
      %343 = vector.load %arg9[%c5_200, %c0_201] : memref<22x16xf32, #tpu.memory_space<vmem>>, vector<16x16xf32>
      %344 = vector.broadcast %342 : f32 to vector<16x16xf32>
      %345 = arith.mulf %343, %344 : vector<16x16xf32>
      %346 = arith.addf %326, %345 : vector<16x16xf32>
      %c91 = arith.constant 91 : index
      %347 = memref.load %arg3[%c91] : memref<98xf32, #tpu.memory_space<smem>>
      %c6_202 = arith.constant 6 : index
      %c0_203 = arith.constant 0 : index
      %348 = vector.load %arg9[%c6_202, %c0_203] : memref<22x16xf32, #tpu.memory_space<vmem>>, vector<16x16xf32>
      %349 = vector.broadcast %347 : f32 to vector<16x16xf32>
      %350 = arith.mulf %348, %349 : vector<16x16xf32>
      %351 = arith.addf %331, %350 : vector<16x16xf32>
      %c1_204 = arith.constant 1 : index
      %c0_205 = arith.constant 0 : index
      %c1_206 = arith.constant 1 : index
      %352 = vector.load %arg8[%c1_204, %c0_205, %c1_206] : memref<2x22x22xf32, #tpu.memory_space<vmem>>, vector<1x22x16xf32>
      %353 = vector.shape_cast %352 : vector<1x22x16xf32> to vector<22x16xf32>
      %c0_207 = arith.constant 0 : index
      %c0_208 = arith.constant 0 : index
      %354 = vector.load %arg9[%c0_207, %c0_208] : memref<22x16xf32, #tpu.memory_space<vmem>>, vector<22x16xf32>
      tpu.vector_store %arg9[%c0_207, %c0_208], %353 {strides = array<i32>} : memref<22x16xf32, #tpu.memory_space<vmem>>, vector<22x16xf32>,
      %c50 = arith.constant 50 : index
      %355 = memref.load %arg3[%c50] : memref<98xf32, #tpu.memory_space<smem>>
      %c0_209 = arith.constant 0 : index
      %c0_210 = arith.constant 0 : index
      %356 = vector.load %arg9[%c0_209, %c0_210] : memref<22x16xf32, #tpu.memory_space<vmem>>, vector<16x16xf32>
      %357 = vector.broadcast %355 : f32 to vector<16x16xf32>
      %358 = arith.mulf %356, %357 : vector<16x16xf32>
      %359 = arith.addf %346, %358 : vector<16x16xf32>
      %c57 = arith.constant 57 : index
      %360 = memref.load %arg3[%c57] : memref<98xf32, #tpu.memory_space<smem>>
      %c1_211 = arith.constant 1 : index
      %c0_212 = arith.constant 0 : index
      %361 = vector.load %arg9[%c1_211, %c0_212] : memref<22x16xf32, #tpu.memory_space<vmem>>, vector<16x16xf32>
      %362 = vector.broadcast %360 : f32 to vector<16x16xf32>
      %363 = arith.mulf %361, %362 : vector<16x16xf32>
      %364 = arith.addf %351, %363 : vector<16x16xf32>
      %c64 = arith.constant 64 : index
      %365 = memref.load %arg3[%c64] : memref<98xf32, #tpu.memory_space<smem>>
      %c2_213 = arith.constant 2 : index
      %c0_214 = arith.constant 0 : index
      %366 = vector.load %arg9[%c2_213, %c0_214] : memref<22x16xf32, #tpu.memory_space<vmem>>, vector<16x16xf32>
      %367 = vector.broadcast %365 : f32 to vector<16x16xf32>
      %368 = arith.mulf %366, %367 : vector<16x16xf32>
      %369 = arith.addf %336, %368 : vector<16x16xf32>
      %c71 = arith.constant 71 : index
      %370 = memref.load %arg3[%c71] : memref<98xf32, #tpu.memory_space<smem>>
      %c3_215 = arith.constant 3 : index
      %c0_216 = arith.constant 0 : index
      %371 = vector.load %arg9[%c3_215, %c0_216] : memref<22x16xf32, #tpu.memory_space<vmem>>, vector<16x16xf32>
      %372 = vector.broadcast %370 : f32 to vector<16x16xf32>
      %373 = arith.mulf %371, %372 : vector<16x16xf32>
      %374 = arith.addf %341, %373 : vector<16x16xf32>
      %c78 = arith.constant 78 : index
      %375 = memref.load %arg3[%c78] : memref<98xf32, #tpu.memory_space<smem>>
      %c4_217 = arith.constant 4 : index
      %c0_218 = arith.constant 0 : index
      %376 = vector.load %arg9[%c4_217, %c0_218] : memref<22x16xf32, #tpu.memory_space<vmem>>, vector<16x16xf32>
      %377 = vector.broadcast %375 : f32 to vector<16x16xf32>
      %378 = arith.mulf %376, %377 : vector<16x16xf32>
      %379 = arith.addf %359, %378 : vector<16x16xf32>
      %c85 = arith.constant 85 : index
      %380 = memref.load %arg3[%c85] : memref<98xf32, #tpu.memory_space<smem>>
      %c5_219 = arith.constant 5 : index
      %c0_220 = arith.constant 0 : index
      %381 = vector.load %arg9[%c5_219, %c0_220] : memref<22x16xf32, #tpu.memory_space<vmem>>, vector<16x16xf32>
      %382 = vector.broadcast %380 : f32 to vector<16x16xf32>
      %383 = arith.mulf %381, %382 : vector<16x16xf32>
      %384 = arith.addf %364, %383 : vector<16x16xf32>
      %c92 = arith.constant 92 : index
      %385 = memref.load %arg3[%c92] : memref<98xf32, #tpu.memory_space<smem>>
      %c6_221 = arith.constant 6 : index
      %c0_222 = arith.constant 0 : index
      %386 = vector.load %arg9[%c6_221, %c0_222] : memref<22x16xf32, #tpu.memory_space<vmem>>, vector<16x16xf32>
      %387 = vector.broadcast %385 : f32 to vector<16x16xf32>
      %388 = arith.mulf %386, %387 : vector<16x16xf32>
      %389 = arith.addf %369, %388 : vector<16x16xf32>
      %c1_223 = arith.constant 1 : index
      %c0_224 = arith.constant 0 : index
      %c2_225 = arith.constant 2 : index
      %390 = vector.load %arg8[%c1_223, %c0_224, %c2_225] : memref<2x22x22xf32, #tpu.memory_space<vmem>>, vector<1x22x16xf32>
      %391 = vector.shape_cast %390 : vector<1x22x16xf32> to vector<22x16xf32>
      %c0_226 = arith.constant 0 : index
      %c0_227 = arith.constant 0 : index
      %392 = vector.load %arg9[%c0_226, %c0_227] : memref<22x16xf32, #tpu.memory_space<vmem>>, vector<22x16xf32>
      tpu.vector_store %arg9[%c0_226, %c0_227], %391 {strides = array<i32>} : memref<22x16xf32, #tpu.memory_space<vmem>>, vector<22x16xf32>,
      %c51 = arith.constant 51 : index
      %393 = memref.load %arg3[%c51] : memref<98xf32, #tpu.memory_space<smem>>
      %c0_228 = arith.constant 0 : index
      %c0_229 = arith.constant 0 : index
      %394 = vector.load %arg9[%c0_228, %c0_229] : memref<22x16xf32, #tpu.memory_space<vmem>>, vector<16x16xf32>
      %395 = vector.broadcast %393 : f32 to vector<16x16xf32>
      %396 = arith.mulf %394, %395 : vector<16x16xf32>
      %397 = arith.addf %384, %396 : vector<16x16xf32>
      %c58 = arith.constant 58 : index
      %398 = memref.load %arg3[%c58] : memref<98xf32, #tpu.memory_space<smem>>
      %c1_230 = arith.constant 1 : index
      %c0_231 = arith.constant 0 : index
      %399 = vector.load %arg9[%c1_230, %c0_231] : memref<22x16xf32, #tpu.memory_space<vmem>>, vector<16x16xf32>
      %400 = vector.broadcast %398 : f32 to vector<16x16xf32>
      %401 = arith.mulf %399, %400 : vector<16x16xf32>
      %402 = arith.addf %389, %401 : vector<16x16xf32>
      %c65 = arith.constant 65 : index
      %403 = memref.load %arg3[%c65] : memref<98xf32, #tpu.memory_space<smem>>
      %c2_232 = arith.constant 2 : index
      %c0_233 = arith.constant 0 : index
      %404 = vector.load %arg9[%c2_232, %c0_233] : memref<22x16xf32, #tpu.memory_space<vmem>>, vector<16x16xf32>
      %405 = vector.broadcast %403 : f32 to vector<16x16xf32>
      %406 = arith.mulf %404, %405 : vector<16x16xf32>
      %407 = arith.addf %374, %406 : vector<16x16xf32>
      %c72 = arith.constant 72 : index
      %408 = memref.load %arg3[%c72] : memref<98xf32, #tpu.memory_space<smem>>
      %c3_234 = arith.constant 3 : index
      %c0_235 = arith.constant 0 : index
      %409 = vector.load %arg9[%c3_234, %c0_235] : memref<22x16xf32, #tpu.memory_space<vmem>>, vector<16x16xf32>
      %410 = vector.broadcast %408 : f32 to vector<16x16xf32>
      %411 = arith.mulf %409, %410 : vector<16x16xf32>
      %412 = arith.addf %379, %411 : vector<16x16xf32>
      %c79 = arith.constant 79 : index
      %413 = memref.load %arg3[%c79] : memref<98xf32, #tpu.memory_space<smem>>
      %c4_236 = arith.constant 4 : index
      %c0_237 = arith.constant 0 : index
      %414 = vector.load %arg9[%c4_236, %c0_237] : memref<22x16xf32, #tpu.memory_space<vmem>>, vector<16x16xf32>
      %415 = vector.broadcast %413 : f32 to vector<16x16xf32>
      %416 = arith.mulf %414, %415 : vector<16x16xf32>
      %417 = arith.addf %397, %416 : vector<16x16xf32>
      %c86 = arith.constant 86 : index
      %418 = memref.load %arg3[%c86] : memref<98xf32, #tpu.memory_space<smem>>
      %c5_238 = arith.constant 5 : index
      %c0_239 = arith.constant 0 : index
      %419 = vector.load %arg9[%c5_238, %c0_239] : memref<22x16xf32, #tpu.memory_space<vmem>>, vector<16x16xf32>
      %420 = vector.broadcast %418 : f32 to vector<16x16xf32>
      %421 = arith.mulf %419, %420 : vector<16x16xf32>
      %422 = arith.addf %402, %421 : vector<16x16xf32>
      %c93 = arith.constant 93 : index
      %423 = memref.load %arg3[%c93] : memref<98xf32, #tpu.memory_space<smem>>
      %c6_240 = arith.constant 6 : index
      %c0_241 = arith.constant 0 : index
      %424 = vector.load %arg9[%c6_240, %c0_241] : memref<22x16xf32, #tpu.memory_space<vmem>>, vector<16x16xf32>
      %425 = vector.broadcast %423 : f32 to vector<16x16xf32>
      %426 = arith.mulf %424, %425 : vector<16x16xf32>
      %427 = arith.addf %407, %426 : vector<16x16xf32>
      %c1_242 = arith.constant 1 : index
      %c0_243 = arith.constant 0 : index
      %c3_244 = arith.constant 3 : index
      %428 = vector.load %arg8[%c1_242, %c0_243, %c3_244] : memref<2x22x22xf32, #tpu.memory_space<vmem>>, vector<1x22x16xf32>
      %429 = vector.shape_cast %428 : vector<1x22x16xf32> to vector<22x16xf32>
      %c0_245 = arith.constant 0 : index
      %c0_246 = arith.constant 0 : index
      %430 = vector.load %arg9[%c0_245, %c0_246] : memref<22x16xf32, #tpu.memory_space<vmem>>, vector<22x16xf32>
      tpu.vector_store %arg9[%c0_245, %c0_246], %429 {strides = array<i32>} : memref<22x16xf32, #tpu.memory_space<vmem>>, vector<22x16xf32>,
      %c52 = arith.constant 52 : index
      %431 = memref.load %arg3[%c52] : memref<98xf32, #tpu.memory_space<smem>>
      %c0_247 = arith.constant 0 : index
      %c0_248 = arith.constant 0 : index
      %432 = vector.load %arg9[%c0_247, %c0_248] : memref<22x16xf32, #tpu.memory_space<vmem>>, vector<16x16xf32>
      %433 = vector.broadcast %431 : f32 to vector<16x16xf32>
      %434 = arith.mulf %432, %433 : vector<16x16xf32>
      %435 = arith.addf %422, %434 : vector<16x16xf32>
      %c59 = arith.constant 59 : index
      %436 = memref.load %arg3[%c59] : memref<98xf32, #tpu.memory_space<smem>>
      %c1_249 = arith.constant 1 : index
      %c0_250 = arith.constant 0 : index
      %437 = vector.load %arg9[%c1_249, %c0_250] : memref<22x16xf32, #tpu.memory_space<vmem>>, vector<16x16xf32>
      %438 = vector.broadcast %436 : f32 to vector<16x16xf32>
      %439 = arith.mulf %437, %438 : vector<16x16xf32>
      %440 = arith.addf %427, %439 : vector<16x16xf32>
      %c66 = arith.constant 66 : index
      %441 = memref.load %arg3[%c66] : memref<98xf32, #tpu.memory_space<smem>>
      %c2_251 = arith.constant 2 : index
      %c0_252 = arith.constant 0 : index
      %442 = vector.load %arg9[%c2_251, %c0_252] : memref<22x16xf32, #tpu.memory_space<vmem>>, vector<16x16xf32>
      %443 = vector.broadcast %441 : f32 to vector<16x16xf32>
      %444 = arith.mulf %442, %443 : vector<16x16xf32>
      %445 = arith.addf %412, %444 : vector<16x16xf32>
      %c73 = arith.constant 73 : index
      %446 = memref.load %arg3[%c73] : memref<98xf32, #tpu.memory_space<smem>>
      %c3_253 = arith.constant 3 : index
      %c0_254 = arith.constant 0 : index
      %447 = vector.load %arg9[%c3_253, %c0_254] : memref<22x16xf32, #tpu.memory_space<vmem>>, vector<16x16xf32>
      %448 = vector.broadcast %446 : f32 to vector<16x16xf32>
      %449 = arith.mulf %447, %448 : vector<16x16xf32>
      %450 = arith.addf %417, %449 : vector<16x16xf32>
      %c80 = arith.constant 80 : index
      %451 = memref.load %arg3[%c80] : memref<98xf32, #tpu.memory_space<smem>>
      %c4_255 = arith.constant 4 : index
      %c0_256 = arith.constant 0 : index
      %452 = vector.load %arg9[%c4_255, %c0_256] : memref<22x16xf32, #tpu.memory_space<vmem>>, vector<16x16xf32>
      %453 = vector.broadcast %451 : f32 to vector<16x16xf32>
      %454 = arith.mulf %452, %453 : vector<16x16xf32>
      %455 = arith.addf %435, %454 : vector<16x16xf32>
      %c87 = arith.constant 87 : index
      %456 = memref.load %arg3[%c87] : memref<98xf32, #tpu.memory_space<smem>>
      %c5_257 = arith.constant 5 : index
      %c0_258 = arith.constant 0 : index
      %457 = vector.load %arg9[%c5_257, %c0_258] : memref<22x16xf32, #tpu.memory_space<vmem>>, vector<16x16xf32>
      %458 = vector.broadcast %456 : f32 to vector<16x16xf32>
      %459 = arith.mulf %457, %458 : vector<16x16xf32>
      %460 = arith.addf %440, %459 : vector<16x16xf32>
      %c94 = arith.constant 94 : index
      %461 = memref.load %arg3[%c94] : memref<98xf32, #tpu.memory_space<smem>>
      %c6_259 = arith.constant 6 : index
      %c0_260 = arith.constant 0 : index
      %462 = vector.load %arg9[%c6_259, %c0_260] : memref<22x16xf32, #tpu.memory_space<vmem>>, vector<16x16xf32>
      %463 = vector.broadcast %461 : f32 to vector<16x16xf32>
      %464 = arith.mulf %462, %463 : vector<16x16xf32>
      %465 = arith.addf %445, %464 : vector<16x16xf32>
      %c1_261 = arith.constant 1 : index
      %c0_262 = arith.constant 0 : index
      %c4_263 = arith.constant 4 : index
      %466 = vector.load %arg8[%c1_261, %c0_262, %c4_263] : memref<2x22x22xf32, #tpu.memory_space<vmem>>, vector<1x22x16xf32>
      %467 = vector.shape_cast %466 : vector<1x22x16xf32> to vector<22x16xf32>
      %c0_264 = arith.constant 0 : index
      %c0_265 = arith.constant 0 : index
      %468 = vector.load %arg9[%c0_264, %c0_265] : memref<22x16xf32, #tpu.memory_space<vmem>>, vector<22x16xf32>
      tpu.vector_store %arg9[%c0_264, %c0_265], %467 {strides = array<i32>} : memref<22x16xf32, #tpu.memory_space<vmem>>, vector<22x16xf32>,
      %c53 = arith.constant 53 : index
      %469 = memref.load %arg3[%c53] : memref<98xf32, #tpu.memory_space<smem>>
      %c0_266 = arith.constant 0 : index
      %c0_267 = arith.constant 0 : index
      %470 = vector.load %arg9[%c0_266, %c0_267] : memref<22x16xf32, #tpu.memory_space<vmem>>, vector<16x16xf32>
      %471 = vector.broadcast %469 : f32 to vector<16x16xf32>
      %472 = arith.mulf %470, %471 : vector<16x16xf32>
      %473 = arith.addf %460, %472 : vector<16x16xf32>
      %c60 = arith.constant 60 : index
      %474 = memref.load %arg3[%c60] : memref<98xf32, #tpu.memory_space<smem>>
      %c1_268 = arith.constant 1 : index
      %c0_269 = arith.constant 0 : index
      %475 = vector.load %arg9[%c1_268, %c0_269] : memref<22x16xf32, #tpu.memory_space<vmem>>, vector<16x16xf32>
      %476 = vector.broadcast %474 : f32 to vector<16x16xf32>
      %477 = arith.mulf %475, %476 : vector<16x16xf32>
      %478 = arith.addf %465, %477 : vector<16x16xf32>
      %c67 = arith.constant 67 : index
      %479 = memref.load %arg3[%c67] : memref<98xf32, #tpu.memory_space<smem>>
      %c2_270 = arith.constant 2 : index
      %c0_271 = arith.constant 0 : index
      %480 = vector.load %arg9[%c2_270, %c0_271] : memref<22x16xf32, #tpu.memory_space<vmem>>, vector<16x16xf32>
      %481 = vector.broadcast %479 : f32 to vector<16x16xf32>
      %482 = arith.mulf %480, %481 : vector<16x16xf32>
      %483 = arith.addf %450, %482 : vector<16x16xf32>
      %c74 = arith.constant 74 : index
      %484 = memref.load %arg3[%c74] : memref<98xf32, #tpu.memory_space<smem>>
      %c3_272 = arith.constant 3 : index
      %c0_273 = arith.constant 0 : index
      %485 = vector.load %arg9[%c3_272, %c0_273] : memref<22x16xf32, #tpu.memory_space<vmem>>, vector<16x16xf32>
      %486 = vector.broadcast %484 : f32 to vector<16x16xf32>
      %487 = arith.mulf %485, %486 : vector<16x16xf32>
      %488 = arith.addf %455, %487 : vector<16x16xf32>
      %c81 = arith.constant 81 : index
      %489 = memref.load %arg3[%c81] : memref<98xf32, #tpu.memory_space<smem>>
      %c4_274 = arith.constant 4 : index
      %c0_275 = arith.constant 0 : index
      %490 = vector.load %arg9[%c4_274, %c0_275] : memref<22x16xf32, #tpu.memory_space<vmem>>, vector<16x16xf32>
      %491 = vector.broadcast %489 : f32 to vector<16x16xf32>
      %492 = arith.mulf %490, %491 : vector<16x16xf32>
      %493 = arith.addf %473, %492 : vector<16x16xf32>
      %c88 = arith.constant 88 : index
      %494 = memref.load %arg3[%c88] : memref<98xf32, #tpu.memory_space<smem>>
      %c5_276 = arith.constant 5 : index
      %c0_277 = arith.constant 0 : index
      %495 = vector.load %arg9[%c5_276, %c0_277] : memref<22x16xf32, #tpu.memory_space<vmem>>, vector<16x16xf32>
      %496 = vector.broadcast %494 : f32 to vector<16x16xf32>
      %497 = arith.mulf %495, %496 : vector<16x16xf32>
      %498 = arith.addf %478, %497 : vector<16x16xf32>
      %c95 = arith.constant 95 : index
      %499 = memref.load %arg3[%c95] : memref<98xf32, #tpu.memory_space<smem>>
      %c6_278 = arith.constant 6 : index
      %c0_279 = arith.constant 0 : index
      %500 = vector.load %arg9[%c6_278, %c0_279] : memref<22x16xf32, #tpu.memory_space<vmem>>, vector<16x16xf32>
      %501 = vector.broadcast %499 : f32 to vector<16x16xf32>
      %502 = arith.mulf %500, %501 : vector<16x16xf32>
      %503 = arith.addf %483, %502 : vector<16x16xf32>
      %c1_280 = arith.constant 1 : index
      %c0_281 = arith.constant 0 : index
      %c5_282 = arith.constant 5 : index
      %504 = vector.load %arg8[%c1_280, %c0_281, %c5_282] : memref<2x22x22xf32, #tpu.memory_space<vmem>>, vector<1x22x16xf32>
      %505 = vector.shape_cast %504 : vector<1x22x16xf32> to vector<22x16xf32>
      %c0_283 = arith.constant 0 : index
      %c0_284 = arith.constant 0 : index
      %506 = vector.load %arg9[%c0_283, %c0_284] : memref<22x16xf32, #tpu.memory_space<vmem>>, vector<22x16xf32>
      tpu.vector_store %arg9[%c0_283, %c0_284], %505 {strides = array<i32>} : memref<22x16xf32, #tpu.memory_space<vmem>>, vector<22x16xf32>,
      %c54 = arith.constant 54 : index
      %507 = memref.load %arg3[%c54] : memref<98xf32, #tpu.memory_space<smem>>
      %c0_285 = arith.constant 0 : index
      %c0_286 = arith.constant 0 : index
      %508 = vector.load %arg9[%c0_285, %c0_286] : memref<22x16xf32, #tpu.memory_space<vmem>>, vector<16x16xf32>
      %509 = vector.broadcast %507 : f32 to vector<16x16xf32>
      %510 = arith.mulf %508, %509 : vector<16x16xf32>
      %511 = arith.addf %498, %510 : vector<16x16xf32>
      %c61 = arith.constant 61 : index
      %512 = memref.load %arg3[%c61] : memref<98xf32, #tpu.memory_space<smem>>
      %c1_287 = arith.constant 1 : index
      %c0_288 = arith.constant 0 : index
      %513 = vector.load %arg9[%c1_287, %c0_288] : memref<22x16xf32, #tpu.memory_space<vmem>>, vector<16x16xf32>
      %514 = vector.broadcast %512 : f32 to vector<16x16xf32>
      %515 = arith.mulf %513, %514 : vector<16x16xf32>
      %516 = arith.addf %503, %515 : vector<16x16xf32>
      %c68 = arith.constant 68 : index
      %517 = memref.load %arg3[%c68] : memref<98xf32, #tpu.memory_space<smem>>
      %c2_289 = arith.constant 2 : index
      %c0_290 = arith.constant 0 : index
      %518 = vector.load %arg9[%c2_289, %c0_290] : memref<22x16xf32, #tpu.memory_space<vmem>>, vector<16x16xf32>
      %519 = vector.broadcast %517 : f32 to vector<16x16xf32>
      %520 = arith.mulf %518, %519 : vector<16x16xf32>
      %521 = arith.addf %488, %520 : vector<16x16xf32>
      %c75 = arith.constant 75 : index
      %522 = memref.load %arg3[%c75] : memref<98xf32, #tpu.memory_space<smem>>
      %c3_291 = arith.constant 3 : index
      %c0_292 = arith.constant 0 : index
      %523 = vector.load %arg9[%c3_291, %c0_292] : memref<22x16xf32, #tpu.memory_space<vmem>>, vector<16x16xf32>
      %524 = vector.broadcast %522 : f32 to vector<16x16xf32>
      %525 = arith.mulf %523, %524 : vector<16x16xf32>
      %526 = arith.addf %493, %525 : vector<16x16xf32>
      %c82 = arith.constant 82 : index
      %527 = memref.load %arg3[%c82] : memref<98xf32, #tpu.memory_space<smem>>
      %c4_293 = arith.constant 4 : index
      %c0_294 = arith.constant 0 : index
      %528 = vector.load %arg9[%c4_293, %c0_294] : memref<22x16xf32, #tpu.memory_space<vmem>>, vector<16x16xf32>
      %529 = vector.broadcast %527 : f32 to vector<16x16xf32>
      %530 = arith.mulf %528, %529 : vector<16x16xf32>
      %531 = arith.addf %511, %530 : vector<16x16xf32>
      %c89 = arith.constant 89 : index
      %532 = memref.load %arg3[%c89] : memref<98xf32, #tpu.memory_space<smem>>
      %c5_295 = arith.constant 5 : index
      %c0_296 = arith.constant 0 : index
      %533 = vector.load %arg9[%c5_295, %c0_296] : memref<22x16xf32, #tpu.memory_space<vmem>>, vector<16x16xf32>
      %534 = vector.broadcast %532 : f32 to vector<16x16xf32>
      %535 = arith.mulf %533, %534 : vector<16x16xf32>
      %536 = arith.addf %516, %535 : vector<16x16xf32>
      %c96 = arith.constant 96 : index
      %537 = memref.load %arg3[%c96] : memref<98xf32, #tpu.memory_space<smem>>
      %c6_297 = arith.constant 6 : index
      %c0_298 = arith.constant 0 : index
      %538 = vector.load %arg9[%c6_297, %c0_298] : memref<22x16xf32, #tpu.memory_space<vmem>>, vector<16x16xf32>
      %539 = vector.broadcast %537 : f32 to vector<16x16xf32>
      %540 = arith.mulf %538, %539 : vector<16x16xf32>
      %541 = arith.addf %521, %540 : vector<16x16xf32>
      %c1_299 = arith.constant 1 : index
      %c0_300 = arith.constant 0 : index
      %c6_301 = arith.constant 6 : index
      %542 = vector.load %arg8[%c1_299, %c0_300, %c6_301] : memref<2x22x22xf32, #tpu.memory_space<vmem>>, vector<1x22x16xf32>
      %543 = vector.shape_cast %542 : vector<1x22x16xf32> to vector<22x16xf32>
      %c0_302 = arith.constant 0 : index
      %c0_303 = arith.constant 0 : index
      %544 = vector.load %arg9[%c0_302, %c0_303] : memref<22x16xf32, #tpu.memory_space<vmem>>, vector<22x16xf32>
      tpu.vector_store %arg9[%c0_302, %c0_303], %543 {strides = array<i32>} : memref<22x16xf32, #tpu.memory_space<vmem>>, vector<22x16xf32>,
      %c55 = arith.constant 55 : index
      %545 = memref.load %arg3[%c55] : memref<98xf32, #tpu.memory_space<smem>>
      %c0_304 = arith.constant 0 : index
      %c0_305 = arith.constant 0 : index
      %546 = vector.load %arg9[%c0_304, %c0_305] : memref<22x16xf32, #tpu.memory_space<vmem>>, vector<16x16xf32>
      %547 = vector.broadcast %545 : f32 to vector<16x16xf32>
      %548 = arith.mulf %546, %547 : vector<16x16xf32>
      %549 = arith.addf %536, %548 : vector<16x16xf32>
      %c62 = arith.constant 62 : index
      %550 = memref.load %arg3[%c62] : memref<98xf32, #tpu.memory_space<smem>>
      %c1_306 = arith.constant 1 : index
      %c0_307 = arith.constant 0 : index
      %551 = vector.load %arg9[%c1_306, %c0_307] : memref<22x16xf32, #tpu.memory_space<vmem>>, vector<16x16xf32>
      %552 = vector.broadcast %550 : f32 to vector<16x16xf32>
      %553 = arith.mulf %551, %552 : vector<16x16xf32>
      %554 = arith.addf %541, %553 : vector<16x16xf32>
      %c69 = arith.constant 69 : index
      %555 = memref.load %arg3[%c69] : memref<98xf32, #tpu.memory_space<smem>>
      %c2_308 = arith.constant 2 : index
      %c0_309 = arith.constant 0 : index
      %556 = vector.load %arg9[%c2_308, %c0_309] : memref<22x16xf32, #tpu.memory_space<vmem>>, vector<16x16xf32>
      %557 = vector.broadcast %555 : f32 to vector<16x16xf32>
      %558 = arith.mulf %556, %557 : vector<16x16xf32>
      %559 = arith.addf %526, %558 : vector<16x16xf32>
      %c76 = arith.constant 76 : index
      %560 = memref.load %arg3[%c76] : memref<98xf32, #tpu.memory_space<smem>>
      %c3_310 = arith.constant 3 : index
      %c0_311 = arith.constant 0 : index
      %561 = vector.load %arg9[%c3_310, %c0_311] : memref<22x16xf32, #tpu.memory_space<vmem>>, vector<16x16xf32>
      %562 = vector.broadcast %560 : f32 to vector<16x16xf32>
      %563 = arith.mulf %561, %562 : vector<16x16xf32>
      %564 = arith.addf %531, %563 : vector<16x16xf32>
      %c83 = arith.constant 83 : index
      %565 = memref.load %arg3[%c83] : memref<98xf32, #tpu.memory_space<smem>>
      %c4_312 = arith.constant 4 : index
      %c0_313 = arith.constant 0 : index
      %566 = vector.load %arg9[%c4_312, %c0_313] : memref<22x16xf32, #tpu.memory_space<vmem>>, vector<16x16xf32>
      %567 = vector.broadcast %565 : f32 to vector<16x16xf32>
      %568 = arith.mulf %566, %567 : vector<16x16xf32>
      %569 = arith.addf %549, %568 : vector<16x16xf32>
      %c90 = arith.constant 90 : index
      %570 = memref.load %arg3[%c90] : memref<98xf32, #tpu.memory_space<smem>>
      %c5_314 = arith.constant 5 : index
      %c0_315 = arith.constant 0 : index
      %571 = vector.load %arg9[%c5_314, %c0_315] : memref<22x16xf32, #tpu.memory_space<vmem>>, vector<16x16xf32>
      %572 = vector.broadcast %570 : f32 to vector<16x16xf32>
      %573 = arith.mulf %571, %572 : vector<16x16xf32>
      %574 = arith.addf %554, %573 : vector<16x16xf32>
      %c97 = arith.constant 97 : index
      %575 = memref.load %arg3[%c97] : memref<98xf32, #tpu.memory_space<smem>>
      %c6_316 = arith.constant 6 : index
      %c0_317 = arith.constant 0 : index
      %576 = vector.load %arg9[%c6_316, %c0_317] : memref<22x16xf32, #tpu.memory_space<vmem>>, vector<16x16xf32>
      %577 = vector.broadcast %575 : f32 to vector<16x16xf32>
      %578 = arith.mulf %576, %577 : vector<16x16xf32>
      %579 = arith.addf %559, %578 : vector<16x16xf32>
      %580 = arith.addf %579, %564 : vector<16x16xf32>
      %581 = arith.addf %569, %574 : vector<16x16xf32>
      %582 = arith.addf %580, %581 : vector<16x16xf32>
      %cst_318 = arith.constant 0.000000e+00 : f32
      %583 = vector.broadcast %cst_318 : f32 to vector<16x16xf32>
      %584 = arith.subf %583, %582 : vector<16x16xf32>
      %585 = math.exp %584 : vector<16x16xf32>
      %cst_319 = arith.constant 1.000000e+00 : f32
      %586 = vector.broadcast %cst_319 : f32 to vector<16x16xf32>
      %587 = arith.addf %586, %585 : vector<16x16xf32>
      %588 = tpu.reciprocal %587 {approx = true} : vector<16x16xf32> -> vector<16x16xf32>
      %589 = arith.mulf %587, %588 : vector<16x16xf32>
      %cst_320 = arith.constant 2.000000e+00 : f32
      %590 = vector.broadcast %cst_320 : f32 to vector<16x16xf32>
      %591 = arith.subf %590, %589 : vector<16x16xf32>
      %592 = arith.mulf %588, %591 : vector<16x16xf32>
      %593 = arith.mulf %587, %592 : vector<16x16xf32>
      %cst_321 = arith.constant 2.000000e+00 : f32
      %594 = vector.broadcast %cst_321 : f32 to vector<16x16xf32>
      %595 = arith.subf %594, %593 : vector<16x16xf32>
      %596 = arith.mulf %592, %595 : vector<16x16xf32>
      %c0_322 = arith.constant 0 : index
      %c0_323 = arith.constant 0 : index
      %c0_324 = arith.constant 0 : index
      %c0_325 = arith.constant 0 : index
      %597 = vector.load %arg5[%c0_322, %c0_323, %c0_324, %c0_325] : memref<1x1x16x16xf32, #tpu.memory_space<vmem>>, vector<1x1x16x16xf32>
      %598 = vector.shape_cast %597 : vector<1x1x16x16xf32> to vector<16x16xf32>
      %599 = vector.shape_cast %596 : vector<16x16xf32> to vector<1x1x16x16xf32>
      tpu.vector_store %arg5[%c0_322, %c0_323, %c0_324, %c0_325], %599 {strides = array<i32>} : memref<1x1x16x16xf32, #tpu.memory_space<vmem>>, vector<1x1x16x16xf32>,
    } else {
    }
    return
  }
  func.func @transform_0(%arg0: i32, %arg1: i32) -> (i32, i32, i32, i32) {
    %c0_i32 = arith.constant 0 : i32
    %c0_i32_0 = arith.constant 0 : i32
    %c0_i32_1 = arith.constant 0 : i32
    return %arg0, %arg1, %c0_i32, %c0_i32_0 : i32, i32, i32, i32
  }
  func.func @transform_1(%arg0: i32, %arg1: i32) -> i32 {
    %c0_i32 = arith.constant 0 : i32
    %c0_i32_0 = arith.constant 0 : i32
    return %c0_i32 : i32
  }
  func.func @transform_2(%arg0: i32, %arg1: i32) -> i32 {
    %c0_i32 = arith.constant 0 : i32
    %c0_i32_0 = arith.constant 0 : i32
    return %c0_i32 : i32
  }
  func.func @transform_3(%arg0: i32, %arg1: i32) -> (i32, i32, i32, i32) {
    %c0_i32 = arith.constant 0 : i32
    %c0_i32_0 = arith.constant 0 : i32
    %c0_i32_1 = arith.constant 0 : i32
    %c0_i32_2 = arith.constant 0 : i32
    return %arg0, %c0_i32, %c0_i32_0, %c0_i32_1 : i32, i32, i32, i32
  }
}

</mosaic_0001>

<bundles_post_ra>
// kernel: tpu_custom_call.1
= control target key start
LH: loop header
LB: loop body
LE: loop exit
PB: predicated region body
PF: predicated region fallthrough
CT: control target
= control target key end

     0   :  { %s3246_s0 = inlined_call_operand.hbm [shape: f32[2,4,16,16], index: 0, kind: input, shape index: {}]   ;;  %s3247_s1 = inlined_call_operand.vmem [shape: f32[98], index: 1, kind: input, shape index: {}]   ;;  %s3248_s2 = inlined_call_operand.<no memory space> [shape: f32[1], index: 2, kind: input, shape index: {}]   ;;  %s3249_s3 = inlined_call_operand.hbm [shape: f32[2,1,16,16], index: 3, kind: output, shape index: {}]  }
   0x1   :  { %3355 = sst [smem:[#allocation109_spill]] %s3246_s0 }
   0x2   :  { %3356 = sst [smem:[#allocation110_spill]] %s3247_s1 }
   0x3   :  { %3357 = sst [smem:[#allocation111_spill]] %s3249_s3 }
   0x4   :  { %8 = sst [smem:[#allocation6]] %s3248_s2 }
   0x5   :  { %9 = vsyncpa [#allocation8], 0 }
   0x6   :  { %11 = vsyncpa [#allocation8 + $0x1], 0 }
   0x7   :  { %12 = vsyncpa [#allocation10], 0 }
   0x8   :  { %13 = vsyncpa [#allocation9], 0 }
   0x9   :  { %15 = vsyncpa [#allocation9 + $0x1], 0  ;;  %s1856_s14 = smov 0   ;;  %s1858_s15 = smov 0  }
   0xa   :  { %s1860_s16 = smov 0   ;;  %s1862_s17 = smov 0  }
   0xb   :  { %s1864_s18 = smov 0   ;;  %s1866_s19 = smov 0  }
   0xc LB: > { %3358 = sst [smem:[#allocation16_spill]] %s1796_s14  ;;  %s1474_s2 = sadd.s32 4294967295, %s1816_s19   ;;  %s1816_s19 = sphi %s1866_s19, %s21_s19   ;;  %s1812_s18 = sphi %s1864_s18, %s3786_s18   ;;  %s1808_s17 = sphi %s1862_s17, %s3785_s17   ;;  %s1804_s16 = sphi %s1860_s16, %s3784_s16   ;;  %s1800_s15 = sphi %s1858_s15, %s3783_s15   ;;  %s1796_s14 = sphi %s1856_s14, %s3782_s14  }
   0xd   : > { %3359 = sst [smem:[#allocation17_spill]] %s1800_s15  ;;  %s1475_s20 = sadd.s32 4294967294, %s1816_s19  }
   0xe   : > { %3360 = sst [smem:[#allocation18_spill]] %s1804_s16  ;;  %s42_s21 = sadd.s32 1, %s1804_s16 }
   0xf   : > { %3361 = sst [smem:[#allocation19_spill]] %s1808_s17  ;;  %p49_p0 = scmp.ne.s32.totalorder %s1804_s16, %s1800_s15 }
  0x10   : > { %3362 = sst [smem:[#allocation20_spill]] %s1812_s18  ;;  %p50_p1 = scmp.eq.s32.totalorder %s1816_s19, 0 }
  0x11   : > { %3363 = sst [smem:[#allocation21_spill]] %s1816_s19  ;;  %p55_p2 = scmp.ne.s32.totalorder %s1800_s15, %s1796_s14 }
  0x12   : > { %p1894_p3 = scmp.eq.s32.totalorder %s1474_s2, 0  ;;  %p121_p4 = scmp.eq.s32.totalorder %s1474_s2, 1 }
  0x13   : > { %p1898_p5 = por %p50_p1, %p49_p0  ;;  %p127_p6 = scmp.eq.s32.totalorder %s1475_s20, 1 }
  0x14   : > { %p1904_p7 = por %p1894_p3, %p55_p2  ;;  %p1908_p8 = por %p121_p4, %p49_p0 }
  0x15   : > { %p1912_p9 = por %p127_p6, %p55_p2  ;;  %p1476_p10 = scmp.ge.s32.totalorder %s1816_s19, 1 }
  0x16   : > { %s3367_s25 = scalar_select %p1908_p8, 1, 0 }
  0x17   : > { %s3369_s26 = scalar_select %p1912_p9, 1, 0 }
  0x18   : > { %3368 = sst [smem:[#allocation22_spill]] %s3367_s25  ;;  %p134_p11 = scmp.lt.s32.totalorder %s1816_s19, 3 }
  0x19   : > { %3370 = sst [smem:[#allocation23_spill]] %s3369_s26  ;;  %p1617_p0 = scmp.lt.s32.totalorder %s1816_s19, 2 }
  0x1a   : > { %s3371_s1 = sld [smem:[#allocation110_spill]]  ;;  %p1921_p12 = pnand %p1476_p10, %p134_p11 }
  0x1b   : > { %p1931_p2 = pnand %p1617_p0, %p1898_p5  ;;  %s33_s6 = sadd.s32 1, %s1812_s18 }
  0x1c   : > { %p1604_p1 = pneg %p1921_p12  ;;  %p1942_p6 = scmp.ge.s32.totalorder %s33_s6, 2 }
  0x1d   : > { %s161_s8 = sand.u32 1, %s1804_s16  }
  0x1e   : > { %p1937_p4 = pnand %p1604_p1, %p1894_p3 }
  0x20   : > { %s147_s29 = sshll.u32 %s3371_s1, 4  ;;  %p1691_p11 = pneg %p1937_p4  ;;  %s148_s29 = int_to_ptr.vmem [resolvable:$true] %s147_s29 }
  0x21   : > { %s1689_s9 = scalar_lea.vmem %s148_s29, 16  ;;  %p1697_p13 = scmp.lt.s32.totalorder %s148_s29, %s148_s29 }
  0x22   : > { %p1690_p10 = scmp.ne.s32.totalorder %s148_s29, %s1689_s9  ;;  %p1698_p9 = scmp.lt.s32.totalorder %s1689_s9, %s1689_s9 }
  0x24   : > { %p1692_p5 = pnand %p1691_p11, %p1690_p10  ;;  %p1699_p8 = por %p1698_p9, %p1697_p13 }
  0x26   : > { %p1693_p0 = pneg %p1692_p5 }
  0x28   : > { %p1700_p1 = pnand %p1699_p8, %p1693_p0 }
  0x2a   : > { %1703 = shalt.err (!%p1700_p1)
}
  0x2b   : > { %s1818_s10 = smov [#allocation11]   ;;  %s3788_s6 = smov (%p1942_p6, %s33_s6), 0 }
  0x2c   : > { %1607 = dma.vmem_to_smem (!%p1937_p4), %s148_s29, 16, %s1818_s10, [#allocation10]  }
  0x2d   : > { %3376 = sst [smem:[#allocation24_spill]] %s3788_s6  ;;  %s1479_s11 = sshll.u32 %s161_s8, 6 }
  0x2e   : > { %s37_s12 = ssub.s32 %s1812_s18, %s3788_s6  ;;  %s1594_s13 = sshll.u32 %s1812_s18, 10 }
  0x2f   : > { %p40_p10 = scmp.eq.s32.totalorder %s37_s12, 0  ;;  %s3377_s0 = sld [smem:[#allocation109_spill]] }
  0x30   : > { %s165_s27 = scalar_lea.vmem [#allocation7], %s1479_s11  ;;  %s162_s9 = scalar_lea.sflag [#allocation8], %s161_s8 }
  0x31   : > { %s175_s28 = sshll.u32 %s165_s27, 4  ;;  %p1706_p8 = pneg %p1931_p2  ;;  %s176_s28 = int_to_ptr.vmem [resolvable:$true] %s175_s28 }
  0x32   : > { %s1964_s5 = scalar_select %p40_p10, %s1804_s16, %s42_s21  }
  0x33   : > { %s1717_s29 = scalar_lea.vmem %s176_s28, 1024  ;;  %s1819_s7 = smov [#allocation7]  }
  0x34   : > { %3378 = sst [smem:[#allocation25_spill]] %s1964_s5  ;;  %p1718_p9 = scmp.ne.s32.totalorder %s176_s28, %s1717_s29 }
  0x35   : > { %s174_s23 = scalar_lea.hbm %s3377_s0, %s1594_s13  ;;  %s1722_s10 = sshll.u32 %s1819_s7, 4  ;;  %s1723_s10 = int_to_ptr.vmem [resolvable:$false] %s1722_s10 }
  0x36   : > { %p1720_p13 = pnand %p1718_p9, %p1706_p8  ;;  %s1724_s12 = scalar_lea.vmem %s1723_s10, 2048 }
  0x37   : > { %p1725_p6 = scmp.lt.s32.totalorder %s176_s28, %s1723_s10  ;;  %p1726_p11 = scmp.lt.s32.totalorder %s1724_s12, %s1717_s29 }
  0x38   : > { %p1721_p4 = pneg %p1720_p13 }
  0x39   : > { %p1727_p5 = por %p1726_p11, %p1725_p6 }
  0x3b   : > { %p1728_p0 = pnand %p1727_p5, %p1721_p4 }
  0x3d   : > { %1731 = shalt.err (!%p1728_p0)
}
  0x3e   : > { %s1820_s11 = smov 128   ;;  %s1821_s21 = smov 8  }
  0x3f   : > { %1611 = dma.hbm_to_vmem [thread:$0]  (!%p1931_p2), %s174_s23, 1024, %s176_s28, %s162_s9, %s1820_s11, %s1820_s11, %s1821_s21  }
  0x40   : > { %187 = sbr.rel (%p1921_p12) target bundleno = 614 (0x266), region = 32 }
  0x45   : > { %s1973_s8 = sand.u32 1, %s1800_s15  }
  0x46   : > { %3379 = sst [smem:[#allocation26_spill]] %s1973_s8  ;;  %s1483_s13 = sshll.u32 %s1973_s8, 6 }
  0x47   : > { %s190_s2 = scalar_lea.sflag [#allocation8], %s1973_s8  ;;  %s193_s20 = scalar_lea.vmem [#allocation7], %s1483_s13 }
  0x48   : > { %1783 = dma.done.wait (%p1904_p7), %s190_s2, 1024  }
  0x49   : > { %1785 = vsyncadd (%p1904_p7), %s190_s2, 4294966272 }
  0x4a   : > { %1787 = dma.done.wait (%p1894_p3), [#allocation10], 16  }
  0x4b   : > { %1789 = vsyncadd (%p1894_p3), [#allocation10], 4294967280 }
  0x4c   : > { %202 = sfence }
  0x4d   : > { %v222_v0 = vld [vmem:[%s193_s20] sm:$0xff]  ;;  %v1486_v1 = vld [vmem:[%s193_s20 + $0x10] sm:$0xff]  ;;  %vm280_vm0 = vcmask 174080   ;;  %v223_v4 = vld [vmem:[%s193_s20 + $0x8] sm:$0xff]  ;;  %vm285_vm1 = vcmask 23552   ;;  %v1822_v11 = vmov 0.0  }
  0x4e   : > { %v1488_v2 = vld [vmem:[%s193_s20 + $0x20] sm:$0xff]  ;;  %v227_v3 = vadd.f32 %v1486_v1, %v222_v0  ;;  %v1487_v5 = vld [vmem:[%s193_s20 + $0x18] sm:$0xff]  ;;  %v229_v6 = vmax.f32 %v222_v0, %v1486_v1  ;;  %v1490_v7 = vld [vmem:[%s193_s20 + $0x30] sm:$0xff]  ;;  %281 = vst.msk [vmem:[#allocation4] sm:$0x7] %vm280_vm0, %v1822_v11  ;;  %vm290_vm2 = vcmask 179352  }
  0x4f   : > { %v228_v8 = vadd.f32 %v1487_v5, %v223_v4  ;;  %v1489_v9 = vld [vmem:[%s193_s20 + $0x28] sm:$0xff]  ;;  %v230_v10 = vmax.f32 %v223_v4, %v1487_v5  ;;  %286 = vst.msk [vmem:[#allocation4 + $0x3] sm:$0xff] %vm285_vm1, %v1822_v11  ;;  %287 = vst.msk [vmem:[#allocation4 + $0xb] sm:$0xff] %vm285_vm1, %v1822_v11  ;;  %v1491_v13 = vld [vmem:[%s193_s20 + $0x38] sm:$0xff]  ;;  %vm249_vm3 = vcmask 130048   ;;  %s1823_s22 = smov 3  }
  0x50   : > { %282 = vst.msk [vmem:[#allocation4 + $0x18] sm:$0x7] %vm280_vm0, %v1822_v11  ;;  %283 = vst.msk [vmem:[#allocation4 + $0x13] sm:$0x7] %vm280_vm0, %v1822_v11  ;;  %v234_v12 = vadd.f32 %v1488_v2, %v227_v3  ;;  %v236_v14 = vmax.f32 %v229_v6, %v1488_v2  ;;  %vm303_vm4 = vcmask 154648   ;;  %s1824_s24 = smov 127  }
  0x51   : > { %284 = vst.msk [vmem:[#allocation4 + $0x2b] sm:$0x7] %vm280_vm0, %v1822_v11  ;;  %v235_v15 = vadd.f32 %v1489_v9, %v228_v8  ;;  %v237_v16 = vmax.f32 %v230_v10, %v1489_v9  ;;  %vm326_vm5 = vcmask 128000   ;;  %s1825_s30 = smov 126   ;;  %s1826_s4 = smov 125  }
  0x52   : > { %288 = vst.msk [vmem:[#allocation4 + $0x1b] sm:$0xff] %vm285_vm1, %v1822_v11  ;;  %289 = vst.msk [vmem:[#allocation4 + $0x23] sm:$0xff] %vm285_vm1, %v1822_v11  ;;  %v241_v17 = vadd.f32 %v1490_v7, %v234_v12  ;;  %v243_v18 = vmax.f32 %v236_v14, %v1490_v7  ;;  %s1827_s23 = smov 124   ;;  %s1828_s27 = smov 123  }
  0x53   : > { %291 = vst.msk [vmem:[#allocation4 + $0x3] sm:$0xff] %vm290_vm2, %v1822_v11  ;;  %292 = vst.msk [vmem:[#allocation4 + $0xb] sm:$0xff] %vm290_vm2, %v1822_v11  ;;  %v242_v19 = vadd.f32 %v1491_v13, %v235_v15  ;;  %v244_v20 = vmax.f32 %v237_v16, %v1491_v13  ;;  %s1829_s28 = smov 122   ;;  %s2042_s9 = sld [smem:[#allocation11]] }
  0x54   : > { %293 = vst.msk [vmem:[#allocation4 + $0x1b] sm:$0xff] %vm290_vm2, %v1822_v11  ;;  %294 = vst.msk [vmem:[#allocation4 + $0x23] sm:$0xff] %vm290_vm2, %v1822_v11  ;;  %s2044_s29 = sld [smem:[#allocation6]] }
  0x55   : > { %250 = vst.msk [vmem:[#allocation2] sm:$0xff] %vm249_vm3, %v241_v17  ;;  %252 = vst.msk [vmem:[#allocation3] sm:$0xff] %vm249_vm3, %v243_v18  ;;  %s2046_s7 = sld [smem:[#allocation11 + $0x7]] }
  0x56   : > { %251 = vst.msk [vmem:[#allocation2 + $0x8] sm:$0xff] %vm249_vm3, %v242_v19  ;;  %253 = vst.msk [vmem:[#allocation3 + $0x8] sm:$0xff] %vm249_vm3, %v244_v20  ;;  %s2048_s10 = sld [smem:[#allocation11 + $0x1c]] }
  0x57   : > { %s2050_s12 = sld [smem:[#allocation11 + $0x23]] }
  0x58   : > { %s2052_s11 = sld [smem:[#allocation11 + $0xe]] }
  0x59   : > { %s2054_s21 = sld [smem:[#allocation11 + $0x15]] }
  0x5a   : > { %s2056_s13 = sld [smem:[#allocation11 + $0x2a]] }
  0x5b   : > { %s2058_s2 = sld [smem:[#allocation11 + $0x1]] }
  0x5c   : > { %v274_v21 = vld [vmem:[#allocation2] sm:$0xff]  ;;  %v278_v22 = vld [vmem:[#allocation3] sm:$0xff]  ;;  %s2060_s20 = sld [smem:[#allocation11 + $0x8]] }
  0x5d   : > { %v276_v23 = vmul.f32 0.25, %v274_v21  ;;  %v275_v24 = vld [vmem:[#allocation2 + $0x8] sm:$0xff]  ;;  %308 = vrot.lane.b32.xlu1 %v278_v22, %s1823_s22  ;;  %v279_v25 = vld [vmem:[#allocation3 + $0x8] sm:$0xff]  ;;  %s2105_s0 = sld [smem:[#allocation11 + $0x10]] }
  0x5e   : > { %v277_v26 = vmul.f32 0.25, %v275_v24  ;;  %s2109_s1 = sld [smem:[#allocation11 + $0x17]] }
  0x5f   : > { %297 = vrot.lane.b32.xlu0 %v276_v23, %s1823_s22  ;;  %s2111_s6 = sld [smem:[#allocation11 + $0x1e]] }
  0x60   : > { %s2113_s18 = sld [smem:[#allocation11 + $0x25]] }
  0x61   : > { %310 = vrot.lane.b32.xlu1 %v279_v25, %s1823_s22  ;;  %s2115_s5 = sld [smem:[#allocation11 + $0x2c]] }
  0x62   : > { %3380 = sst [smem:[#allocation27_spill]] %s2060_s20 }
  0x63   : > { %299 = vrot.lane.b32.xlu0 %v277_v26, %s1823_s22  ;;  %s2062_s22 = sld [smem:[#allocation11 + $0xf]] }
  0x64   : > { %3387 = sst [smem:[#allocation34_spill]] %s2105_s0 }
  0x65   : > { %3388 = sst [smem:[#allocation35_spill]] %s2111_s6 }
  0x66   : > { %3389 = sst [smem:[#allocation36_spill]] %s2113_s18 }
  0x67   : > { %3390 = sst [smem:[#allocation37_spill]] %s2115_s5 }
  0x68   : > { %s2117_s16 = sld [smem:[#allocation11 + $0x3]] }
  0x69   : > { %3381 = sst [smem:[#allocation28_spill]] %s2062_s22 }
  0x6a   : > { %s2119_s15 = sld [smem:[#allocation11 + $0xa]] }
  0x6b   : > { %s2123_s19 = sld [smem:[#allocation11 + $0x11]] }
  0x6c   : > { %s2131_s26 = sld [smem:[#allocation11 + $0x18]] }
  0x6d   : > { %s2139_s14 = sld [smem:[#allocation11 + $0x1f]] }
  0x6e   : > { %3391 = sst [smem:[#allocation38_spill]] %s2117_s16 }
  0x6f   : > { %s2148_s3 = sld [smem:[#allocation11 + $0x26]] }
  0x70   : > { %3392 = sst [smem:[#allocation39_spill]] %s2119_s15 }
  0x71   : > { %s2156_s25 = sld [smem:[#allocation11 + $0x2d]] }
  0x72   : > { %3393 = sst [smem:[#allocation40_spill]] %s2131_s26 }
  0x73   : > { %3394 = sst [smem:[#allocation41_spill]] %s2139_s14 }
  0x74   : > { %s2161_s17 = sld [smem:[#allocation11 + $0x4]] }
  0x75   : > { %3395 = sst [smem:[#allocation42_spill]] %s2148_s3 }
  0x76   : > { %s2164_s8 = sld [smem:[#allocation11 + $0xb]] }
  0x77   : > { %s2166_s14 = sld [smem:[#allocation11 + $0x12]] }
  0x78   : > { %s2168_s3 = sld [smem:[#allocation11 + $0x19]] }
  0x79   : > { %s2170_s26 = sld [smem:[#allocation11 + $0x20]] }
  0x7a   : > { %3396 = sst [smem:[#allocation43_spill]] %s2161_s17 }
  0x7b   : > { %s2172_s15 = sld [smem:[#allocation11 + $0x27]] }
  0x7c   : > { %s2174_s16 = sld [smem:[#allocation11 + $0x2e]] }
  0x7d   : > { %3397 = sst [smem:[#allocation44_spill]] %s2166_s14 }
  0x7e   : > { %3398 = sst [smem:[#allocation45_spill]] %s2168_s3 }
  0x7f   : > { %3399 = sst [smem:[#allocation46_spill]] %s2170_s26 }
  0x80   : > { %s2176_s5 = sld [smem:[#allocation11 + $0x5]] }
  0x81   : > { %s2186_s14 = sld [smem:[#allocation11 + $0xc]] }
  0x82   : > { %3400 = sst [smem:[#allocation47_spill]] %s2174_s16 }
  0x83   : > { %s2194_s16 = sld [smem:[#allocation11 + $0x13]] }
  0x84   : > { %s2209_s26 = sld [smem:[#allocation11 + $0x21]] }
  0x85   : > { %s2217_s3 = sld [smem:[#allocation11 + $0x2f]] }
  0x86   : > { %s2219_s17 = sld [smem:[#allocation11 + $0x6]] }
  0x87   : > { %3401 = sst [smem:[#allocation48_spill]] %s2186_s14 }
  0x88   : > { %s2203_s14 = sld [smem:[#allocation11 + $0x1a]] }
  0x89   : > { %3402 = sst [smem:[#allocation49_spill]] %s2194_s16 }
  0x8a   : > { %3404 = sst [smem:[#allocation51_spill]] %s2209_s26 }
  0x8b   : > { %s2213_s16 = sld [smem:[#allocation11 + $0x28]] }
  0x8c   : > { %3406 = sst [smem:[#allocation53_spill]] %s2217_s3 }
  0x8d   : > { %3407 = sst [smem:[#allocation54_spill]] %s2219_s17 }
  0x8e   : > { %3403 = sst [smem:[#allocation50_spill]] %s2203_s14 }
  0x8f   : > { %s2221_s14 = sld [smem:[#allocation11 + $0xd]] }
  0x90   : > { %s2223_s18 = sld [smem:[#allocation11 + $0x14]] }
  0x91   : > { %3405 = sst [smem:[#allocation52_spill]] %s2213_s16 }
  0x92   : > { %s2225_s6 = sld [smem:[#allocation11 + $0x1b]] }
  0x93   : > { %s2229_s26 = sld [smem:[#allocation11 + $0x22]] }
  0x94   : > { %s2231_s16 = sld [smem:[#allocation11 + $0x29]] }
  0x95   : > { %3408 = sst [smem:[#allocation55_spill]] %s2221_s14 }
  0x96   : > { %s2237_s17 = sld [smem:[#allocation11 + $0x30]] }
  0x97   : > { %s2366_s20 = sld [smem:[#allocation11 + $0x34]] }
  0x98   : > { %3409 = sst [smem:[#allocation56_spill]] %s2225_s6 }
  0x99   : > { %3410 = sst [smem:[#allocation57_spill]] %s2229_s26 }
  0x9a   : > { %3411 = sst [smem:[#allocation58_spill]] %s2231_s16 }
  0x9b   : > { %s2441_s0 = sld [smem:[#allocation11 + $0x3c]] }
  0x9c   : > { %3413 = sst [smem:[#allocation60_spill]] %s2237_s17 }
  0x9d   : > { %s2289_s17 = sld [smem:[#allocation11 + $0x39]] }
  0x9e   : > { %3448 = sst [smem:[#allocation95_spill]] %s2366_s20 }
  0x9f   : > { %s2435_s20 = sld [smem:[#allocation11 + $0x35]] }
  0xa0   : > { %s2465_s14 = sld [smem:[#allocation11 + $0x58]] }
  0xa1   : > { %s2493_s22 = sld [smem:[#allocation11 + $0x36]] }
  0xa2   : > { %s3499_s3 = sld [smem:[#allocation28_spill]] }
  0xa3   : > { %3427 = sst [smem:[#allocation74_spill]] %s2289_s17 }
  0xa4   : > { %s2300_s17 = sld [smem:[#allocation11 + $0x4e]] }
  0xa5   : > { %s2505_s26 = sld [smem:[#allocation11 + $0x3d]] }
  0xaa   : > { %3431 = sst [smem:[#allocation78_spill]] %s2300_s17 }
  0xab   : > { %s2317_s17 = sld [smem:[#allocation11 + $0x5c]] }
  0xcf   : > { %v309_v27 = vpop.permute.xlu1 %308 }
  0xd0   : > { %315 = vst.msk [vmem:[#allocation4 + $0x1b] sm:$0xff] %vm303_vm4, %v309_v27 }
  0xd1   : > { %v298_v28 = vpop.permute.xlu0 %297 }
  0xd2   : > { %304 = vst.msk [vmem:[#allocation4 + $0x3] sm:$0xff] %vm303_vm4, %v298_v28 }
  0xd3   : > { %v311_v29 = vpop.permute.xlu1 %310 }
  0xd4   : > { %316 = vst.msk [vmem:[#allocation4 + $0x23] sm:$0xff] %vm303_vm4, %v311_v29 }
  0xd5   : > { %v300_v30 = vpop.permute.xlu0 %299 }
  0xd6   : > { %305 = vst.msk [vmem:[#allocation4 + $0xb] sm:$0xff] %vm303_vm4, %v300_v30 }
  0xd7   : > { %v2011_v39 = vld [vmem:[#allocation4 + $0x18] sm:$0xff] }
  0xd9   : > { %v320_v31 = vld [vmem:[#allocation4] sm:$0xff] }
  0xda   : > { %324 = vst.msk [vmem:[#allocation5] sm:$0xff] %vm249_vm3, %v320_v31  ;;  %390 = vrot.lane.b32.xlu0 %v320_v31, %s1824_s24 }
  0xdb   : > { %v2015_v41 = vld [vmem:[#allocation4 + $0x20] sm:$0xff]  ;;  %v892_v42 = vld [vmem:[#allocation4 + $0x28] sm:$0x3f] }
  0xdc   : > { %v966_v43 = vld [vmem:[#allocation4 + $0x28] sm:$0x3f] }
  0xdd   : > { %v321_v32 = vld [vmem:[#allocation4 + $0x8] sm:$0xff]  ;;  %v322_v33 = vld [vmem:[#allocation4 + $0x10] sm:$0x3f] }
  0xde   : > { %v386_v34 = vld [vmem:[#allocation4 + $0x10] sm:$0x3f]  ;;  %325 = vst.msk [vmem:[#allocation5 + $0x8] sm:$0xff] %vm249_vm3, %v321_v32  ;;  %392 = vrot.lane.b32.xlu1 %v321_v32, %s1824_s24  ;;  %v1040_v44 = vld [vmem:[#allocation4 + $0x28] sm:$0x3f] }
  0xdf   : > { %327 = vst.msk [vmem:[#allocation5 + $0x10] sm:$0x3f] %vm326_vm5, %v322_v33  ;;  %394 = vrot.lane.b32.xlu0 %v386_v34, %s1824_s24  ;;  %v460_v35 = vld [vmem:[#allocation4 + $0x10] sm:$0x3f]  ;;  %v1114_v45 = vld [vmem:[#allocation4 + $0x28] sm:$0x3f] }
  0xe0   : > { %v534_v36 = vld [vmem:[#allocation4 + $0x10] sm:$0x3f]  ;;  %v1188_v46 = vld [vmem:[#allocation4 + $0x28] sm:$0x3f] }
  0xe1   : > { %v608_v37 = vld [vmem:[#allocation4 + $0x10] sm:$0x3f]  ;;  %v1262_v47 = vld [vmem:[#allocation4 + $0x28] sm:$0x3f] }
  0xe2   : > { %464 = vrot.lane.b32.xlu1 %v320_v31, %s1825_s30  ;;  %v682_v38 = vld [vmem:[#allocation4 + $0x10] sm:$0x3f] }
  0xe3   : > { %466 = vrot.lane.b32.xlu0 %v321_v32, %s1825_s30  ;;  %v756_v40 = vld [vmem:[#allocation4 + $0x10] sm:$0x3f] }
  0xe4   : > { %v2064_v48 = vld [vmem:[#allocation5] sm:$0xff] }
  0xe5   : > { %v2068_v49 = vld [vmem:[#allocation5 + $0x1] sm:$0xff] }
  0xe6   : > { %468 = vrot.lane.b32.xlu1 %v460_v35, %s1825_s30  ;;  %v2070_v50 = vld [vmem:[#allocation5 + $0x2] sm:$0xff]  ;;  %v2091_v57 = vld [vmem:[#allocation5 + $0xa] sm:$0xff] }
  0xe7   : > { %538 = vrot.lane.b32.xlu0 %v320_v31, %s1826_s4  ;;  %v2072_v51 = vld [vmem:[#allocation5 + $0x3] sm:$0xff]  ;;  %v2093_v58 = vld [vmem:[#allocation5 + $0xb] sm:$0xff] }
  0xe8   : > { %v2076_v52 = vld [vmem:[#allocation5 + $0x4] sm:$0xff]  ;;  %v2095_v59 = vld [vmem:[#allocation5 + $0xc] sm:$0xff] }
  0xe9   : > { %v2078_v53 = vld [vmem:[#allocation5 + $0x5] sm:$0xff]  ;;  %v2099_v60 = vld [vmem:[#allocation5 + $0xd] sm:$0xff] }
  0xea   : > { %540 = vrot.lane.b32.xlu1 %v321_v32, %s1826_s4  ;;  %v2080_v54 = vld [vmem:[#allocation5 + $0x6] sm:$0xff]  ;;  %v2101_v61 = vld [vmem:[#allocation5 + $0xe] sm:$0xff] }
  0xeb   : > { %542 = vrot.lane.b32.xlu0 %v534_v36, %s1826_s4  ;;  %v2087_v56 = vld [vmem:[#allocation5 + $0x9] sm:$0xff]  ;;  %v339_v36 = vstv %s2046_s7  ;;  %s2247_s7 = sld [smem:[#allocation11 + $0x31]] }
  0xec   : > { %v2103_v62 = vld [vmem:[#allocation5 + $0x8] sm:$0xff] }
  0xee   : > { %612 = vrot.lane.b32.xlu1 %v320_v31, %s1827_s23 }
  0xef   : > { %614 = vrot.lane.b32.xlu0 %v321_v32, %s1827_s23 }
  0xf1   : > { %3416 = sst [smem:[#allocation63_spill]] %s2247_s7 }
  0xf2   : > { %616 = vrot.lane.b32.xlu1 %v608_v37, %s1827_s23  ;;  %v371_v37 = vstv %s2050_s12  ;;  %s2257_s12 = sld [smem:[#allocation11 + $0x38]] }
  0xf3   : > { %686 = vrot.lane.b32.xlu0 %v320_v31, %s1828_s27  ;;  %s2276_s7 = sld [smem:[#allocation11 + $0x4d]] }
  0xf6   : > { %688 = vrot.lane.b32.xlu1 %v321_v32, %s1828_s27 }
  0xf7   : > { %690 = vrot.lane.b32.xlu0 %v682_v38, %s1828_s27 }
  0xf8   : > { %3418 = sst [smem:[#allocation65_spill]] %s2257_s12 }
  0xf9   : > { %s2271_s12 = sld [smem:[#allocation11 + $0x46]] }
  0xfa   : > { %760 = vrot.lane.b32.xlu1 %v320_v31, %s1829_s28  ;;  %3423 = sst [smem:[#allocation70_spill]] %s2276_s7 }
  0xfb   : > { %762 = vrot.lane.b32.xlu0 %v321_v32, %s1829_s28  ;;  %s2517_s7 = sld [smem:[#allocation11 + $0x44]] }
  0xfe   : > { %764 = vrot.lane.b32.xlu1 %v756_v40, %s1829_s28 }
  0xff   : > { %896 = vrot.lane.b32.xlu0 %v2011_v39, %s1824_s24  ;;  %3422 = sst [smem:[#allocation69_spill]] %s2271_s12 }
 0x100   : > { %s2285_s12 = sld [smem:[#allocation11 + $0x32]] }
 0x102   : > { %898 = vrot.lane.b32.xlu1 %v2015_v41, %s1824_s24 }
 0x103   : > { %900 = vrot.lane.b32.xlu0 %v892_v42, %s1824_s24  ;;  %s2066_s24 = sld [smem:[#allocation11 + $0x16]] }
 0x106   : > { %970 = vrot.lane.b32.xlu1 %v2011_v39, %s1825_s30  ;;  %3426 = sst [smem:[#allocation73_spill]] %s2285_s12 }
 0x107   : > { %972 = vrot.lane.b32.xlu0 %v2015_v41, %s1825_s30  ;;  %s2556_s12 = sld [smem:[#allocation11 + $0x59]] }
 0x109   : > { %3382 = sst [smem:[#allocation29_spill]] %s2066_s24 }
 0x10a   : > { %974 = vrot.lane.b32.xlu1 %v966_v43, %s1825_s30  ;;  %s2074_s30 = sld [smem:[#allocation11 + $0x1d]]  ;;  %v341_v43 = vmul.f32 %v339_v36, %v2087_v56 }
 0x10b   : > { %1044 = vrot.lane.b32.xlu0 %v2011_v39, %s1826_s4  ;;  %s3466_s24 = sld [smem:[#allocation47_spill]] }
 0x10c   : > { %s3501_s16 = sld [smem:[#allocation29_spill]] }
 0x10e   : > { %1046 = vrot.lane.b32.xlu1 %v2015_v41, %s1826_s4 }
 0x10f   : > { %1048 = vrot.lane.b32.xlu0 %v1040_v44, %s1826_s4  ;;  %s2082_s4 = sld [smem:[#allocation11 + $0x24]]  ;;  %v373_v44 = vmul.f32 %v371_v37, %v2099_v60  ;;  %v340_v60 = vmul.f32 %v339_v36, %v2068_v49 }
 0x111   : > { %v375_v49 = vadd.f32 %v373_v44, %v341_v43 }
 0x112   : > { %1118 = vrot.lane.b32.xlu1 %v2011_v39, %s1827_s23 }
 0x113   : > { %1120 = vrot.lane.b32.xlu0 %v2015_v41, %s1827_s23 }
 0x115   : > { %3383 = sst [smem:[#allocation30_spill]] %s2082_s4 }
 0x116   : > { %1122 = vrot.lane.b32.xlu1 %v1114_v45, %s1827_s23  ;;  %s2085_s23 = sld [smem:[#allocation11 + $0x2b]] }
 0x117   : > { %1192 = vrot.lane.b32.xlu0 %v2011_v39, %s1828_s27 }
 0x11a   : > { %1194 = vrot.lane.b32.xlu1 %v2015_v41, %s1828_s27 }
 0x11b   : > { %1196 = vrot.lane.b32.xlu0 %v1188_v46, %s1828_s27  ;;  %s2089_s27 = sld [smem:[#allocation11 + $0x2]] }
 0x11c   : > { %3384 = sst [smem:[#allocation31_spill]] %s2085_s23 }
 0x11d   : > { %s3473_s23 = sld [smem:[#allocation54_spill]] }
 0x11e   : > { %1266 = vrot.lane.b32.xlu1 %v2011_v39, %s1829_s28  ;;  %3506 = sst [smem:[#allocation54_spill]] %s2517_s7 }
 0x11f   : > { %1268 = vrot.lane.b32.xlu0 %v2015_v41, %s1829_s28  ;;  %s3543_s7 = sld [smem:[#allocation40_spill]] }
 0x121   : > { %3385 = sst [smem:[#allocation32_spill]] %s2089_s27 }
 0x122   : > { %1270 = vrot.lane.b32.xlu1 %v1262_v47, %s1829_s28  ;;  %s2097_s28 = sld [smem:[#allocation11 + $0x9]] }
 0x123   : > { %s2389_s27 = sld [smem:[#allocation11 + $0x49]] }
 0x124   : > { %s3518_s4 = sld [smem:[#allocation32_spill]] }
 0x128   : > { %3386 = sst [smem:[#allocation33_spill]] %s2097_s28 }
 0x129   : > { %3454 = sst [smem:[#allocation98_spill]] %s2389_s27 }
 0x12a   : > { %s3474_s27 = sld [smem:[#allocation60_spill]] }
 0x12b   : > { %s2471_s28 = sld [smem:[#allocation11 + $0x5f]] }
 0x14c   : > { %v391_v55 = vpop.permute.xlu0 %390 }
 0x14d   : > { %399 = vst.msk [vmem:[#allocation5] sm:$0xff] %vm249_vm3, %v391_v55 }
 0x150   : > { %v393_v63 = vpop.permute.xlu1 %392 }
 0x151   : > { %v395_v0 = vpop.permute.xlu0 %394  ;;  %400 = vst.msk [vmem:[#allocation5 + $0x8] sm:$0xff] %vm249_vm3, %v393_v63  ;;  %v405_v63 = vstv %s2058_s2  ;;  %s2266_s2 = sld [smem:[#allocation11 + $0x3f]] }
 0x152   : > { %401 = vst.msk [vmem:[#allocation5 + $0x10] sm:$0x3f] %vm326_vm5, %v395_v0 }
 0x154   : > { %v465_v1 = vpop.permute.xlu1 %464  ;;  %v2121_v2 = vld [vmem:[#allocation5] sm:$0xff] }
 0x155   : > { %v467_v9 = vpop.permute.xlu0 %466 }
 0x157   : > { %3420 = sst [smem:[#allocation67_spill]] %s2266_s2 }
 0x158   : > { %v2125_v3 = vld [vmem:[#allocation5 + $0x1] sm:$0xff]  ;;  %v469_v10 = vpop.permute.xlu1 %468  ;;  %s2279_s2 = sld [smem:[#allocation11 + $0x54]] }
 0x159   : > { %v2127_v4 = vld [vmem:[#allocation5 + $0x2] sm:$0xff]  ;;  %v2143_v12 = vld [vmem:[#allocation5 + $0xa] sm:$0xff]  ;;  %v539_v18 = vpop.permute.xlu0 %538 }
 0x15a   : > { %v2129_v5 = vld [vmem:[#allocation5 + $0x3] sm:$0xff]  ;;  %v2145_v13 = vld [vmem:[#allocation5 + $0xb] sm:$0xff] }
 0x15b   : > { %v2133_v6 = vld [vmem:[#allocation5 + $0x4] sm:$0xff]  ;;  %v2150_v14 = vld [vmem:[#allocation5 + $0xc] sm:$0xff] }
 0x15c   : > { %v2135_v7 = vld [vmem:[#allocation5 + $0x5] sm:$0xff]  ;;  %v2152_v15 = vld [vmem:[#allocation5 + $0xd] sm:$0xff]  ;;  %v541_v26 = vpop.permute.xlu1 %540 }
 0x15d   : > { %v2137_v8 = vld [vmem:[#allocation5 + $0x6] sm:$0xff]  ;;  %v2154_v16 = vld [vmem:[#allocation5 + $0xe] sm:$0xff]  ;;  %v543_v27 = vpop.permute.xlu0 %542 }
 0x15e   : > { %v2141_v11 = vld [vmem:[#allocation5 + $0x9] sm:$0xff]  ;;  %473 = vst.msk [vmem:[#allocation5] sm:$0xff] %vm249_vm3, %v465_v1  ;;  %3424 = sst [smem:[#allocation71_spill]] %s2279_s2 }
 0x15f   : > { %v2158_v17 = vld [vmem:[#allocation5 + $0x8] sm:$0xff]  ;;  %475 = vst.msk [vmem:[#allocation5 + $0x10] sm:$0x3f] %vm326_vm5, %v469_v10  ;;  %s3519_s2 = sld [smem:[#allocation33_spill]] }
 0x160   : > { %474 = vst.msk [vmem:[#allocation5 + $0x8] sm:$0xff] %vm249_vm3, %v467_v9  ;;  %v613_v35 = vpop.permute.xlu1 %612  ;;  %v372_v9 = vmul.f32 %v371_v37, %v2078_v53  ;;  %v407_v10 = vmul.f32 %v405_v63, %v2158_v17  ;;  %v406_v53 = vmul.f32 %v405_v63, %v2121_v2  ;;  %v503_v17 = vstv %s2109_s1  ;;  %s2292_s1 = sld [smem:[#allocation11 + $0x40]] }
 0x161   : > { %v331_v63 = vstv %s2042_s9  ;;  %s2306_s9 = sld [smem:[#allocation11 + $0x55]] }
 0x162   : > { %v374_v36 = vadd.f32 %v372_v9, %v340_v60  ;;  %v409_v37 = vadd.f32 %v407_v10, %v375_v49 }
 0x164   : > { %v617_v55 = vpop.permute.xlu1 %616  ;;  %v408_v2 = vadd.f32 %v406_v53, %v374_v36 }
 0x165   : > { %v2184_v22 = vld [vmem:[#allocation5] sm:$0xff] }
 0x166   : > { %3428 = sst [smem:[#allocation75_spill]] %s2292_s1 }
 0x167   : > { %v2178_v19 = vld [vmem:[#allocation5 + $0x9] sm:$0xff]  ;;  %v2198_v29 = vld [vmem:[#allocation5 + $0x1] sm:$0xff]  ;;  %3434 = sst [smem:[#allocation81_spill]] %s2306_s9 }
 0x168   : > { %v2180_v20 = vld [vmem:[#allocation5 + $0xa] sm:$0xff]  ;;  %v2200_v30 = vld [vmem:[#allocation5 + $0x2] sm:$0xff]  ;;  %s3497_s9 = sld [smem:[#allocation27_spill]] }
 0x169   : > { %v2182_v21 = vld [vmem:[#allocation5 + $0xb] sm:$0xff]  ;;  %v501_v31 = vld [vmem:[#allocation5 + $0x3] sm:$0xff]  ;;  %s2535_s1 = sld [smem:[#allocation11 + $0x4b]] }
 0x16a   : > { %v2188_v23 = vld [vmem:[#allocation5 + $0xc] sm:$0xff]  ;;  %v2205_v32 = vld [vmem:[#allocation5 + $0x4] sm:$0xff]  ;;  %v504_v43 = vmul.f32 %v503_v17, %v501_v31  ;;  %v505_v44 = vmul.f32 %v503_v17, %v2182_v21  ;;  %3517 = sst [smem:[#allocation27_spill]] %s2556_s12 }
 0x16b   : > { %v2190_v24 = vld [vmem:[#allocation5 + $0xd] sm:$0xff]  ;;  %v2207_v33 = vld [vmem:[#allocation5 + $0x5] sm:$0xff]  ;;  %s2654_s12 = sld [smem:[#allocation11 + $0x53]] }
 0x16c   : > { %v2192_v25 = vld [vmem:[#allocation5 + $0xe] sm:$0xff]  ;;  %v2211_v34 = vld [vmem:[#allocation5 + $0x6] sm:$0xff] }
 0x16d   : > { %v2196_v28 = vld [vmem:[#allocation5 + $0x8] sm:$0xff]  ;;  %549 = vst.msk [vmem:[#allocation5 + $0x10] sm:$0x3f] %vm326_vm5, %v543_v27 }
 0x16e   : > { %548 = vst.msk [vmem:[#allocation5 + $0x8] sm:$0xff] %vm249_vm3, %v541_v26  ;;  %547 = vst.msk [vmem:[#allocation5] sm:$0xff] %vm249_vm3, %v539_v18 }
 0x16f   : > { %3511 = sst [smem:[#allocation60_spill]] %s2535_s1 }
 0x170   : > { %s3534_s1 = sld [smem:[#allocation39_spill]] }
 0x175   : > { %v2233_v38 = vld [vmem:[#allocation5 + $0x9] sm:$0xff]  ;;  %v2251_v0 = vld [vmem:[#allocation5] sm:$0xff] }
 0x176   : > { %v568_v40 = vld [vmem:[#allocation5 + $0xa] sm:$0xff]  ;;  %v2255_v56 = vld [vmem:[#allocation5 + $0x1] sm:$0xff] }
 0x177   : > { %v2235_v42 = vld [vmem:[#allocation5 + $0xb] sm:$0xff]  ;;  %v567_v18 = vld [vmem:[#allocation5 + $0x2] sm:$0xff] }
 0x178   : > { %3412 = vst [vmem:[#allocation59_spill] sm:$0xff] %v2235_v42  ;;  %v2241_v45 = vld [vmem:[#allocation5 + $0xc] sm:$0xff]  ;;  %v2262_v26 = vld [vmem:[#allocation5 + $0x3] sm:$0xff] }
 0x179   : > { %3414 = vst [vmem:[#allocation61_spill] sm:$0xff] %v2241_v45  ;;  %v2243_v46 = vld [vmem:[#allocation5 + $0xd] sm:$0xff]  ;;  %v2264_v27 = vld [vmem:[#allocation5 + $0x4] sm:$0xff]  ;;  %v437_v45 = vstv %s2074_s30  ;;  %s2282_s30 = sld [smem:[#allocation11 + $0x5b]] }
 0x17a   : > { %3415 = vst [vmem:[#allocation62_spill] sm:$0xff] %v2243_v46  ;;  %v2245_v47 = vld [vmem:[#allocation5 + $0xe] sm:$0xff]  ;;  %3419 = vst [vmem:[#allocation66_spill] sm:$0xff] %v2264_v27  ;;  %v2269_v46 = vld [vmem:[#allocation5 + $0x5] sm:$0xff]  ;;  %v438_v27 = vmul.f32 %v437_v45, %v2133_v6 }
 0x17b   : > { %623 = vst.msk [vmem:[#allocation5 + $0x10] sm:$0x3f] %vm326_vm5, %v617_v55  ;;  %v2253_v1 = vld [vmem:[#allocation5 + $0x8] sm:$0xff]  ;;  %v615_v55 = vpop.permute.xlu0 %614  ;;  %3421 = vst [vmem:[#allocation68_spill] sm:$0xff] %v2269_v46  ;;  %v569_v46 = vstv %s2123_s19  ;;  %s2294_s19 = sld [smem:[#allocation11 + $0x47]] }
 0x17c   : > { %3417 = vst [vmem:[#allocation64_spill] sm:$0xff] %v2253_v1  ;;  %v599_v1 = vld [vmem:[#allocation5 + $0x6] sm:$0xff]  ;;  %v440_v60 = vadd.f32 %v438_v27, %v408_v2  ;;  %v570_v9 = vmul.f32 %v569_v46, %v567_v18  ;;  %v571_v10 = vmul.f32 %v569_v46, %v568_v40  ;;  %v332_v40 = vmul.f32 %v331_v63, %v2064_v48 }
 0x17d   : > { %621 = vst.msk [vmem:[#allocation5] sm:$0xff] %vm249_vm3, %v613_v35  ;;  %622 = vst.msk [vmem:[#allocation5 + $0x8] sm:$0xff] %vm249_vm3, %v615_v55  ;;  %v439_v35 = vmul.f32 %v437_v45, %v2150_v14  ;;  %v601_v46 = vstv %s2156_s25  ;;  %v635_v18 = vstv %s2164_s8  ;;  %s2323_s25 = sld [smem:[#allocation11 + $0x33]] }
 0x17e   : > { %v506_v31 = vadd.f32 %v504_v43, %v440_v60  ;;  %v347_v43 = vstv %s2052_s11  ;;  %s2332_s8 = sld [smem:[#allocation11 + $0x3a]] }
 0x17f   : > { %3425 = sst [smem:[#allocation72_spill]] %s2282_s30  ;;  %v687_v55 = vpop.permute.xlu0 %686  ;;  %v441_v6 = vadd.f32 %v439_v35, %v409_v37  ;;  %v318_v35 = vstv %s2044_s29 }
 0x180   : > { %s2338_s29 = sld [smem:[#allocation11 + $0x41]] }
 0x181   : > { %v507_v45 = vadd.f32 %v505_v44, %v441_v6  ;;  %v572_v44 = vadd.f32 %v570_v9, %v506_v31  ;;  %v602_v9 = vmul.f32 %v601_v46, %v599_v1  ;;  %s2347_s11 = sld [smem:[#allocation11 + $0x4f]] }
 0x182   : > { %s3516_s30 = sld [smem:[#allocation31_spill]] }
 0x183   : > { %v573_v60 = vadd.f32 %v571_v10, %v507_v45  ;;  %3439 = sst [smem:[#allocation86_spill]] %s2323_s25  ;;  %v603_v10 = vmul.f32 %v601_v46, %v2245_v47 }
 0x184   : > { %v2296_v49 = vld [vmem:[#allocation5] sm:$0xff]  ;;  %v2298_v14 = vld [vmem:[#allocation5 + $0x8] sm:$0xff]  ;;  %3442 = sst [smem:[#allocation89_spill]] %s2332_s8 }
 0x185   : > { %3429 = vst [vmem:[#allocation76_spill] sm:$0xff] %v2296_v49  ;;  %3430 = vst [vmem:[#allocation77_spill] sm:$0xff] %v2298_v14  ;;  %v633_v21 = vld [vmem:[#allocation5 + $0x1] sm:$0xff]  ;;  %v634_v53 = vld [vmem:[#allocation5 + $0x9] sm:$0xff]  ;;  %v363_v49 = vstv %s2048_s10  ;;  %s2343_s10 = sld [smem:[#allocation11 + $0x48]] }
 0x186   : > { %v2302_v27 = vld [vmem:[#allocation5 + $0x2] sm:$0xff]  ;;  %v2304_v17 = vld [vmem:[#allocation5 + $0xa] sm:$0xff]  ;;  %v636_v31 = vmul.f32 %v635_v18, %v633_v21  ;;  %v637_v45 = vmul.f32 %v635_v18, %v634_v53  ;;  %3443 = sst [smem:[#allocation90_spill]] %s2338_s29  ;;  %v364_v47 = vmul.f32 %v363_v49, %v2076_v52  ;;  %v604_v21 = vadd.f32 %v602_v9, %v572_v44 }
 0x187   : > { %3432 = vst [vmem:[#allocation79_spill] sm:$0xff] %v2302_v27  ;;  %3433 = vst [vmem:[#allocation80_spill] sm:$0xff] %v2304_v17  ;;  %v2311_v36 = vld [vmem:[#allocation5 + $0x3] sm:$0xff]  ;;  %v2313_v37 = vld [vmem:[#allocation5 + $0xb] sm:$0xff]  ;;  %v689_v17 = vpop.permute.xlu1 %688  ;;  %v355_v27 = vstv %s2054_s21  ;;  %v605_v53 = vadd.f32 %v603_v10, %v573_v60  ;;  %3445 = sst [smem:[#allocation92_spill]] %s2347_s11  ;;  %v365_v18 = vmul.f32 %v363_v49, %v2095_v59 }
 0x188   : > { %3435 = vst [vmem:[#allocation82_spill] sm:$0xff] %v2311_v36  ;;  %3436 = vst [vmem:[#allocation83_spill] sm:$0xff] %v2313_v37  ;;  %v2315_v2 = vld [vmem:[#allocation5 + $0x4] sm:$0xff]  ;;  %v2321_v6 = vld [vmem:[#allocation5 + $0xc] sm:$0xff]  ;;  %v691_v36 = vpop.permute.xlu0 %690  ;;  %v379_v37 = vstv %s2056_s13  ;;  %s2355_s21 = sld [smem:[#allocation11 + $0x56]]  ;;  %v2358_v52 = vmul.f32 %v355_v27, %v2093_v58 }
 0x189   : > { %3437 = vst [vmem:[#allocation84_spill] sm:$0xff] %v2315_v2  ;;  %3438 = vst [vmem:[#allocation85_spill] sm:$0xff] %v2321_v6  ;;  %v665_v14 = vld [vmem:[#allocation5 + $0x5] sm:$0xff]  ;;  %v666_v48 = vld [vmem:[#allocation5 + $0xd] sm:$0xff]  ;;  %v333_v6 = vmul.f32 %v331_v63, %v2103_v62  ;;  %v380_v62 = vmul.f32 %v379_v37, %v2080_v54  ;;  %v667_v63 = vstv %s2172_s15  ;;  %v639_v46 = vadd.f32 %v637_v45, %v605_v53  ;;  %s2361_s13 = sld [smem:[#allocation11 + $0x5d]] }
 0x18a   : > { %v2328_v42 = vld [vmem:[#allocation5 + $0x6] sm:$0xff]  ;;  %v2330_v2 = vld [vmem:[#allocation5 + $0xe] sm:$0xff]  ;;  %v668_v58 = vmul.f32 %v667_v63, %v665_v14  ;;  %s2371_s15 = sld [smem:[#allocation11 + $0x3b]] }
 0x18b   : > { %3440 = vst [vmem:[#allocation87_spill] sm:$0xff] %v2328_v42  ;;  %3441 = vst [vmem:[#allocation88_spill] sm:$0xff] %v2330_v2  ;;  %v334_v2 = vadd.f32 %v332_v40, %v318_v35  ;;  %v348_v42 = vmul.f32 %v347_v43, %v2070_v50  ;;  %3444 = sst [smem:[#allocation91_spill]] %s2343_s10  ;;  %v381_v50 = vmul.f32 %v379_v37, %v2101_v61  ;;  %v761_v54 = vpop.permute.xlu1 %760 }
 0x18c   : > { %695 = vst.msk [vmem:[#allocation5] sm:$0xff] %vm249_vm3, %v687_v55  ;;  %696 = vst.msk [vmem:[#allocation5 + $0x8] sm:$0xff] %vm249_vm3, %v689_v17  ;;  %v349_v55 = vmul.f32 %v347_v43, %v2091_v57  ;;  %v2350_v17 = vmul.f32 %v355_v27, %v2072_v51  ;;  %v638_v40 = vadd.f32 %v636_v31, %v604_v21  ;;  %v701_v43 = vstv %s2176_s5  ;;  %s2381_s5 = sld [smem:[#allocation11 + $0x42]] }
 0x18d   : > { %697 = vst.msk [vmem:[#allocation5 + $0x10] sm:$0x3f] %vm326_vm5, %v691_v36  ;;  %v335_v51 = vadd.f32 %v333_v6, %v318_v35  ;;  %v2368_v61 = vadd.f32 %v364_v47, %v334_v2  ;;  %v669_v27 = vmul.f32 %v667_v63, %v666_v48  ;;  %v2373_v44 = vadd.f32 %v380_v62, %v348_v42  ;;  %s3469_s10 = sld [smem:[#allocation50_spill]]  ;;  %v830_v35 = vld [vmem:[#allocation4 + $0x28] sm:$0x3f] }
 0x18e   : > { %3446 = sst [smem:[#allocation93_spill]] %s2355_s21  ;;  %v2375_v60 = vadd.f32 %v381_v50, %v349_v55  ;;  %v670_v2 = vadd.f32 %v668_v58, %v638_v40  ;;  %v3507_v57 = vstv %s3497_s9 }
 0x18f   : > { %3447 = sst [smem:[#allocation94_spill]] %s2361_s13  ;;  %v671_v14 = vadd.f32 %v669_v27, %v639_v46  ;;  %v2391_v47 = vadd.f32 %v365_v18, %v335_v51  ;;  %v414_v59 = vmul.f32 %v3507_v57, %v2125_v3  ;;  %v3512_v3 = vstv %s3501_s16 }
 0x190   : > { %3449 = sst [smem:[#allocation96_spill]] %s2371_s15 }
 0x191   : > { %s2402_s13 = sld [smem:[#allocation11 + $0x50]] }
 0x192   : > { %3451 = sst [smem:[#allocation97_spill]] %s2381_s5 }
 0x193   : > { %v699_v49 = vld [vmem:[#allocation5] sm:$0xff]  ;;  %v700_v6 = vld [vmem:[#allocation5 + $0x8] sm:$0xff]  ;;  %s2416_s21 = sld [smem:[#allocation11 + $0x57]] }
 0x194   : > { %v2379_v9 = vld [vmem:[#allocation5 + $0x1] sm:$0xff]  ;;  %v702_v48 = vmul.f32 %v701_v43, %v699_v49  ;;  %v703_v42 = vmul.f32 %v701_v43, %v700_v6  ;;  %v2383_v10 = vld [vmem:[#allocation5 + $0x9] sm:$0xff]  ;;  %v763_v49 = vpop.permute.xlu0 %762  ;;  %v765_v6 = vpop.permute.xlu1 %764  ;;  %s3470_s29 = sld [smem:[#allocation51_spill]] }
 0x195   : > { %v2385_v31 = vld [vmem:[#allocation5 + $0x2] sm:$0xff]  ;;  %v2387_v45 = vld [vmem:[#allocation5 + $0xa] sm:$0xff]  ;;  %s2426_s8 = sld [smem:[#allocation11 + $0x5e]] }
 0x196   : > { %v2396_v62 = vld [vmem:[#allocation5 + $0x3] sm:$0xff]  ;;  %v2398_v50 = vld [vmem:[#allocation5 + $0xb] sm:$0xff]  ;;  %v2406_v51 = vadd.f32 %v702_v48, %v670_v2  ;;  %v2408_v18 = vadd.f32 %v703_v42, %v671_v14  ;;  %s2453_s11 = sld [smem:[#allocation11 + $0x4a]] }
 0x197   : > { %v2400_v63 = vld [vmem:[#allocation5 + $0x4] sm:$0xff]  ;;  %3459 = sst [smem:[#allocation99_spill]] %s2402_s13  ;;  %v2410_v43 = vld [vmem:[#allocation5 + $0xc] sm:$0xff] }
 0x198   : > { %3462 = vst [vmem:[#allocation100_spill] sm:$0xff] %v2408_v18  ;;  %v2412_v58 = vld [vmem:[#allocation5 + $0x5] sm:$0xff]  ;;  %v2414_v27 = vld [vmem:[#allocation5 + $0xd] sm:$0xff]  ;;  %s3467_s13 = sld [smem:[#allocation48_spill]] }
 0x199   : > { %v2422_v42 = vld [vmem:[#allocation5 + $0x6] sm:$0xff]  ;;  %v2424_v40 = vld [vmem:[#allocation5 + $0xe] sm:$0xff]  ;;  %s2459_s25 = sld [smem:[#allocation11 + $0x51]] }
 0x19a   : > { %769 = vst.msk [vmem:[#allocation5] sm:$0xff] %vm249_vm3, %v761_v54  ;;  %770 = vst.msk [vmem:[#allocation5 + $0x8] sm:$0xff] %vm249_vm3, %v763_v49  ;;  %3481 = sst [smem:[#allocation48_spill]] %s2465_s14 }
 0x19b   : > { %3471 = sst [smem:[#allocation47_spill]] %s2426_s8  ;;  %771 = vst.msk [vmem:[#allocation5 + $0x10] sm:$0x3f] %vm326_vm5, %v765_v6 }
 0x19c   : > { %s2447_s8 = sld [smem:[#allocation11 + $0x43]] }
 0x19d   : > { %3485 = sst [smem:[#allocation50_spill]] %s2471_s28 }
 0x19e   : > { %s3488_s15 = sld [smem:[#allocation93_spill]] }
 0x19f   : > { %3494 = sst [smem:[#allocation51_spill]] %s2493_s22 }
 0x1a0   : > { %s3504_s6 = sld [smem:[#allocation99_spill]] }
 0x1a1   : > { %v2473_v46 = vld [vmem:[#allocation5] sm:$0xff]  ;;  %v2475_v48 = vld [vmem:[#allocation5 + $0x8] sm:$0xff]  ;;  %s3505_s5 = sld [smem:[#allocation47_spill]] }
 0x1a2   : > { %v2477_v6 = vld [vmem:[#allocation5 + $0x1] sm:$0xff]  ;;  %v2483_v14 = vld [vmem:[#allocation5 + $0x9] sm:$0xff]  ;;  %s2548_s9 = sld [smem:[#allocation11 + $0x52]] }
 0x1a3   : > { %v2485_v54 = vld [vmem:[#allocation5 + $0x2] sm:$0xff]  ;;  %v2487_v2 = vld [vmem:[#allocation5 + $0xa] sm:$0xff]  ;;  %s3520_s16 = sld [smem:[#allocation34_spill]] }
 0x1a4   : > { %v2495_v49 = vld [vmem:[#allocation5 + $0x3] sm:$0xff]  ;;  %v2497_v55 = vld [vmem:[#allocation5 + $0xb] sm:$0xff]  ;;  %s2586_s14 = sld [smem:[#allocation11 + $0x60]] }
 0x1a5   : > { %3495 = vst [vmem:[#allocation101_spill] sm:$0xff] %v2495_v49  ;;  %3496 = vst [vmem:[#allocation102_spill] sm:$0xff] %v2497_v55  ;;  %v2499_v21 = vld [vmem:[#allocation5 + $0x4] sm:$0xff]  ;;  %v2507_v36 = vld [vmem:[#allocation5 + $0xc] sm:$0xff]  ;;  %s3533_s28 = sld [smem:[#allocation37_spill]] }
 0x1a6   : > { %3498 = vst [vmem:[#allocation103_spill] sm:$0xff] %v2499_v21  ;;  %3500 = vst [vmem:[#allocation104_spill] sm:$0xff] %v2507_v36  ;;  %v2509_v37 = vld [vmem:[#allocation5 + $0x5] sm:$0xff]  ;;  %v2511_v1 = vld [vmem:[#allocation5 + $0xd] sm:$0xff]  ;;  %v3508_v36 = vmov %v3507_v57  ;;  %v3515_v57 = vmov %v3512_v3  ;;  %s2630_s22 = sld [smem:[#allocation11 + $0x4c]] }
 0x1a7   : > { %3502 = vst [vmem:[#allocation105_spill] sm:$0xff] %v2509_v37  ;;  %3503 = vst [vmem:[#allocation106_spill] sm:$0xff] %v2511_v1  ;;  %v415_v37 = vmul.f32 %v3508_v36, %v2141_v11  ;;  %v3509_v1 = vstv %s3499_s3  ;;  %v2531_v55 = vld [vmem:[#allocation5 + $0x6] sm:$0xff]  ;;  %v2533_v18 = vld [vmem:[#allocation5 + $0xe] sm:$0xff]  ;;  %v430_v11 = vmul.f32 %v3512_v3, %v2129_v5  ;;  %s3513_s3 = sld [smem:[#allocation30_spill]]  ;;  %v431_v36 = vmul.f32 %v3515_v57, %v2145_v13 }
 0x1a8   : > { %v422_v49 = vmul.f32 %v3509_v1, %v2127_v4  ;;  %v3510_v21 = vmov %v3509_v1  ;;  %831 = vst.msk [vmem:[#allocation5] sm:$0xff] %vm249_vm3, %v2011_v39  ;;  %832 = vst.msk [vmem:[#allocation5 + $0x8] sm:$0xff] %vm249_vm3, %v2015_v41  ;;  %3514 = sst [smem:[#allocation93_spill]] %s2548_s9  ;;  %v3523_v1 = vstv %s3516_s30 }
 0x1a9   : > { %v423_v53 = vmul.f32 %v3510_v21, %v2143_v12  ;;  %833 = vst.msk [vmem:[#allocation5 + $0x10] sm:$0x3f] %vm326_vm5, %v830_v35  ;;  %v416_v12 = vadd.f32 %v414_v59, %v2373_v44  ;;  %v417_v13 = vadd.f32 %v415_v37, %v2375_v60  ;;  %v432_v21 = vadd.f32 %v430_v11, %v2368_v61  ;;  %v897_v44 = vpop.permute.xlu0 %896  ;;  %s2600_s30 = sld [smem:[#allocation11 + $0x37]] }
 0x1aa   : > { %v424_v57 = vadd.f32 %v422_v49, %v2350_v17  ;;  %v454_v4 = vmul.f32 %v3523_v1, %v2137_v8  ;;  %v433_v59 = vadd.f32 %v431_v36, %v2391_v47  ;;  %v3524_v37 = vmov %v3523_v1  ;;  %s3538_s9 = sld [smem:[#allocation38_spill]] }
 0x1ab   : > { %v425_v3 = vadd.f32 %v423_v53, %v2358_v52  ;;  %v455_v60 = vmul.f32 %v3524_v37, %v2154_v16  ;;  %v3525_v17 = vstv %s3518_s4  ;;  %v3526_v61 = vstv %s3519_s2  ;;  %s2608_s4 = sld [smem:[#allocation11 + $0x3e]] }
 0x1ac   : > { %v480_v52 = vmul.f32 %v3525_v17, %v2184_v22  ;;  %v489_v53 = vmul.f32 %v3526_v61, %v2178_v19  ;;  %v3528_v49 = vmov %v3526_v61  ;;  %v3529_v47 = vstv %s3520_s16  ;;  %s2620_s2 = sld [smem:[#allocation11 + $0x45]] }
 0x1ad   : > { %v3521_v39 = vstv %s3513_s3  ;;  %v488_v8 = vmul.f32 %v3528_v49, %v2198_v29  ;;  %v496_v11 = vmul.f32 %v3529_v47, %v2200_v30  ;;  %v3530_v16 = vmov %v3529_v47  ;;  %s3531_s3 = sld [smem:[#allocation35_spill]] }
 0x1ae   : > { %v446_v5 = vmul.f32 %v3521_v39, %v2135_v7  ;;  %v3522_v35 = vmov %v3521_v39  ;;  %v3527_v7 = vmov %v3525_v17  ;;  %v497_v22 = vmul.f32 %v3530_v16, %v2180_v20  ;;  %s3532_s16 = sld [smem:[#allocation36_spill]] }
 0x1af   : > { %v447_v41 = vmul.f32 %v3522_v35, %v2152_v15  ;;  %v481_v15 = vmul.f32 %v3527_v7, %v2196_v28  ;;  %v456_v36 = vadd.f32 %v454_v4, %v424_v57  ;;  %v457_v39 = vadd.f32 %v455_v60, %v425_v3  ;;  %v2602_v28 = vld [vmem:[#allocation5] sm:$0xff]  ;;  %v2604_v35 = vld [vmem:[#allocation5 + $0x8] sm:$0xff]  ;;  %v899_v3 = vpop.permute.xlu1 %898  ;;  %v901_v4 = vpop.permute.xlu0 %900 }
 0x1b0   : > { %v448_v19 = vadd.f32 %v446_v5, %v416_v12  ;;  %v2606_v29 = vld [vmem:[#allocation5 + $0x1] sm:$0xff]  ;;  %v2610_v30 = vld [vmem:[#allocation5 + $0x9] sm:$0xff] }
 0x1b1   : > { %v449_v1 = vadd.f32 %v447_v41, %v417_v13  ;;  %v2612_v20 = vld [vmem:[#allocation5 + $0x2] sm:$0xff]  ;;  %v2614_v37 = vld [vmem:[#allocation5 + $0xa] sm:$0xff]  ;;  %v491_v13 = vadd.f32 %v489_v53, %v457_v39  ;;  %v490_v47 = vadd.f32 %v488_v8, %v456_v36  ;;  %v499_v53 = vadd.f32 %v497_v22, %v433_v59 }
 0x1b2   : > { %v482_v41 = vadd.f32 %v480_v52, %v448_v19  ;;  %v2622_v57 = vld [vmem:[#allocation5 + $0x3] sm:$0xff]  ;;  %v2624_v60 = vld [vmem:[#allocation5 + $0xb] sm:$0xff]  ;;  %v498_v52 = vadd.f32 %v496_v11, %v432_v21  ;;  %v3540_v11 = vstv %s3533_s28  ;;  %s3548_s28 = sld [smem:[#allocation44_spill]] }
 0x1b3   : > { %v2626_v17 = vld [vmem:[#allocation5 + $0x4] sm:$0xff]  ;;  %v483_v49 = vadd.f32 %v481_v15, %v449_v1  ;;  %v2632_v16 = vld [vmem:[#allocation5 + $0xc] sm:$0xff]  ;;  %v3536_v61 = vstv %s3531_s3  ;;  %v529_v22 = vmul.f32 %v3540_v11, %v2192_v25  ;;  %s3553_s3 = sld [smem:[#allocation43_spill]] }
 0x1b4   : > { %3535 = vst [vmem:[#allocation107_spill] sm:$0xff] %v2632_v16  ;;  %v2634_v19 = vld [vmem:[#allocation5 + $0x5] sm:$0xff]  ;;  %v2636_v39 = vld [vmem:[#allocation5 + $0xd] sm:$0xff]  ;;  %v512_v7 = vmul.f32 %v3536_v61, %v2205_v32  ;;  %v3537_v15 = vmov %v3536_v61  ;;  %v3539_v21 = vstv %s3532_s16  ;;  %v3544_v61 = vmov %v3540_v11  ;;  %s3556_s16 = sld [smem:[#allocation41_spill]] }
 0x1b5   : > { %v513_v8 = vmul.f32 %v3537_v15, %v2188_v23  ;;  %v521_v59 = vmul.f32 %v3539_v21, %v2190_v24  ;;  %v2650_v1 = vld [vmem:[#allocation5 + $0x6] sm:$0xff]  ;;  %v2652_v36 = vld [vmem:[#allocation5 + $0xe] sm:$0xff]  ;;  %v3542_v12 = vmov %v3539_v21  ;;  %v528_v23 = vmul.f32 %v3544_v61, %v2211_v34 }
 0x1b6   : > { %3541 = vst [vmem:[#allocation108_spill] sm:$0xff] %v2652_v36  ;;  %v520_v32 = vmul.f32 %v3542_v12, %v2207_v33  ;;  %v3545_v15 = vstv %s3534_s1  ;;  %905 = vst.msk [vmem:[#allocation5] sm:$0xff] %vm249_vm3, %v897_v44  ;;  %v514_v33 = vadd.f32 %v512_v7, %v482_v41  ;;  %v3547_v34 = vstv %s3538_s9  ;;  %s3549_s1 = sld [smem:[#allocation42_spill]]  ;;  %v3554_v7 = vld [vmem:[#allocation64_spill] sm:$0xff] }
 0x1b7   : > { %v562_v24 = vmul.f32 %v3545_v15, %v2255_v56  ;;  %v3546_v25 = vmov %v3545_v15  ;;  %906 = vst.msk [vmem:[#allocation5 + $0x8] sm:$0xff] %vm249_vm3, %v899_v3  ;;  %v523_v12 = vadd.f32 %v521_v59, %v491_v13  ;;  %v554_v11 = vmul.f32 %v3547_v34, %v2251_v0  ;;  %s2708_s9 = sld [smem:[#allocation11 + $0x61]] }
 0x1b8   : > { %v563_v21 = vmul.f32 %v3546_v25, %v2233_v38  ;;  %907 = vst.msk [vmem:[#allocation5 + $0x10] sm:$0x3f] %vm326_vm5, %v901_v4  ;;  %v515_v56 = vadd.f32 %v513_v8, %v483_v49  ;;  %v522_v15 = vadd.f32 %v520_v32, %v490_v47  ;;  %v530_v38 = vadd.f32 %v528_v23, %v498_v52  ;;  %v3551_v4 = vld [vmem:[#allocation59_spill] sm:$0xff]  ;;  %v971_v8 = vpop.permute.xlu1 %970  ;;  %v3559_v23 = vld [vmem:[#allocation80_spill] sm:$0xff] }
 0x1b9   : > { %v531_v25 = vadd.f32 %v529_v22, %v499_v53  ;;  %v3550_v44 = vstv %s3543_s7  ;;  %v3555_v59 = vmov %v3547_v34  ;;  %v3557_v22 = vld [vmem:[#allocation79_spill] sm:$0xff]  ;;  %v3558_v32 = vstv %s3548_s28  ;;  %s2694_s7 = sld [smem:[#allocation11 + $0x5a]] }
 0x1ba   : > { %v578_v3 = vmul.f32 %v3550_v44, %v2262_v26  ;;  %v3552_v5 = vmov %v3550_v44  ;;  %v555_v34 = vmul.f32 %v3555_v59, %v3554_v7  ;;  %v564_v49 = vadd.f32 %v562_v24, %v530_v38  ;;  %v3563_v24 = vld [vmem:[#allocation62_spill] sm:$0xff]  ;;  %s3571_s28 = sld [smem:[#allocation45_spill]] }
 0x1bb   : > { %v579_v41 = vmul.f32 %v3552_v5, %v3551_v4  ;;  %v565_v47 = vadd.f32 %v563_v21, %v531_v25  ;;  %v556_v53 = vadd.f32 %v554_v11, %v522_v15  ;;  %v644_v26 = vmul.f32 %v3558_v32, %v3557_v22  ;;  %v3561_v4 = vld [vmem:[#allocation68_spill] sm:$0xff]  ;;  %v3565_v25 = vld [vmem:[#allocation76_spill] sm:$0xff]  ;;  %v3567_v15 = vld [vmem:[#allocation77_spill] sm:$0xff] }
 0x1bc   : > { %v3560_v44 = vmov %v3558_v32  ;;  %v3562_v0 = vstv %s3549_s1  ;;  %v3566_v59 = vstv %s3553_s3  ;;  %v580_v22 = vadd.f32 %v578_v3, %v514_v33  ;;  %s3580_s1 = sld [smem:[#allocation49_spill]] }
 0x1bd   : > { %v645_v61 = vmul.f32 %v3560_v44, %v3559_v23  ;;  %v594_v7 = vmul.f32 %v3562_v0, %v3561_v4  ;;  %v3564_v38 = vmov %v3562_v0  ;;  %v628_v11 = vmul.f32 %v3566_v59, %v3565_v25  ;;  %v3569_v23 = vld [vmem:[#allocation66_spill] sm:$0xff]  ;;  %v2713_v16 = vld [vmem:[#allocation5] sm:$0xff]  ;;  %s3584_s3 = sld [smem:[#allocation46_spill]] }
 0x1be   : > { %v595_v21 = vmul.f32 %v3564_v38, %v3563_v24  ;;  %v3568_v52 = vmov %v3566_v59  ;;  %v581_v32 = vadd.f32 %v579_v41, %v515_v56  ;;  %v3570_v44 = vstv %s3556_s16  ;;  %v2715_v0 = vld [vmem:[#allocation5 + $0x8] sm:$0xff]  ;;  %v3573_v25 = vld [vmem:[#allocation61_spill] sm:$0xff]  ;;  %s3604_s16 = sld [smem:[#allocation55_spill]] }
 0x1bf   : > { %v629_v13 = vmul.f32 %v3568_v52, %v3567_v15  ;;  %v586_v5 = vmul.f32 %v3570_v44, %v3569_v23  ;;  %v2717_v4 = vld [vmem:[#allocation5 + $0x1] sm:$0xff]  ;;  %v557_v38 = vadd.f32 %v555_v34, %v523_v12  ;;  %v3574_v59 = vmov %v3570_v44  ;;  %v2723_v56 = vld [vmem:[#allocation5 + $0x9] sm:$0xff] }
 0x1c0   : > { %3572 = vst [vmem:[#allocation59_spill] sm:$0xff] %v2717_v4  ;;  %v587_v52 = vmul.f32 %v3574_v59, %v3573_v25  ;;  %v596_v15 = vadd.f32 %v594_v7, %v564_v49  ;;  %v597_v33 = vadd.f32 %v595_v21, %v565_v47  ;;  %3575 = vst [vmem:[#allocation64_spill] sm:$0xff] %v2723_v56  ;;  %v2725_v3 = vld [vmem:[#allocation5 + $0x2] sm:$0xff]  ;;  %v2727_v41 = vld [vmem:[#allocation5 + $0xa] sm:$0xff]  ;;  %v3579_v12 = vstv %s3571_s28  ;;  %s3626_s28 = sld [smem:[#allocation65_spill]] }
 0x1c1   : > { %3576 = vst [vmem:[#allocation79_spill] sm:$0xff] %v2725_v3  ;;  %3577 = vst [vmem:[#allocation80_spill] sm:$0xff] %v2727_v41  ;;  %v588_v23 = vadd.f32 %v586_v5, %v556_v53  ;;  %v646_v44 = vadd.f32 %v644_v26, %v580_v22  ;;  %v647_v4 = vadd.f32 %v645_v61, %v581_v32  ;;  %v3578_v24 = vld [vmem:[#allocation82_spill] sm:$0xff]  ;;  %v3585_v59 = vld [vmem:[#allocation83_spill] sm:$0xff]  ;;  %v3586_v53 = vmov %v3579_v12 }
 0x1c2   : > { %v652_v34 = vmul.f32 %v3579_v12, %v3578_v24  ;;  %v2732_v25 = vld [vmem:[#allocation5 + $0x3] sm:$0xff]  ;;  %v2734_v49 = vld [vmem:[#allocation5 + $0xb] sm:$0xff]  ;;  %v630_v7 = vadd.f32 %v628_v11, %v596_v15  ;;  %v631_v21 = vadd.f32 %v629_v13, %v597_v33  ;;  %v653_v26 = vmul.f32 %v3586_v53, %v3585_v59  ;;  %v3597_v41 = vld [vmem:[#allocation84_spill] sm:$0xff] }
 0x1c3   : > { %3581 = vst [vmem:[#allocation68_spill] sm:$0xff] %v2732_v25  ;;  %3582 = vst [vmem:[#allocation62_spill] sm:$0xff] %v2734_v49  ;;  %v2736_v47 = vld [vmem:[#allocation5 + $0x4] sm:$0xff]  ;;  %v3588_v61 = vstv %s3466_s24  ;;  %v2744_v32 = vld [vmem:[#allocation5 + $0xc] sm:$0xff]  ;;  %v973_v49 = vpop.permute.xlu0 %972  ;;  %v975_v25 = vpop.permute.xlu1 %974  ;;  %v3594_v13 = vstv %s3467_s13  ;;  %v3598_v3 = vstv %s3584_s3  ;;  %s3602_s24 = sld [smem:[#allocation52_spill]] }
 0x1c4   : > { %3583 = vst [vmem:[#allocation76_spill] sm:$0xff] %v2736_v47  ;;  %v3587_v5 = vld [vmem:[#allocation87_spill] sm:$0xff]  ;;  %3589 = vst [vmem:[#allocation77_spill] sm:$0xff] %v2744_v32  ;;  %v3592_v47 = vld [vmem:[#allocation88_spill] sm:$0xff]  ;;  %v3593_v11 = vmov %v3588_v61  ;;  %v710_v33 = vmul.f32 %v3594_v13, %v2379_v9  ;;  %v3595_v59 = vmov %v3594_v13  ;;  %v660_v56 = vmul.f32 %v3598_v3, %v3597_v41  ;;  %s3603_s13 = sld [smem:[#allocation53_spill]] }
 0x1c5   : > { %v676_v22 = vmul.f32 %v3588_v61, %v3587_v5  ;;  %v2746_v24 = vld [vmem:[#allocation5 + $0x5] sm:$0xff]  ;;  %v2748_v12 = vld [vmem:[#allocation5 + $0xd] sm:$0xff]  ;;  %v677_v15 = vmul.f32 %v3593_v11, %v3592_v47  ;;  %v711_v53 = vmul.f32 %v3595_v59, %v2383_v10  ;;  %v3596_v5 = vstv %s3580_s1  ;;  %s3629_s1 = sld [smem:[#allocation67_spill]] }
 0x1c6   : > { %3590 = vst [vmem:[#allocation66_spill] sm:$0xff] %v2746_v24  ;;  %3591 = vst [vmem:[#allocation61_spill] sm:$0xff] %v2748_v12  ;;  %v718_v61 = vmul.f32 %v3596_v5, %v2385_v31  ;;  %v2762_v32 = vld [vmem:[#allocation5 + $0x6] sm:$0xff]  ;;  %v2764_v24 = vld [vmem:[#allocation5 + $0xe] sm:$0xff]  ;;  %v589_v12 = vadd.f32 %v587_v52, %v557_v38  ;;  %v3600_v11 = vmov %v3598_v3  ;;  %v3601_v9 = vmov %v3596_v5  ;;  %s3647_s3 = sld [smem:[#allocation70_spill]] }
 0x1c7   : > { %v3599_v47 = vld [vmem:[#allocation85_spill] sm:$0xff]  ;;  %v719_v13 = vmul.f32 %v3601_v9, %v2387_v45  ;;  %979 = vst.msk [vmem:[#allocation5] sm:$0xff] %vm249_vm3, %v971_v8  ;;  %980 = vst.msk [vmem:[#allocation5 + $0x8] sm:$0xff] %vm249_vm3, %v973_v49  ;;  %v654_v10 = vadd.f32 %v652_v34, %v588_v23  ;;  %v678_v31 = vadd.f32 %v676_v22, %v646_v44  ;;  %v1321_v52 = vstv %s2694_s7  ;;  %v1045_v22 = vpop.permute.xlu0 %1044 }
 0x1c8   : > { %v661_v36 = vmul.f32 %v3600_v11, %v3599_v47  ;;  %981 = vst.msk [vmem:[#allocation5 + $0x10] sm:$0x3f] %vm326_vm5, %v975_v25  ;;  %v679_v38 = vadd.f32 %v677_v15, %v647_v4  ;;  %v655_v3 = vadd.f32 %v653_v26, %v589_v12  ;;  %v662_v41 = vadd.f32 %v660_v56, %v630_v7 }
 0x1c9   : > { %v1329_v8 = vstv %s2708_s9  ;;  %v712_v49 = vadd.f32 %v710_v33, %v678_v31  ;;  %v720_v25 = vadd.f32 %v718_v61, %v654_v10  ;;  %v3605_v23 = vstv %s3469_s10  ;;  %s3625_s10 = sld [smem:[#allocation58_spill]] }
 0x1ca   : > { %v663_v45 = vadd.f32 %v661_v36, %v631_v21  ;;  %v713_v59 = vadd.f32 %v711_v53, %v679_v38  ;;  %v726_v44 = vmul.f32 %v3605_v23, %v2396_v62  ;;  %v721_v4 = vadd.f32 %v719_v13, %v655_v3  ;;  %s3775_s9 = sld [smem:[#allocation111_spill]] }
 0x1cb   : > { %v3606_v34 = vmov %v3605_v23  ;;  %v3607_v56 = vstv %s3470_s29  ;;  %v3609_v12 = vstv %s3602_s24  ;;  %v3611_v62 = vstv %s3473_s23  ;;  %s3619_s23 = sld [smem:[#allocation56_spill]] }
 0x1cc   : > { %v727_v26 = vmul.f32 %v3606_v34, %v2398_v50  ;;  %v734_v7 = vmul.f32 %v3607_v56, %v2400_v63  ;;  %v3608_v36 = vmov %v3607_v56  ;;  %v742_v15 = vmul.f32 %v3609_v12, %v2412_v58  ;;  %s3622_s29 = sld [smem:[#allocation63_spill]] }
 0x1cd   : > { %v735_v21 = vmul.f32 %v3608_v36, %v2410_v43  ;;  %v3610_v33 = vmov %v3609_v12  ;;  %v776_v5 = vmul.f32 %v3611_v62, %v2473_v46  ;;  %v3612_v61 = vmov %v3611_v62  ;;  %v3620_v36 = vld [vmem:[#allocation100_spill] sm:$0xff]  ;;  %s3648_s24 = sld [smem:[#allocation71_spill]] }
 0x1ce   : > { %v743_v53 = vmul.f32 %v3610_v33, %v2414_v27  ;;  %v777_v47 = vmul.f32 %v3612_v61, %v2475_v48  ;;  %v3613_v50 = vstv %s3603_s13  ;;  %v3614_v63 = vstv %s3604_s16  ;;  %v2822_v23 = vld [vmem:[#allocation5] sm:$0xff]  ;;  %v1047_v61 = vpop.permute.xlu1 %1046  ;;  %s3649_s13 = sld [smem:[#allocation72_spill]] }
 0x1cf   : > { %v750_v11 = vmul.f32 %v3613_v50, %v2422_v42  ;;  %v784_v9 = vmul.f32 %v3614_v63, %v2477_v6  ;;  %v3615_v43 = vstv %s2223_s18  ;;  %v744_v31 = vadd.f32 %v742_v15, %v712_v49  ;;  %v2824_v42 = vld [vmem:[#allocation5 + $0x8] sm:$0xff]  ;;  %s3621_s18 = sld [smem:[#allocation57_spill]] }
 0x1d0   : > { %v792_v13 = vmul.f32 %v3615_v43, %v2485_v54  ;;  %v3616_v58 = vmov %v3615_v43  ;;  %v745_v27 = vadd.f32 %v743_v53, %v713_v59  ;;  %v3617_v38 = vmov %v3613_v50  ;;  %v2826_v34 = vld [vmem:[#allocation5 + $0x1] sm:$0xff]  ;;  %v2829_v49 = vld [vmem:[#allocation5 + $0x9] sm:$0xff]  ;;  %s3650_s16 = sld [smem:[#allocation73_spill]] }
 0x1d1   : > { %v793_v10 = vmul.f32 %v3616_v58, %v2487_v2  ;;  %v751_v46 = vmul.f32 %v3617_v38, %v2424_v40  ;;  %v3618_v3 = vmov %v3614_v63  ;;  %v728_v6 = vadd.f32 %v726_v44, %v662_v41  ;;  %v2831_v59 = vld [vmem:[#allocation5 + $0x2] sm:$0xff]  ;;  %v2833_v40 = vld [vmem:[#allocation5 + $0xa] sm:$0xff] }
 0x1d2   : > { %v785_v48 = vmul.f32 %v3618_v3, %v2483_v14  ;;  %v729_v56 = vadd.f32 %v727_v26, %v663_v45  ;;  %v736_v54 = vadd.f32 %v734_v7, %v2406_v51  ;;  %v752_v2 = vadd.f32 %v750_v11, %v720_v25  ;;  %v2836_v41 = vld [vmem:[#allocation5 + $0x3] sm:$0xff]  ;;  %v2838_v45 = vld [vmem:[#allocation5 + $0xb] sm:$0xff] }
 0x1d3   : > { %v737_v14 = vadd.f32 %v735_v21, %v3620_v36  ;;  %v753_v12 = vadd.f32 %v751_v46, %v721_v4  ;;  %v778_v15 = vadd.f32 %v776_v5, %v744_v31  ;;  %v779_v33 = vadd.f32 %v777_v47, %v745_v27  ;;  %v2840_v51 = vld [vmem:[#allocation5 + $0x4] sm:$0xff]  ;;  %v2845_v53 = vld [vmem:[#allocation5 + $0xc] sm:$0xff]  ;;  %v1049_v47 = vpop.permute.xlu0 %1048 }
 0x1d4   : > { %v786_v25 = vadd.f32 %v784_v9, %v752_v2  ;;  %v794_v44 = vadd.f32 %v792_v13, %v728_v6  ;;  %v795_v26 = vadd.f32 %v793_v10, %v729_v56  ;;  %v3623_v7 = vld [vmem:[#allocation101_spill] sm:$0xff]  ;;  %v3624_v21 = vstv %s3619_s23  ;;  %v2849_v5 = vld [vmem:[#allocation5 + $0xd] sm:$0xff]  ;;  %v3632_v10 = vld [vmem:[#allocation104_spill] sm:$0xff]  ;;  %s3651_s23 = sld [smem:[#allocation74_spill]] }
 0x1d5   : > { %v800_v4 = vmul.f32 %v3624_v21, %v3623_v7  ;;  %v2847_v62 = vld [vmem:[#allocation5 + $0x5] sm:$0xff]  ;;  %v787_v50 = vadd.f32 %v785_v48, %v753_v12  ;;  %v3628_v63 = vmov %v3624_v21  ;;  %v3630_v43 = vld [vmem:[#allocation103_spill] sm:$0xff]  ;;  %v3631_v13 = vstv %s3621_s18  ;;  %s3653_s18 = sld [smem:[#allocation75_spill]] }
 0x1d6   : > { %v3627_v11 = vld [vmem:[#allocation102_spill] sm:$0xff]  ;;  %v808_v58 = vmul.f32 %v3631_v13, %v3630_v43  ;;  %v3633_v31 = vmov %v3631_v13  ;;  %v3634_v3 = vstv %s3474_s27  ;;  %v3636_v2 = vstv %s3622_s29  ;;  %v3638_v21 = vld [vmem:[#allocation105_spill] sm:$0xff]  ;;  %s3645_s27 = sld [smem:[#allocation69_spill]] }
 0x1d7   : > { %v801_v9 = vmul.f32 %v3628_v63, %v3627_v11  ;;  %v809_v27 = vmul.f32 %v3633_v31, %v3632_v10  ;;  %v2860_v38 = vld [vmem:[#allocation5 + $0x6] sm:$0xff]  ;;  %v2862_v46 = vld [vmem:[#allocation5 + $0xe] sm:$0xff]  ;;  %v824_v6 = vmul.f32 %v3634_v3, %v2531_v55  ;;  %v3635_v48 = vmov %v3634_v3  ;;  %s3673_s29 = sld [smem:[#allocation78_spill]] }
 0x1d8   : > { %v825_v56 = vmul.f32 %v3635_v48, %v2533_v18  ;;  %v838_v36 = vmul.f32 %v3636_v2, %v2602_v28  ;;  %v3637_v12 = vmov %v3636_v2  ;;  %1053 = vst.msk [vmem:[#allocation5] sm:$0xff] %vm249_vm3, %v1045_v22  ;;  %1054 = vst.msk [vmem:[#allocation5 + $0x8] sm:$0xff] %vm249_vm3, %v1047_v61  ;;  %v3639_v11 = vstv %s3625_s10  ;;  %v3643_v31 = vld [vmem:[#allocation106_spill] sm:$0xff]  ;;  %s3674_s10 = sld [smem:[#allocation81_spill]] }
 0x1d9   : > { %v839_v7 = vmul.f32 %v3637_v12, %v2604_v35  ;;  %1055 = vst.msk [vmem:[#allocation5 + $0x10] sm:$0x3f] %vm326_vm5, %v1049_v47  ;;  %v816_v63 = vmul.f32 %v3639_v11, %v3638_v21  ;;  %v3640_v55 = vstv %s3626_s28  ;;  %v3642_v28 = vstv %s3629_s1  ;;  %s3675_s28 = sld [smem:[#allocation86_spill]] }
 0x1da   : > { %v846_v43 = vmul.f32 %v3640_v55, %v2606_v29  ;;  %v3641_v18 = vmov %v3640_v55  ;;  %v854_v10 = vmul.f32 %v3642_v28, %v2612_v20  ;;  %v3644_v35 = vmov %v3639_v11  ;;  %s3676_s1 = sld [smem:[#allocation89_spill]] }
 0x1db   : > { %v847_v13 = vmul.f32 %v3641_v18, %v2610_v30  ;;  %v817_v3 = vmul.f32 %v3644_v35, %v3643_v31  ;;  %v826_v22 = vadd.f32 %v824_v6, %v794_v44  ;;  %v827_v61 = vadd.f32 %v825_v56, %v795_v26  ;;  %v1119_v44 = vpop.permute.xlu1 %1118 }
 0x1dc   : > { %v3646_v47 = vmov %v3642_v28  ;;  %v802_v2 = vadd.f32 %v800_v4, %v736_v54  ;;  %v803_v29 = vadd.f32 %v801_v9, %v737_v14  ;;  %v810_v12 = vadd.f32 %v808_v58, %v778_v15 }
 0x1dd   : > { %v855_v48 = vmul.f32 %v3646_v47, %v2614_v37  ;;  %v811_v30 = vadd.f32 %v809_v27, %v779_v33  ;;  %v818_v20 = vadd.f32 %v816_v63, %v786_v25  ;;  %v819_v21 = vadd.f32 %v817_v3, %v787_v50 }
 0x1de   : > { %v840_v11 = vadd.f32 %v838_v36, %v826_v22  ;;  %v841_v55 = vadd.f32 %v839_v7, %v827_v61  ;;  %v848_v26 = vadd.f32 %v846_v43, %v802_v2  ;;  %v849_v6 = vadd.f32 %v847_v13, %v803_v29  ;;  %v3667_v61 = vld [vmem:[#allocation79_spill] sm:$0xff]  ;;  %v3669_v29 = vld [vmem:[#allocation107_spill] sm:$0xff] }
 0x1df   : > { %v856_v37 = vadd.f32 %v854_v10, %v810_v12  ;;  %v3652_v54 = vstv %s3645_s27  ;;  %v857_v15 = vadd.f32 %v855_v48, %v811_v30  ;;  %v3655_v25 = vstv %s3647_s3  ;;  %v2921_v18 = vld [vmem:[#allocation5] sm:$0xff]  ;;  %s3679_s27 = sld [smem:[#allocation90_spill]] }
 0x1e0   : > { %v862_v14 = vmul.f32 %v3652_v54, %v2622_v57  ;;  %v3654_v33 = vmov %v3652_v54  ;;  %v870_v50 = vmul.f32 %v3655_v25, %v2626_v17  ;;  %v3656_v9 = vstv %s3648_s24  ;;  %v2923_v17 = vld [vmem:[#allocation5 + $0x8] sm:$0xff]  ;;  %s3700_s3 = sld [smem:[#allocation94_spill]] }
 0x1e1   : > { %v863_v4 = vmul.f32 %v3654_v33, %v2624_v60  ;;  %v878_v58 = vmul.f32 %v3656_v9, %v2634_v19  ;;  %v3657_v27 = vmov %v3656_v9  ;;  %v3658_v36 = vstv %s3649_s13  ;;  %v2925_v13 = vld [vmem:[#allocation5 + $0x1] sm:$0xff]  ;;  %v3661_v19 = vld [vmem:[#allocation108_spill] sm:$0xff]  ;;  %v2939_v48 = vld [vmem:[#allocation5 + $0x9] sm:$0xff]  ;;  %s3701_s24 = sld [smem:[#allocation95_spill]] }
 0x1e2   : > { %v879_v56 = vmul.f32 %v3657_v27, %v2636_v39  ;;  %v886_v7 = vmul.f32 %v3658_v36, %v2650_v1  ;;  %v3659_v63 = vstv %s3650_s16  ;;  %v3662_v28 = vmov %v3658_v36  ;;  %v3663_v39 = vld [vmem:[#allocation59_spill] sm:$0xff]  ;;  %v3665_v1 = vld [vmem:[#allocation64_spill] sm:$0xff]  ;;  %v2951_v36 = vld [vmem:[#allocation5 + $0x3] sm:$0xff]  ;;  %s3703_s13 = sld [smem:[#allocation96_spill]] }
 0x1e3   : > { %v912_v57 = vmul.f32 %v3659_v63, %v2713_v16  ;;  %v3660_v43 = vmov %v3659_v63  ;;  %v887_v10 = vmul.f32 %v3662_v28, %v3661_v19  ;;  %v3664_v31 = vstv %s3651_s23  ;;  %v2943_v2 = vld [vmem:[#allocation5 + $0xa] sm:$0xff]  ;;  %s3706_s16 = sld [smem:[#allocation97_spill]] }
 0x1e4   : > { %v913_v60 = vmul.f32 %v3660_v43, %v2715_v0  ;;  %v920_v35 = vmul.f32 %v3664_v31, %v3663_v39  ;;  %v3666_v3 = vmov %v3664_v31  ;;  %v3668_v16 = vstv %s3653_s18  ;;  %v2941_v0 = vld [vmem:[#allocation5 + $0x2] sm:$0xff]  ;;  %v2953_v63 = vld [vmem:[#allocation5 + $0xb] sm:$0xff] }
 0x1e5   : > { %v921_v22 = vmul.f32 %v3666_v3, %v3665_v1  ;;  %v928_v47 = vmul.f32 %v3668_v16, %v3667_v61  ;;  %v3670_v12 = vmov %v3655_v25  ;;  %v880_v54 = vadd.f32 %v878_v58, %v848_v26  ;;  %v3671_v25 = vld [vmem:[#allocation80_spill] sm:$0xff]  ;;  %v2957_v1 = vld [vmem:[#allocation5 + $0xc] sm:$0xff]  ;;  %v1123_v58 = vpop.permute.xlu1 %1122 }
 0x1e6   : > { %v871_v30 = vmul.f32 %v3670_v12, %v3669_v29  ;;  %v881_v33 = vadd.f32 %v879_v56, %v849_v6  ;;  %v3672_v9 = vmov %v3668_v16  ;;  %v2955_v43 = vld [vmem:[#allocation5 + $0x4] sm:$0xff]  ;;  %v864_v19 = vadd.f32 %v862_v14, %v818_v20  ;;  %v2961_v26 = vld [vmem:[#allocation5 + $0xd] sm:$0xff]  ;;  %v1121_v6 = vpop.permute.xlu0 %1120 }
 0x1e7   : > { %v929_v27 = vmul.f32 %v3672_v9, %v3671_v25  ;;  %v865_v28 = vadd.f32 %v863_v4, %v819_v21  ;;  %v888_v39 = vadd.f32 %v886_v7, %v856_v37  ;;  %v889_v31 = vadd.f32 %v887_v10, %v857_v15  ;;  %v2959_v3 = vld [vmem:[#allocation5 + $0x5] sm:$0xff]  ;;  %v2965_v37 = vld [vmem:[#allocation5 + $0xe] sm:$0xff] }
 0x1e8   : > { %v872_v56 = vadd.f32 %v870_v50, %v840_v11  ;;  %v873_v61 = vadd.f32 %v871_v30, %v841_v55  ;;  %v914_v16 = vadd.f32 %v912_v57, %v880_v54  ;;  %v915_v20 = vadd.f32 %v913_v60, %v881_v33  ;;  %v2963_v21 = vld [vmem:[#allocation5 + $0x6] sm:$0xff]  ;;  %1129 = vst.msk [vmem:[#allocation5 + $0x10] sm:$0x3f] %vm326_vm5, %v1123_v58 }
 0x1e9   : > { %v922_v14 = vadd.f32 %v920_v35, %v888_v39  ;;  %v923_v15 = vadd.f32 %v921_v22, %v889_v31  ;;  %v930_v4 = vadd.f32 %v928_v47, %v864_v19  ;;  %v3677_v7 = vld [vmem:[#allocation68_spill] sm:$0xff]  ;;  %v3678_v11 = vstv %s2294_s19  ;;  %1127 = vst.msk [vmem:[#allocation5] sm:$0xff] %vm249_vm3, %v1119_v44  ;;  %1128 = vst.msk [vmem:[#allocation5 + $0x8] sm:$0xff] %vm249_vm3, %v1121_v6  ;;  %v3680_v57 = vld [vmem:[#allocation62_spill] sm:$0xff]  ;;  %s3697_s19 = sld [smem:[#allocation91_spill]] }
 0x1ea   : > { %v936_v55 = vmul.f32 %v3678_v11, %v3677_v7  ;;  %v931_v50 = vadd.f32 %v929_v27, %v865_v28  ;;  %v3681_v60 = vmov %v3678_v11  ;;  %v3682_v35 = vld [vmem:[#allocation76_spill] sm:$0xff]  ;;  %v3683_v22 = vstv %s3673_s29  ;;  %v3684_v47 = vld [vmem:[#allocation66_spill] sm:$0xff]  ;;  %v3686_v54 = vld [vmem:[#allocation61_spill] sm:$0xff] }
 0x1eb   : > { %v937_v10 = vmul.f32 %v3681_v60, %v3680_v57  ;;  %v944_v29 = vmul.f32 %v3683_v22, %v3682_v35  ;;  %v3685_v12 = vstv %s3674_s10  ;;  %v3688_v44 = vstv %s2317_s17  ;;  %v3695_v22 = vld [vmem:[#allocation77_spill] sm:$0xff]  ;;  %s3699_s17 = sld [smem:[#allocation92_spill]]  ;;  %s1830_s10 = smov [#allocation12]  }
 0x1ec   : > { %v952_v30 = vmul.f32 %v3685_v12, %v3684_v47  ;;  %v3687_v33 = vmov %v3685_v12  ;;  %v960_v9 = vmul.f32 %v3688_v44, %v2762_v32  ;;  %v3689_v19 = vstv %s3675_s28  ;;  %s1736_s28 = sshll.u32 %s1830_s10, 4  ;;  %s1737_s28 = int_to_ptr.vmem [resolvable:$false] %s1736_s28 }
 0x1ed   : > { %v953_v25 = vmul.f32 %v3687_v33, %v3686_v54  ;;  %v986_v39 = vmul.f32 %v3689_v19, %v2822_v23  ;;  %v3690_v27 = vmov %v3689_v19  ;;  %v3691_v31 = vmov %v3688_v44  ;;  %v1193_v33 = vpop.permute.xlu0 %1192 }
 0x1ee   : > { %v987_v28 = vmul.f32 %v3690_v27, %v2824_v42  ;;  %v961_v6 = vmul.f32 %v3691_v31, %v2764_v24  ;;  %v3692_v58 = vstv %s3676_s1  ;;  %v3694_v60 = vstv %s3679_s27  ;;  %s1738_s1 = scalar_lea.vmem %s1737_s28, 512 }
 0x1ef   : > { %v994_v7 = vmul.f32 %v3692_v58, %v2826_v34  ;;  %v3693_v11 = vmov %v3692_v58  ;;  %v1002_v35 = vmul.f32 %v3694_v60, %v2831_v59  ;;  %v3696_v32 = vstv %s3673_s29 }
 0x1f0   : > { %v995_v57 = vmul.f32 %v3693_v11, %v2829_v49  ;;  %v945_v47 = vmul.f32 %v3696_v32, %v3695_v22  ;;  %v954_v23 = vadd.f32 %v952_v30, %v922_v14  ;;  %v955_v12 = vadd.f32 %v953_v25, %v923_v15  ;;  %v3036_v22 = vld [vmem:[#allocation5 + $0xb] sm:$0xff] }
 0x1f1   : > { %v3698_v42 = vmov %v3694_v60  ;;  %v938_v24 = vadd.f32 %v936_v55, %v872_v56  ;;  %v939_v44 = vadd.f32 %v937_v10, %v873_v61  ;;  %v962_v34 = vadd.f32 %v960_v9, %v930_v4  ;;  %v1131_v55 = vld [vmem:[#allocation5] sm:$0xff]  ;;  %v1132_v61 = vld [vmem:[#allocation5 + $0x8] sm:$0xff] }
 0x1f2   : > { %v1003_v54 = vmul.f32 %v3698_v42, %v2833_v40  ;;  %v963_v49 = vadd.f32 %v961_v6, %v931_v50  ;;  %v946_v19 = vadd.f32 %v944_v29, %v914_v16  ;;  %v947_v27 = vadd.f32 %v945_v47, %v915_v20  ;;  %v1139_v4 = vld [vmem:[#allocation5 + $0x1] sm:$0xff]  ;;  %v1140_v9 = vld [vmem:[#allocation5 + $0x9] sm:$0xff] }
 0x1f3   : > { %v988_v59 = vadd.f32 %v986_v39, %v954_v23  ;;  %v989_v31 = vadd.f32 %v987_v28, %v955_v12  ;;  %v996_v58 = vadd.f32 %v994_v7, %v962_v34  ;;  %v1004_v15 = vadd.f32 %v1002_v35, %v938_v24  ;;  %v1147_v39 = vld [vmem:[#allocation5 + $0x2] sm:$0xff]  ;;  %v3056_v24 = vld [vmem:[#allocation5 + $0xd] sm:$0xff]  ;;  %v1197_v34 = vpop.permute.xlu0 %1196 }
 0x1f4   : > { %v997_v14 = vadd.f32 %v995_v57, %v963_v49  ;;  %v3702_v40 = vstv %s3697_s19  ;;  %v1005_v50 = vadd.f32 %v1003_v54, %v939_v44  ;;  %v3705_v10 = vstv %s3699_s17  ;;  %v3052_v54 = vld [vmem:[#allocation5 + $0xc] sm:$0xff]  ;;  %v1195_v44 = vpop.permute.xlu1 %1194 }
 0x1f5   : > { %v1010_v56 = vmul.f32 %v3702_v40, %v2836_v41  ;;  %v3704_v16 = vmov %v3702_v40  ;;  %v1018_v29 = vmul.f32 %v3705_v10, %v2840_v51  ;;  %v3707_v30 = vstv %s3488_s15  ;;  %v1148_v41 = vld [vmem:[#allocation5 + $0xa] sm:$0xff]  ;;  %s3718_s15 = sld [smem:[#allocation98_spill]] }
 0x1f6   : > { %v1011_v20 = vmul.f32 %v3704_v16, %v2838_v45  ;;  %v1026_v25 = vmul.f32 %v3707_v30, %v2847_v62  ;;  %v3708_v28 = vmov %v3707_v30  ;;  %v3709_v7 = vstv %s3700_s3  ;;  %v1155_v51 = vld [vmem:[#allocation5 + $0x3] sm:$0xff] }
 0x1f7   : > { %v1027_v6 = vmul.f32 %v3708_v28, %v2849_v5  ;;  %v1034_v11 = vmul.f32 %v3709_v7, %v2860_v38  ;;  %v3710_v57 = vstv %s3701_s24  ;;  %v3038_v62 = vld [vmem:[#allocation5 + $0x4] sm:$0xff]  ;;  %v3712_v32 = vmov %v3709_v7 }
 0x1f8   : > { %v1060_v45 = vmul.f32 %v3710_v57, %v2921_v18  ;;  %v3711_v60 = vmov %v3710_v57  ;;  %v1035_v47 = vmul.f32 %v3712_v32, %v2862_v46  ;;  %v3713_v5 = vstv %s3703_s13 }
 0x1f9   : > { %v1061_v35 = vmul.f32 %v3711_v60, %v2923_v17  ;;  %v1068_v23 = vmul.f32 %v3713_v5, %v2925_v13  ;;  %v3714_v38 = vmov %v3713_v5  ;;  %v3715_v18 = vstv %s3706_s16  ;;  %v3054_v17 = vld [vmem:[#allocation5 + $0x5] sm:$0xff] }
 0x1fa   : > { %v1069_v12 = vmul.f32 %v3714_v38, %v2939_v48  ;;  %v1076_v42 = vmul.f32 %v3715_v18, %v2941_v0  ;;  %v3716_v49 = vmov %v3705_v10  ;;  %v1028_v40 = vadd.f32 %v1026_v25, %v996_v58  ;;  %v3064_v48 = vld [vmem:[#allocation5 + $0x6] sm:$0xff]  ;;  %v3066_v0 = vld [vmem:[#allocation5 + $0xe] sm:$0xff] }
 0x1fb   : > { %v1019_v46 = vmul.f32 %v3716_v49, %v2845_v53  ;;  %v1029_v16 = vadd.f32 %v1027_v6, %v997_v14  ;;  %v3717_v13 = vmov %v3715_v18  ;;  %v1012_v30 = vadd.f32 %v1010_v56, %v946_v19  ;;  %1201 = vst.msk [vmem:[#allocation5] sm:$0xff] %vm249_vm3, %v1193_v33  ;;  %1202 = vst.msk [vmem:[#allocation5 + $0x8] sm:$0xff] %vm249_vm3, %v1195_v44 }
 0x1fc   : > { %v1077_v10 = vmul.f32 %v3717_v13, %v2943_v2  ;;  %v1013_v28 = vadd.f32 %v1011_v20, %v947_v27  ;;  %v1036_v7 = vadd.f32 %v1034_v11, %v1004_v15  ;;  %v1037_v57 = vadd.f32 %v1035_v47, %v1005_v50  ;;  %1203 = vst.msk [vmem:[#allocation5 + $0x10] sm:$0x3f] %vm326_vm5, %v1197_v34 }
 0x1fd   : > { %v1020_v53 = vadd.f32 %v1018_v29, %v988_v59  ;;  %v1021_v2 = vadd.f32 %v1019_v46, %v989_v31  ;;  %v1062_v19 = vadd.f32 %v1060_v45, %v1028_v40  ;;  %v1063_v27 = vadd.f32 %v1061_v35, %v1029_v16 }
 0x1fe   : > { %v1070_v58 = vadd.f32 %v1068_v23, %v1036_v7  ;;  %v1071_v14 = vadd.f32 %v1069_v12, %v1037_v57  ;;  %v1078_v15 = vadd.f32 %v1076_v42, %v1012_v30  ;;  %v3719_v33 = vstv %s3718_s15  ;;  %v1267_v23 = vpop.permute.xlu1 %1266 }
 0x1ff   : > { %v1084_v56 = vmul.f32 %v3719_v33, %v2951_v36  ;;  %v1079_v50 = vadd.f32 %v1077_v10, %v1013_v28  ;;  %v3720_v20 = vmov %v3719_v33  ;;  %v3721_v31 = vstv %s3504_s6  ;;  %s3735_s6 = sld [smem:[#allocation48_spill]] }
 0x200   : > { %v1085_v59 = vmul.f32 %v3720_v20, %v2953_v63  ;;  %v1092_v29 = vmul.f32 %v3721_v31, %v2955_v43  ;;  %v3722_v25 = vmov %v3721_v31  ;;  %v3723_v11 = vstv %s2416_s21  ;;  %s3753_s21 = sld [smem:[#allocation93_spill]] }
 0x201   : > { %v1093_v6 = vmul.f32 %v3722_v25, %v2957_v1  ;;  %v1100_v45 = vmul.f32 %v3723_v11, %v2959_v3  ;;  %v3724_v60 = vmov %v3723_v11  ;;  %v3725_v36 = vstv %s3505_s5 }
 0x202   : > { %v1101_v35 = vmul.f32 %v3724_v60, %v2961_v26  ;;  %v1108_v32 = vmul.f32 %v3725_v36, %v2963_v21  ;;  %v3726_v47 = vstv %s2435_s20  ;;  %v3728_v12 = vstv %s2441_s0  ;;  %v1205_v30 = vld [vmem:[#allocation5] sm:$0xff]  ;;  %s3734_s0 = sld [smem:[#allocation50_spill]]  ;;  %v1271_v11 = vpop.permute.xlu1 %1270 }
 0x203   : > { %v1134_v5 = vmul.f32 %v3726_v47, %v1131_v55  ;;  %v3727_v38 = vmov %v3726_v47  ;;  %v1142_v18 = vmul.f32 %v3728_v12, %v1139_v4  ;;  %v3729_v43 = vstv %s2447_s8  ;;  %v1213_v28 = vld [vmem:[#allocation5 + $0x1] sm:$0xff]  ;;  %v1214_v57 = vld [vmem:[#allocation5 + $0x9] sm:$0xff]  ;;  %s3737_s20 = sld [smem:[#allocation51_spill]] }
 0x204   : > { %v1135_v63 = vmul.f32 %v3727_v38, %v1132_v61  ;;  %v1150_v42 = vmul.f32 %v3729_v43, %v1147_v39  ;;  %v3730_v44 = vmov %v3729_v43  ;;  %v1102_v34 = vadd.f32 %v1100_v45, %v1070_v58  ;;  %v1206_v61 = vld [vmem:[#allocation5 + $0x8] sm:$0xff]  ;;  %s3739_s8 = sld [smem:[#allocation54_spill]] }
 0x205   : > { %v1151_v1 = vmul.f32 %v3730_v44, %v1148_v41  ;;  %v3731_v3 = vmov %v3725_v36  ;;  %v3732_v46 = vmov %v3728_v12  ;;  %v3733_v40 = vstv %s2453_s11  ;;  %v1221_v58 = vld [vmem:[#allocation5 + $0x2] sm:$0xff]  ;;  %v1238_v31 = vld [vmem:[#allocation5 + $0xc] sm:$0xff]  ;;  %s3744_s11 = sld [smem:[#allocation60_spill]] }
 0x206   : > { %v1109_v49 = vmul.f32 %v3731_v3, %v2965_v37  ;;  %v1143_v26 = vmul.f32 %v3732_v46, %v1140_v9  ;;  %v1158_v16 = vmul.f32 %v3733_v40, %v1155_v51  ;;  %v1086_v21 = vadd.f32 %v1084_v56, %v1020_v53  ;;  %v1222_v37 = vld [vmem:[#allocation5 + $0xa] sm:$0xff] }
 0x207   : > { %v1087_v13 = vadd.f32 %v1085_v59, %v1021_v2  ;;  %v1103_v55 = vadd.f32 %v1101_v35, %v1071_v14  ;;  %v1110_v10 = vadd.f32 %v1108_v32, %v1078_v15  ;;  %v1094_v4 = vadd.f32 %v1092_v29, %v1062_v19  ;;  %v1229_v2 = vld [vmem:[#allocation5 + $0x3] sm:$0xff]  ;;  %v1230_v14 = vld [vmem:[#allocation5 + $0xb] sm:$0xff] }
 0x208   : > { %v1095_v39 = vadd.f32 %v1093_v6, %v1063_v27  ;;  %v1111_v41 = vadd.f32 %v1109_v49, %v1079_v50  ;;  %v1136_v7 = vadd.f32 %v1134_v5, %v1102_v34  ;;  %v1152_v51 = vadd.f32 %v1150_v42, %v1086_v21  ;;  %v1237_v15 = vld [vmem:[#allocation5 + $0x4] sm:$0xff]  ;;  %v1246_v25 = vld [vmem:[#allocation5 + $0xd] sm:$0xff]  ;;  %v1269_v6 = vpop.permute.xlu0 %1268 }
 0x209   : > { %v1137_v33 = vadd.f32 %v1135_v63, %v1103_v55  ;;  %v1144_v9 = vadd.f32 %v1142_v18, %v1110_v10  ;;  %v1153_v53 = vadd.f32 %v1151_v1, %v1087_v13  ;;  %v3736_v27 = vmov %v3733_v40  ;;  %v1245_v29 = vld [vmem:[#allocation5 + $0x5] sm:$0xff] }
 0x20a   : > { %v1145_v19 = vadd.f32 %v1143_v26, %v1111_v41  ;;  %v1159_v56 = vmul.f32 %v3736_v27, %v3036_v22  ;;  %v1160_v50 = vadd.f32 %v1158_v16, %v1094_v4  ;;  %v3738_v20 = vstv %s2459_s25  ;;  %v1253_v38 = vld [vmem:[#allocation5 + $0x6] sm:$0xff]  ;;  %s3774_s25 = sld [smem:[#allocation22_spill]] }
 0x20b   : > { %v1166_v59 = vmul.f32 %v3738_v20, %v3038_v62  ;;  %v3740_v45 = vstv %s3734_s0  ;;  %v3742_v22 = vstv %s2505_s26  ;;  %v1254_v62 = vld [vmem:[#allocation5 + $0xe] sm:$0xff]  ;;  %v3745_v63 = vstv %s3735_s6  ;;  %1275 = vst.msk [vmem:[#allocation5] sm:$0xff] %vm249_vm3, %v1267_v23  ;;  %s3751_s26 = sld [smem:[#allocation27_spill]] }
 0x20c   : > { %v1182_v60 = vmul.f32 %v3740_v45, %v3064_v48  ;;  %v3741_v35 = vmov %v3740_v45  ;;  %v1216_v32 = vmul.f32 %v3742_v22, %v1213_v28  ;;  %v3743_v47 = vmov %v3742_v22  ;;  %1276 = vst.msk [vmem:[#allocation5 + $0x8] sm:$0xff] %vm249_vm3, %v1269_v6 }
 0x20d   : > { %v1183_v36 = vmul.f32 %v3741_v35, %v3066_v0  ;;  %v1217_v5 = vmul.f32 %v3743_v47, %v1214_v57  ;;  %v1174_v12 = vmul.f32 %v3745_v63, %v3054_v17  ;;  %v3746_v18 = vmov %v3745_v63  ;;  %1277 = vst.msk [vmem:[#allocation5 + $0x10] sm:$0x3f] %vm326_vm5, %v1271_v11 }
 0x20e   : > { %v1175_v43 = vmul.f32 %v3746_v18, %v3056_v24  ;;  %v3747_v42 = vstv %s3737_s20  ;;  %v3748_v44 = vstv %s3739_s8  ;;  %v1184_v0 = vadd.f32 %v1182_v60, %v1152_v51 }
 0x20f   : > { %v1208_v48 = vmul.f32 %v3747_v42, %v1205_v30  ;;  %v1224_v1 = vmul.f32 %v3748_v44, %v1221_v58  ;;  %v1185_v34 = vadd.f32 %v1183_v36, %v1153_v53  ;;  %v3749_v3 = vmov %v3747_v42 }
 0x210   : > { %v1209_v49 = vmul.f32 %v3749_v3, %v1206_v61  ;;  %v3750_v46 = vmov %v3748_v44  ;;  %v1161_v24 = vadd.f32 %v1159_v56, %v1095_v39  ;;  %v3752_v26 = vmov %v3738_v20  ;;  %p3776_p7 = scmp.ne.s32.totalorder %s3774_s25, 0 }
 0x211   : > { %v1225_v17 = vmul.f32 %v3750_v46, %v1222_v37  ;;  %v1167_v40 = vmul.f32 %v3752_v26, %v3052_v54  ;;  %v1176_v16 = vadd.f32 %v1174_v12, %v1144_v9  ;;  %v3754_v21 = vstv %s3744_s11 }
 0x212   : > { %v1232_v23 = vmul.f32 %v3754_v21, %v1229_v2  ;;  %v1177_v13 = vadd.f32 %v1175_v43, %v1145_v19  ;;  %v1218_v55 = vadd.f32 %v1216_v32, %v1184_v0  ;;  %v1219_v10 = vadd.f32 %v1217_v5, %v1185_v34  ;;  %v1279_v11 = vld [vmem:[#allocation5] sm:$0xff] }
 0x213   : > { %v3755_v30 = vmov %v3754_v21  ;;  %v1168_v61 = vadd.f32 %v1166_v59, %v1136_v7  ;;  %v1169_v4 = vadd.f32 %v1167_v40, %v1137_v33  ;;  %v1210_v41 = vadd.f32 %v1208_v48, %v1176_v16  ;;  %v1287_v45 = vld [vmem:[#allocation5 + $0x1] sm:$0xff] }
 0x214   : > { %v1233_v28 = vmul.f32 %v3755_v30, %v1230_v14  ;;  %v1226_v57 = vadd.f32 %v1224_v1, %v1160_v50  ;;  %v1211_v39 = vadd.f32 %v1209_v49, %v1177_v13  ;;  %v1227_v58 = vadd.f32 %v1225_v17, %v1161_v24  ;;  %v1295_v47 = vld [vmem:[#allocation5 + $0x2] sm:$0xff]  ;;  %v1296_v5 = vld [vmem:[#allocation5 + $0xa] sm:$0xff] }
 0x215   : > { %v3756_v54 = vstv %s3751_s26  ;;  %v1234_v53 = vadd.f32 %v1232_v23, %v1168_v61  ;;  %v3758_v2 = vstv %s3753_s21  ;;  %v3760_v14 = vstv %s2586_s14  ;;  %v1303_v48 = vld [vmem:[#allocation5 + $0x3] sm:$0xff]  ;;  %v1304_v44 = vld [vmem:[#allocation5 + $0xb] sm:$0xff]  ;;  %s3772_s14 = sld [smem:[#allocation26_spill]] }
 0x216   : > { %v1248_v37 = vmul.f32 %v3756_v54, %v1245_v29  ;;  %v3757_v9 = vmov %v3756_v54  ;;  %v1240_v19 = vmul.f32 %v3758_v2, %v1237_v15  ;;  %v3759_v27 = vmov %v3758_v2  ;;  %v1280_v29 = vld [vmem:[#allocation5 + $0x8] sm:$0xff] }
 0x217   : > { %v1249_v51 = vmul.f32 %v3757_v9, %v1246_v25  ;;  %v1241_v56 = vmul.f32 %v3759_v27, %v1238_v31  ;;  %v1256_v20 = vmul.f32 %v3760_v14, %v1253_v38  ;;  %v1235_v7 = vadd.f32 %v1233_v28, %v1169_v4  ;;  %v1288_v31 = vld [vmem:[#allocation5 + $0x9] sm:$0xff] }
 0x218   : > { %v1250_v33 = vadd.f32 %v1248_v37, %v1218_v55  ;;  %v3761_v59 = vmov %v3760_v14  ;;  %v3762_v60 = vstv %s2600_s30  ;;  %v3764_v22 = vstv %s2608_s4  ;;  %v1311_v1 = vld [vmem:[#allocation5 + $0x4] sm:$0xff]  ;;  %v1312_v17 = vld [vmem:[#allocation5 + $0xc] sm:$0xff] }
 0x219   : > { %v1251_v50 = vadd.f32 %v1249_v51, %v1219_v10  ;;  %v1257_v6 = vmul.f32 %v3761_v59, %v1254_v62  ;;  %v1258_v25 = vadd.f32 %v1256_v20, %v1226_v57  ;;  %v1282_v35 = vmul.f32 %v3762_v60, %v1279_v11  ;;  %v1319_v24 = vld [vmem:[#allocation5 + $0x5] sm:$0xff]  ;;  %v1320_v26 = vld [vmem:[#allocation5 + $0xd] sm:$0xff] }
 0x21a   : > { %v3763_v36 = vmov %v3762_v60  ;;  %v1290_v32 = vmul.f32 %v3764_v22, %v1287_v45  ;;  %v3765_v63 = vmov %v3764_v22  ;;  %v3766_v18 = vstv %s2620_s2  ;;  %v1327_v55 = vld [vmem:[#allocation5 + $0x6] sm:$0xff]  ;;  %v1328_v10 = vld [vmem:[#allocation5 + $0xe] sm:$0xff] }
 0x21b   : > { %v1283_v15 = vmul.f32 %v3763_v36, %v1280_v29  ;;  %v1259_v38 = vadd.f32 %v1257_v6, %v1227_v58  ;;  %v1291_v12 = vmul.f32 %v3765_v63, %v1288_v31  ;;  %v1298_v62 = vmul.f32 %v3766_v18, %v1295_v47  ;;  %s1365_s18 = scalar_lea.sflag [#allocation9], %s3772_s14 }
 0x21c   : > { %v3767_v43 = vmov %v3766_v18  ;;  %v1284_v0 = vadd.f32 %v1282_v35, %v1250_v33  ;;  %v1292_v3 = vadd.f32 %v1290_v32, %v1258_v25  ;;  %v3768_v49 = vstv %s2630_s22  ;;  %s3773_s22 = sld [smem:[#allocation19_spill]] }
 0x21d   : > { %v1299_v42 = vmul.f32 %v3767_v43, %v1296_v5  ;;  %v1285_v34 = vadd.f32 %v1283_v15, %v1251_v50  ;;  %v1306_v46 = vmul.f32 %v3768_v49, %v1303_v48  ;;  %v1293_v40 = vadd.f32 %v1291_v12, %v1259_v38 }
 0x21e   : > { %v1300_v16 = vadd.f32 %v1298_v62, %v1234_v53  ;;  %v3769_v23 = vmov %v3768_v49  ;;  %v1242_v30 = vadd.f32 %v1240_v19, %v1210_v41  ;;  %v3770_v28 = vstv %s2654_s12  ;;  %s1485_s12 = sshll.u32 %s3772_s14, 4 }
 0x21f   : > { %v1301_v21 = vadd.f32 %v1299_v42, %v1235_v7  ;;  %v1307_v13 = vmul.f32 %v3769_v23, %v1304_v44  ;;  %v1314_v61 = vmul.f32 %v3770_v28, %v1311_v1  ;;  %v3771_v4 = vmov %v3770_v28  ;;  %s220_s30 = scalar_lea.vmem [#allocation12], %s1485_s12 }
 0x220   : > { %v1315_v57 = vmul.f32 %v3771_v4, %v1312_v17  ;;  %v1322_v58 = vmul.f32 %v1321_v52, %v1319_v24  ;;  %v1243_v54 = vadd.f32 %v1241_v56, %v1211_v39  ;;  %v1323_v37 = vmul.f32 %v1321_v52, %v1320_v26  ;;  %s1378_s4 = sshll.u32 %s220_s30, 4  ;;  %s3196_s4 = int_to_ptr.vmem [resolvable:$true] %s1378_s4 }
 0x221   : > { %v1330_v9 = vmul.f32 %v1329_v8, %v1327_v55  ;;  %v1331_v51 = vmul.f32 %v1329_v8, %v1328_v10  ;;  %v1308_v53 = vadd.f32 %v1306_v46, %v1242_v30  ;;  %v1316_v2 = vadd.f32 %v1314_v61, %v1284_v0  ;;  %s1732_s29 = scalar_lea.vmem %s3196_s4, 256  ;;  %p1739_p1 = scmp.lt.s32.totalorder %s3196_s4, %s1737_s28 }
 0x222   : > { %v1317_v27 = vadd.f32 %v1315_v57, %v1285_v34  ;;  %v1324_v14 = vadd.f32 %v1322_v58, %v1292_v3  ;;  %v1309_v20 = vadd.f32 %v1307_v13, %v1243_v54  ;;  %v1325_v7 = vadd.f32 %v1323_v37, %v1293_v40  ;;  %s1595_s5 = sshll.u32 %s3773_s22, 8  ;;  %p1733_p3 = scmp.ne.s32.totalorder %s3196_s4, %s1732_s29 }
 0x223   : > { %v1332_v41 = vadd.f32 %v1330_v9, %v1300_v16  ;;  %v1333_v19 = vadd.f32 %v1331_v51, %v1301_v21  ;;  %s3194_s23 = scalar_lea.hbm %s3775_s9, %s1595_s5  ;;  %p1740_p10 = scmp.lt.s32.totalorder %s1738_s1, %s1732_s29 }
 0x224   : > { %v1336_v33 = vadd.f32 %v1324_v14, %v1316_v2  ;;  %v1337_v6 = vadd.f32 %v1325_v7, %v1317_v27  ;;  %p1734_p12 = pnand %p1733_p3, %p3776_p7 }
 0x225   : > { %v1334_v50 = vadd.f32 %v1332_v41, %v1308_v53  ;;  %v1335_v59 = vadd.f32 %v1333_v19, %v1309_v20  ;;  %p1741_p8 = por %p1740_p10, %p1739_p1 }
 0x226   : > { %p1735_p2 = pneg %p1734_p12 }
 0x227   : > { %v1338_v11 = vadd.f32 %v1336_v33, %v1334_v50  ;;  %v1339_v39 = vadd.f32 %v1337_v6, %v1335_v59 }
 0x228   : > { %p1742_p9 = pnand %p1741_p8, %p1735_p2 }
 0x229   : > { %v1340_v52 = vsub.f32 0.0, %v1338_v11  ;;  %v1341_v56 = vsub.f32 0.0, %v1339_v39 }
 0x22b   : > { %v1342_v29 = vmul.f32 1.442695, %v1340_v52  ;;  %v1344_v45 = vmul.f32 1.442695, %v1341_v56 }
 0x22d   : > { %1681 = vpow2.f32 %v1342_v29 }
 0x22e   : > { %1683 = vpow2.f32 %v1344_v45 }
 0x23a   : > { %v1682_v8 = vpop.eup %1681 }
 0x23b   : > { %v1684_v25 = vpop.eup %1683  ;;  %v1346_v60 = vadd.f32 1.0, %v1682_v8 }
 0x23c   : > { %v1347_v35 = vadd.f32 1.0, %v1684_v25 }
 0x23d   : > { %1685 = vrcp.f32 %v1346_v60 }
 0x23e   : > { %1687 = vrcp.f32 %v1347_v35 }
 0x24a   : > { %v1686_v36 = vpop.eup %1685 }
 0x24b   : > { %v1688_v15 = vpop.eup %1687  ;;  %v1350_v31 = vmul.f32 %v1686_v36, %v1346_v60 }
 0x24c   : > { %v1351_v22 = vmul.f32 %v1688_v15, %v1347_v35 }
 0x24d   : > { %v1352_v32 = vsub.f32 2.0, %v1350_v31 }
 0x24e   : > { %v1353_v47 = vsub.f32 2.0, %v1351_v22 }
 0x24f   : > { %v1354_v5 = vmul.f32 %v1686_v36, %v1352_v32 }
 0x250   : > { %v1355_v38 = vmul.f32 %v1688_v15, %v1353_v47 }
 0x251   : > { %v1356_v63 = vmul.f32 %v1354_v5, %v1346_v60 }
 0x252   : > { %v1357_v12 = vmul.f32 %v1355_v38, %v1347_v35 }
 0x253   : > { %v1358_v18 = vsub.f32 2.0, %v1356_v63 }
 0x254   : > { %v1359_v62 = vsub.f32 2.0, %v1357_v12 }
 0x255   : > { %v1360_v43 = vmul.f32 %v1358_v18, %v1354_v5 }
 0x256   : > { %v1361_v42 = vmul.f32 %v1359_v62, %v1355_v38 }
 0x257   : > { %1362 = vst.msk [vmem:[%s220_s30] sm:$0xff] %vm249_vm3, %v1360_v43 }
 0x258   : > { %1363 = vst.msk [vmem:[%s220_s30 + $0x8] sm:$0xff] %vm249_vm3, %v1361_v42 }
 0x259   : > { %1745 = shalt.err (!%p1742_p9)
}
 0x25a   : > { %s1746_s27 = scalar_lea.hbm %s3194_s23, 256  ;;  %s1750_s3 = scalar_lea.hbm %s3775_s9, 512 }
 0x25b   : > { %p1747_p13 = scmp.ne.s32.totalorder %s3194_s23, %s1746_s27  ;;  %p1751_p11 = scmp.lt.s32.totalorder %s3194_s23, %s3775_s9 }
 0x25c   : > { %p1752_p5 = scmp.lt.s32.totalorder %s1750_s3, %s1746_s27 }
 0x25d   : > { %p1748_p4 = pnand %p1747_p13, %p3776_p7 }
 0x25e   : > { %p1753_p0 = por %p1752_p5, %p1751_p11 }
 0x25f   : > { %p1749_p6 = pneg %p1748_p4 }
 0x261   : > { %p1754_p3 = pnand %p1753_p0, %p1749_p6 }
 0x263   : > { %1757 = shalt.err (!%p1754_p3)
}
 0x264   : > { %s1831_s16 = smov 128   ;;  %s1832_s15 = smov 8  }
 0x265   : > { %1602 = dma.vmem_to_hbm [thread:$0]  (%p3776_p7), %s3196_s4, 256, %s3194_s23, %s1365_s18, %s1831_s16, %s1831_s16, %s1832_s15  }
 0x266 PF: > { %s3777_s0 = sld [smem:[#allocation16_spill]] }
 0x267   : > { %s3778_s6 = sld [smem:[#allocation23_spill]] }
 0x268   : > { %s3779_s20 = sld [smem:[#allocation21_spill]] }
 0x26c   : > { %s1393_s8 = sand.u32 1, %s3777_s0  }
 0x26d   : > { %p3780_p12 = scmp.ne.s32.totalorder %s3778_s6, 0  ;;  %s1394_s11 = scalar_lea.sflag [#allocation9], %s1393_s8 }
 0x26e   : > { %p3781_p2 = scmp.ge.s32.totalorder %s3779_s20, 2 }
 0x270   : > { %p1613_p1 = pnand %p3781_p2, %p3780_p12 }
 0x272   : > { %p1614_p10 = pneg %p1613_p1 }
 0x274   : > { %1791 = dma.done.wait (%p1614_p10), %s1394_s11, 256  }
 0x275   : > { %1793 = vsyncadd (%p1614_p10), %s1394_s11, 4294967040  ;;  %s21_s19 = sadd.s32 1, %s3779_s20   ;;  %s3782_s14 = sld [smem:[#allocation17_spill]] }
 0x276   : > { %p18_p8 = scmp.ge.s32.totalorder %s21_s19, 4   ;;  %s3783_s15 = sld [smem:[#allocation18_spill]] }
 0x277   : > { %s3784_s16 = sld [smem:[#allocation25_spill]] }
 0x278   : > { %s3785_s17 = sld [smem:[#allocation20_spill]]  ;;  %20 = sbr.rel (!%p18_p8) target bundleno = 12 (0xc), region = 98 }
 0x279   : > { %s3786_s18 = sld [smem:[#allocation24_spill]] }
 0x27d   :  { %1399 = vsyncpa [#allocation8], 1 }
 0x27e   :  { %1401 = vsyncpa [#allocation8 + $0x1], 1 }
 0x27f   :  { %1402 = vsyncpa [#allocation9], 1 }
 0x280   :  { %1404 = vsyncpa [#allocation9 + $0x1], 1 }
 0x281   :  { %1405 = vsyncpa [#allocation10], 1 }
 0x282   :  { %1407 = vsyncpa [#allocation10 + $0x1], 1 }

</bundles_post_ra>
